<compile_context>
chip_gen: v7x
topology: tpu7x:2x2x1
jax: 0.10.0
libtpu: 0.0.40
codegen_flags: <defaults>
</compile_context>

<pallas_src>
import functools

import jax
import jax.numpy as jnp
import numpy as np
from jax.experimental import pallas as pl
from jax.experimental.pallas import tpu as pltpu


# ---------------------------------------------------------------------------
# Fixed layer geometry (input 14x14 is implied by the architecture:
# 14 -conv5-> 10 -pool-> 5 -pad+conv4-> 4 -pool-> 2 -conv2-> 1  => 128 features).
# ---------------------------------------------------------------------------
_IMG = 14
_LANES_IN = 256            # 14*14 = 196 pixels, zero-padded to 2*128 lanes
_C1_BLOCK = 896            # per pool-window block: 5*5*32 = 800, padded to 7*128
_C1_PRE = 4 * _C1_BLOCK    # conv1 pre-pool lanes, ordered (pool_pos, i, j, c)
_C2_BLOCK = 256            # per pool-window block: 2*2*64
_C2_PRE = 4 * _C2_BLOCK    # conv2 pre-pool lanes
_FEAT = 128                # conv3 output channels (== flattened feature size)
_HEAD = 128                # lin0 (10) and lin1 (2) outputs zero-padded to 128 lanes
_CHUNK = 8                 # images per branch per grid step (raise for big batches)


# ---------------------------------------------------------------------------
# The fused Pallas kernel: whole forward for one batch chunk (both branches).
# Rows 0..half-1 are branch-1 images, rows half..2*half-1 are branch-2 images.
# ---------------------------------------------------------------------------
def _fused_kernel(x_ref, m1_ref, b1_ref, m2_ref, b2_ref, m3_ref, b3_ref,
                  w0_ref, b0_ref, w1_ref, bl1_ref, o_ref, *, half):
    f32 = jnp.float32
    bf16 = jnp.bfloat16

    # conv1 + folded BN (dense matmul over flattened pixels) + ReLU.
    a1 = jnp.dot(x_ref[...], m1_ref[...], preferred_element_type=f32) + b1_ref[...]
    a1 = jnp.maximum(a1, 0.0)                                     # [2*half, 3584]
    # maxpool1 2x2: the 4 window positions are 4 lane-aligned 896-lane blocks.
    p1 = jnp.maximum(jnp.maximum(a1[:, 0:896], a1[:, 896:1792]),
                     jnp.maximum(a1[:, 1792:2688], a1[:, 2688:3584]))

    # conv2 (pad=1) + folded BN as ONE K=896 matmul + ReLU.
    a2 = jnp.dot(p1.astype(bf16), m2_ref[...], preferred_element_type=f32) + b2_ref[...]
    a2 = jnp.maximum(a2, 0.0)                                     # [2*half, 1024]
    # maxpool2 2x2: 4 lane-aligned 256-lane blocks.
    p2 = jnp.maximum(jnp.maximum(a2[:, 0:256], a2[:, 256:512]),
                     jnp.maximum(a2[:, 512:768], a2[:, 768:1024]))

    # conv3 + folded BN (no ReLU): dense 256 -> 128.
    feat = jnp.dot(p2.astype(bf16), m3_ref[...], preferred_element_type=f32) + b3_ref[...]

    # Siamese head: lin0 + ReLU on both branches (stacked rows), subtract, lin1.
    h = jnp.dot(feat.astype(bf16), w0_ref[...], preferred_element_type=f32) + b0_ref[...]
    h = jnp.maximum(h, 0.0)                                       # [2*half, 128]
    dif = h[:half, :] - h[half:, :]                               # [half, 128]
    # lin1 zero-padded to 128 output lanes -> lane-dense store (wrapper slices :2).
    o_ref[...] = jnp.dot(dif.astype(bf16), w1_ref[...], preferred_element_type=f32) + bl1_ref[...]


# ---------------------------------------------------------------------------
# Synthetic parameters in PyTorch layout (conv [Cout,Cin,Kh,Kw], BN eval stats,
# Linear [out,in]).
# ---------------------------------------------------------------------------
def init_params(key):
    ks = jax.random.split(key, 14)

    def bn(k, c):
        k1, k2, k3, k4 = jax.random.split(k, 4)
        gamma = 1.0 + 0.05 * jax.random.normal(k1, (c,), jnp.float32)
        beta = 0.05 * jax.random.normal(k2, (c,), jnp.float32)
        mean = 0.05 * jax.random.normal(k3, (c,), jnp.float32)
        var = 1.0 + 0.05 * jnp.abs(jax.random.normal(k4, (c,), jnp.float32))
        return (gamma, beta, mean, var)

    return {
        "w1": 0.1 * jax.random.normal(ks[0], (32, 1, 5, 5), jnp.float32),
        "b1": 0.05 * jax.random.normal(ks[1], (32,), jnp.float32),
        "bn1": bn(ks[2], 32),
        "w2": 0.1 * jax.random.normal(ks[3], (64, 32, 4, 4), jnp.float32),
        "b2": 0.05 * jax.random.normal(ks[4], (64,), jnp.float32),
        "bn2": bn(ks[5], 64),
        "w3": 0.1 * jax.random.normal(ks[6], (128, 64, 2, 2), jnp.float32),
        "b3": 0.05 * jax.random.normal(ks[7], (128,), jnp.float32),
        "bn3": bn(ks[8], 128),
        "w0": 0.1 * jax.random.normal(ks[9], (10, 128), jnp.float32),
        "b0": 0.05 * jax.random.normal(ks[10], (10,), jnp.float32),
        "wl1": 0.1 * jax.random.normal(ks[11], (2, 10), jnp.float32),
        "bl1": 0.05 * jax.random.normal(ks[12], (2,), jnp.float32),
    }


# ---------------------------------------------------------------------------
# Host-side builder: fold BN and turn each conv (+padding +im2col +pool-friendly
# output ordering) into one fixed dense matrix.  Sizes are batch-independent.
# ---------------------------------------------------------------------------
def build_dense_params(p):
    def fold(gamma, beta, mean, var, eps=1e-5):
        s = gamma / np.sqrt(var + eps)
        return s, beta - mean * s

    w1 = np.asarray(p["w1"]); s1, t1 = fold(*[np.asarray(a) for a in p["bn1"]])
    w2 = np.asarray(p["w2"]); s2, t2 = fold(*[np.asarray(a) for a in p["bn2"]])
    w3 = np.asarray(p["w3"]); s3, t3 = fold(*[np.asarray(a) for a in p["bn3"]])
    w1f = w1 * s1[:, None, None, None]; b1f = np.asarray(p["b1"]) * s1 + t1
    w2f = w2 * s2[:, None, None, None]; b2f = np.asarray(p["b2"]) * s2 + t2
    w3f = w3 * s3[:, None, None, None]; b3f = np.asarray(p["b3"]) * s3 + t3

    # conv1: flattened 14x14 pixel -> pre-pool lanes (pool_pos, ip, jp, c).
    m1 = np.zeros((_LANES_IN, _C1_PRE), np.float32)
    bias1 = np.zeros((_C1_PRE,), np.float32)
    for pp in range(4):
        pi, pj = divmod(pp, 2)
        for ip in range(5):
            for jp in range(5):
                i1, j1 = 2 * ip + pi, 2 * jp + pj          # conv1 output coords (10x10)
                base = pp * _C1_BLOCK + (ip * 5 + jp) * 32
                bias1[base:base + 32] = b1f
                for di in range(5):
                    for dj in range(5):
                        q = (i1 + di) * _IMG + (j1 + dj)
                        m1[q, base:base + 32] = w1f[:, 0, di, dj]

    # conv2 (pad=1): pool1 lanes (ip, jp, cin) -> pre-pool lanes (pool_pos, i2, j2, cout).
    m2 = np.zeros((_C1_BLOCK, _C2_PRE), np.float32)
    bias2 = np.tile(b2f, _C2_PRE // 64).astype(np.float32)
    for pp in range(4):
        pi, pj = divmod(pp, 2)
        for i2 in range(2):
            for j2 in range(2):
                i1, j1 = 2 * i2 + pi, 2 * j2 + pj          # conv2 output coords (4x4)
                obase = pp * _C2_BLOCK + (i2 * 2 + j2) * 64
                for di in range(4):
                    for dj in range(4):
                        ii, jj = i1 + di - 1, j1 + dj - 1  # pool1 coords (pad = 1)
                        if 0 <= ii < 5 and 0 <= jj < 5:
                            ibase = (ii * 5 + jj) * 32
                            m2[ibase:ibase + 32, obase:obase + 64] = w2f[:, :, di, dj].T

    # conv3: pool2 lanes (i, j, cin) -> 128 feature lanes (full dense map).
    m3 = np.zeros((_C2_BLOCK, _FEAT), np.float32)
    for di in range(2):
        for dj in range(2):
            ibase = (di * 2 + dj) * 64
            m3[ibase:ibase + 64, :] = w3f[:, :, di, dj].T
    bias3 = b3f.astype(np.float32)

    # Heads, zero-padded to 128 lanes (padding lanes stay exactly 0 through ReLU).
    w0p = np.zeros((_FEAT, _HEAD), np.float32); w0p[:, :10] = np.asarray(p["w0"]).T
    b0p = np.zeros((_HEAD,), np.float32);       b0p[:10] = np.asarray(p["b0"])
    w1p = np.zeros((_HEAD, _HEAD), np.float32); w1p[:10, :2] = np.asarray(p["wl1"]).T
    bl1p = np.zeros((_HEAD,), np.float32);      bl1p[:2] = np.asarray(p["bl1"])

    bf16, f32 = jnp.bfloat16, jnp.float32
    return {
        "m1": jnp.asarray(m1, bf16), "b1": jnp.asarray(bias1[None, :], f32),
        "m2": jnp.asarray(m2, bf16), "b2": jnp.asarray(bias2[None, :], f32),
        "m3": jnp.asarray(m3, bf16), "b3": jnp.asarray(bias3[None, :], f32),
        "w0": jnp.asarray(w0p, bf16), "b0": jnp.asarray(b0p[None, :], f32),
        "w1": jnp.asarray(w1p, bf16), "bl1": jnp.asarray(bl1p[None, :], f32),
    }


# ---------------------------------------------------------------------------
# Forward pass: one pallas_call, grid over batch chunks (batch axis "parallel").
# ---------------------------------------------------------------------------
@jax.jit
def b_siamese_forward(x1, x2, dp):
    nb = x1.shape[0]
    c = _CHUNK
    nsteps = -(-nb // c)
    b_pad = nsteps * c

    def prep(x):  # flatten 14x14 -> 196 lanes, zero-pad lanes/batch, cast bf16
        xf = x.reshape(nb, -1).astype(jnp.float32)
        xf = jnp.pad(xf, ((0, b_pad - nb), (0, _LANES_IN - xf.shape[1])))
        return xf.astype(jnp.bfloat16).reshape(nsteps, c, _LANES_IN)

    # Per grid step: rows [0:c] = x1 chunk, rows [c:2c] = x2 chunk.
    xs = jnp.concatenate([prep(x1), prep(x2)], axis=1).reshape(nsteps * 2 * c, _LANES_IN)

    const = lambda i: (0, 0)      # weights: DMA'd once, resident for the whole grid
    grid_spec = pltpu.PrefetchScalarGridSpec(
        num_scalar_prefetch=0,
        grid=(nsteps,),
        in_specs=[
            pl.BlockSpec((2 * c, _LANES_IN), lambda i: (i, 0)),   # streamed images
            pl.BlockSpec((_LANES_IN, _C1_PRE), const),            # conv1 dense
            pl.BlockSpec((1, _C1_PRE), const),
            pl.BlockSpec((_C1_BLOCK, _C2_PRE), const),            # conv2 dense
            pl.BlockSpec((1, _C2_PRE), const),
            pl.BlockSpec((_C2_BLOCK, _FEAT), const),              # conv3 dense
            pl.BlockSpec((1, _FEAT), const),
            pl.BlockSpec((_FEAT, _HEAD), const),                  # lin0 (padded)
            pl.BlockSpec((1, _HEAD), const),
            pl.BlockSpec((_HEAD, _HEAD), const),                  # lin1 (padded)
            pl.BlockSpec((1, _HEAD), const),
        ],
        out_specs=pl.BlockSpec((c, _HEAD), lambda i: (i, 0)),
    )
    out = pl.pallas_call(
        functools.partial(_fused_kernel, half=c),
        out_shape=jax.ShapeDtypeStruct((b_pad, _HEAD), jnp.float32),
        grid_spec=grid_spec,
        compiler_params=pltpu.CompilerParams(
            dimension_semantics=("parallel",),          # batch chunks independent
            vmem_limit_bytes=32 * 1024 * 1024),          # ~8 MB working set + headroom
    )(xs, dp["m1"], dp["b1"], dp["m2"], dp["b2"], dp["m3"], dp["b3"],
      dp["w0"], dp["b0"], dp["w1"], dp["bl1"])
    return out[:nb, :2]


# ---------------------------------------------------------------------------
# Pure-JAX reference: direct convolutions from the ORIGINAL (unfolded) params,
# eval-mode BatchNorm, max-pools, linear head.  Independent of the dense folding.
# ---------------------------------------------------------------------------
@jax.jit
def reference_forward(x1, x2, p):
    hp = jax.lax.Precision.HIGHEST

    def conv(a, w, b, pad=0):
        out = jax.lax.conv_general_dilated(
            a, w, window_strides=(1, 1), padding=[(pad, pad), (pad, pad)],
            dimension_numbers=("NCHW", "OIHW", "NCHW"), precision=hp)
        return out + b.reshape(1, -1, 1, 1)

    def bn(a, gamma, beta, mean, var, eps=1e-5):
        inv = gamma / jnp.sqrt(var + eps)
        return (a - mean.reshape(1, -1, 1, 1)) * inv.reshape(1, -1, 1, 1) \
            + beta.reshape(1, -1, 1, 1)

    def pool(a):
        n, ch, h, w = a.shape
        return a.reshape(n, ch, h // 2, 2, w // 2, 2).max(axis=(3, 5))

    def pre(x):
        a = pool(jax.nn.relu(bn(conv(x, p["w1"], p["b1"]), *p["bn1"])))
        a = pool(jax.nn.relu(bn(conv(a, p["w2"], p["b2"], pad=1), *p["bn2"])))
        a = bn(conv(a, p["w3"], p["b3"]), *p["bn3"])
        f = a.reshape(a.shape[0], -1)
        return jax.nn.relu(jnp.dot(f, p["w0"].T, precision=hp) + p["b0"])

    dif = pre(x1) - pre(x2)
    return jnp.dot(dif, p["wl1"].T, precision=hp) + p["bl1"]


# ---------------------------------------------------------------------------
if __name__ == "__main__":
    key = jax.random.PRNGKey(0)
    kp, kx1, kx2 = jax.random.split(key, 3)
    params = init_params(kp)
    dense = build_dense_params(params)

    # Small test: batch=2 (single grid step after padding to the chunk size).
    x1 = jax.random.normal(kx1, (2, 1, _IMG, _IMG), jnp.float32)
    x2 = jax.random.normal(kx2, (2, 1, _IMG, _IMG), jnp.float32)
    out = jax.block_until_ready(b_siamese_forward(x1, x2, dense))
    ref = jax.block_until_ready(reference_forward(x1, x2, params))
    assert out.shape == (2, 2) and out.dtype == jnp.float32
    # Tolerance sized for bf16 MXU operands with f32 accumulation (f32-only path
    # matches at ~1e-5; bf16 rounding across 5 chained matmuls stays well below 1e-2).
    np.testing.assert_allclose(np.asarray(out), np.asarray(ref), rtol=2e-2, atol=2e-2)

    # Multi-step grid check: batch=20 -> padded to 24, grid=(3,) batch chunks.
    kx3, kx4 = jax.random.split(kx2)
    x1b = jax.random.normal(kx3, (20, 1, _IMG, _IMG), jnp.float32)
    x2b = jax.random.normal(kx4, (20, 1, _IMG, _IMG), jnp.float32)
    outb = jax.block_until_ready(b_siamese_forward(x1b, x2b, dense))
    refb = jax.block_until_ready(reference_forward(x1b, x2b, params))
    np.testing.assert_allclose(np.asarray(outb), np.asarray(refb), rtol=2e-2, atol=2e-2)

    print("KERNEL_OK")
</pallas_src>

<mosaic_0001>
module attributes {stable_mosaic.version = 11 : i64} {
  func.func @_fused_kernel(%arg0: i32, %arg1: memref<16x256xbf16, #tpu.memory_space<vmem>>, %arg2: memref<256x3584xbf16, #tpu.memory_space<vmem>>, %arg3: memref<1x3584xf32, #tpu.memory_space<vmem>>, %arg4: memref<896x1024xbf16, #tpu.memory_space<vmem>>, %arg5: memref<1x1024xf32, #tpu.memory_space<vmem>>, %arg6: memref<256x128xbf16, #tpu.memory_space<vmem>>, %arg7: memref<1x128xf32, #tpu.memory_space<vmem>>, %arg8: memref<128x128xbf16, #tpu.memory_space<vmem>>, %arg9: memref<1x128xf32, #tpu.memory_space<vmem>>, %arg10: memref<128x128xbf16, #tpu.memory_space<vmem>>, %arg11: memref<1x128xf32, #tpu.memory_space<vmem>>, %arg12: memref<8x128xf32, #tpu.memory_space<vmem>>) attributes {dimension_semantics = [#tpu.dimension_semantics<parallel>], iteration_bounds = array<i64: 1>, scalar_prefetch = 0 : i64, scratch_operands = 0 : i64, tpu.core_type = #tpu.core_type<tc>, window_params = [{transform_indices = @transform_0, window_bounds = array<i64: 16, 256>}, {pipeline_mode = #tpu.pipeline_mode<synchronous>, transform_indices = @transform_1, window_bounds = array<i64: 256, 3584>}, {pipeline_mode = #tpu.pipeline_mode<synchronous>, transform_indices = @transform_2, window_bounds = array<i64: 1, 3584>}, {pipeline_mode = #tpu.pipeline_mode<synchronous>, transform_indices = @transform_3, window_bounds = array<i64: 896, 1024>}, {pipeline_mode = #tpu.pipeline_mode<synchronous>, transform_indices = @transform_4, window_bounds = array<i64: 1, 1024>}, {pipeline_mode = #tpu.pipeline_mode<synchronous>, transform_indices = @transform_5, window_bounds = array<i64: 256, 128>}, {pipeline_mode = #tpu.pipeline_mode<synchronous>, transform_indices = @transform_6, window_bounds = array<i64: 1, 128>}, {pipeline_mode = #tpu.pipeline_mode<synchronous>, transform_indices = @transform_7, window_bounds = array<i64: 128, 128>}, {pipeline_mode = #tpu.pipeline_mode<synchronous>, transform_indices = @transform_8, window_bounds = array<i64: 1, 128>}, {pipeline_mode = #tpu.pipeline_mode<synchronous>, transform_indices = @transform_9, window_bounds = array<i64: 128, 128>}, {pipeline_mode = #tpu.pipeline_mode<synchronous>, transform_indices = @transform_10, window_bounds = array<i64: 1, 128>}, {transform_indices = @transform_11, window_bounds = array<i64: 8, 128>}]} {
    %c0 = arith.constant 0 : index
    %c0_0 = arith.constant 0 : index
    %0 = vector.load %arg1[%c0, %c0_0] : memref<16x256xbf16, #tpu.memory_space<vmem>>, vector<16x256xbf16>
    %c0_1 = arith.constant 0 : index
    %c0_2 = arith.constant 0 : index
    %1 = vector.load %arg2[%c0_1, %c0_2] : memref<256x3584xbf16, #tpu.memory_space<vmem>>, vector<256x3584xbf16>
    %cst = arith.constant dense<0.000000e+00> : vector<16x3584xf32>
    %2 = tpu.matmul %0, %1, %cst {dimension_numbers = #tpu.dot_dimension_numbers<[1], [0], [0], [1], [0, 0, 1, 1], [], []>} : vector<16x256xbf16>, vector<256x3584xbf16>, vector<16x3584xf32> -> vector<16x3584xf32>
    %c0_3 = arith.constant 0 : index
    %c0_4 = arith.constant 0 : index
    %3 = vector.load %arg3[%c0_3, %c0_4] : memref<1x3584xf32, #tpu.memory_space<vmem>>, vector<1x3584xf32>
    %4 = vector.broadcast %3 : vector<1x3584xf32> to vector<16x3584xf32>
    %5 = arith.addf %2, %4 : vector<16x3584xf32>
    %cst_5 = arith.constant 0.000000e+00 : f32
    %6 = vector.broadcast %cst_5 : f32 to vector<16x3584xf32>
    %7 = arith.maximumf %5, %6 : vector<16x3584xf32>
    %8 = vector.extract_strided_slice %7 {offsets = [0, 0], sizes = [16, 896], strides = [1, 1]} : vector<16x3584xf32> to vector<16x896xf32>
    %9 = vector.extract_strided_slice %7 {offsets = [0, 896], sizes = [16, 896], strides = [1, 1]} : vector<16x3584xf32> to vector<16x896xf32>
    %10 = arith.maximumf %8, %9 : vector<16x896xf32>
    %11 = vector.extract_strided_slice %7 {offsets = [0, 1792], sizes = [16, 896], strides = [1, 1]} : vector<16x3584xf32> to vector<16x896xf32>
    %12 = vector.extract_strided_slice %7 {offsets = [0, 2688], sizes = [16, 896], strides = [1, 1]} : vector<16x3584xf32> to vector<16x896xf32>
    %13 = arith.maximumf %11, %12 : vector<16x896xf32>
    %14 = arith.maximumf %10, %13 : vector<16x896xf32>
    %15 = arith.truncf %14 : vector<16x896xf32> to vector<16x896xbf16>
    %c0_6 = arith.constant 0 : index
    %c0_7 = arith.constant 0 : index
    %16 = vector.load %arg4[%c0_6, %c0_7] : memref<896x1024xbf16, #tpu.memory_space<vmem>>, vector<896x1024xbf16>
    %cst_8 = arith.constant dense<0.000000e+00> : vector<16x1024xf32>
    %17 = tpu.matmul %15, %16, %cst_8 {dimension_numbers = #tpu.dot_dimension_numbers<[1], [0], [0], [1], [0, 0, 1, 1], [], []>} : vector<16x896xbf16>, vector<896x1024xbf16>, vector<16x1024xf32> -> vector<16x1024xf32>
    %c0_9 = arith.constant 0 : index
    %c0_10 = arith.constant 0 : index
    %18 = vector.load %arg5[%c0_9, %c0_10] : memref<1x1024xf32, #tpu.memory_space<vmem>>, vector<1x1024xf32>
    %19 = vector.broadcast %18 : vector<1x1024xf32> to vector<16x1024xf32>
    %20 = arith.addf %17, %19 : vector<16x1024xf32>
    %cst_11 = arith.constant 0.000000e+00 : f32
    %21 = vector.broadcast %cst_11 : f32 to vector<16x1024xf32>
    %22 = arith.maximumf %20, %21 : vector<16x1024xf32>
    %23 = vector.extract_strided_slice %22 {offsets = [0, 0], sizes = [16, 256], strides = [1, 1]} : vector<16x1024xf32> to vector<16x256xf32>
    %24 = vector.extract_strided_slice %22 {offsets = [0, 256], sizes = [16, 256], strides = [1, 1]} : vector<16x1024xf32> to vector<16x256xf32>
    %25 = arith.maximumf %23, %24 : vector<16x256xf32>
    %26 = vector.extract_strided_slice %22 {offsets = [0, 512], sizes = [16, 256], strides = [1, 1]} : vector<16x1024xf32> to vector<16x256xf32>
    %27 = vector.extract_strided_slice %22 {offsets = [0, 768], sizes = [16, 256], strides = [1, 1]} : vector<16x1024xf32> to vector<16x256xf32>
    %28 = arith.maximumf %26, %27 : vector<16x256xf32>
    %29 = arith.maximumf %25, %28 : vector<16x256xf32>
    %30 = arith.truncf %29 : vector<16x256xf32> to vector<16x256xbf16>
    %c0_12 = arith.constant 0 : index
    %c0_13 = arith.constant 0 : index
    %31 = vector.load %arg6[%c0_12, %c0_13] : memref<256x128xbf16, #tpu.memory_space<vmem>>, vector<256x128xbf16>
    %cst_14 = arith.constant dense<0.000000e+00> : vector<16x128xf32>
    %32 = tpu.matmul %30, %31, %cst_14 {dimension_numbers = #tpu.dot_dimension_numbers<[1], [0], [0], [1], [0, 0, 1, 1], [], []>} : vector<16x256xbf16>, vector<256x128xbf16>, vector<16x128xf32> -> vector<16x128xf32>
    %c0_15 = arith.constant 0 : index
    %c0_16 = arith.constant 0 : index
    %33 = vector.load %arg7[%c0_15, %c0_16] : memref<1x128xf32, #tpu.memory_space<vmem>>, vector<1x128xf32>
    %34 = vector.broadcast %33 : vector<1x128xf32> to vector<16x128xf32>
    %35 = arith.addf %32, %34 : vector<16x128xf32>
    %36 = arith.truncf %35 : vector<16x128xf32> to vector<16x128xbf16>
    %c0_17 = arith.constant 0 : index
    %c0_18 = arith.constant 0 : index
    %37 = vector.load %arg8[%c0_17, %c0_18] : memref<128x128xbf16, #tpu.memory_space<vmem>>, vector<128x128xbf16>
    %cst_19 = arith.constant dense<0.000000e+00> : vector<16x128xf32>
    %38 = tpu.matmul %36, %37, %cst_19 {dimension_numbers = #tpu.dot_dimension_numbers<[1], [0], [0], [1], [0, 0, 1, 1], [], []>} : vector<16x128xbf16>, vector<128x128xbf16>, vector<16x128xf32> -> vector<16x128xf32>
    %c0_20 = arith.constant 0 : index
    %c0_21 = arith.constant 0 : index
    %39 = vector.load %arg9[%c0_20, %c0_21] : memref<1x128xf32, #tpu.memory_space<vmem>>, vector<1x128xf32>
    %40 = vector.broadcast %39 : vector<1x128xf32> to vector<16x128xf32>
    %41 = arith.addf %38, %40 : vector<16x128xf32>
    %cst_22 = arith.constant 0.000000e+00 : f32
    %42 = vector.broadcast %cst_22 : f32 to vector<16x128xf32>
    %43 = arith.maximumf %41, %42 : vector<16x128xf32>
    %44 = vector.extract_strided_slice %43 {offsets = [0, 0], sizes = [8, 128], strides = [1, 1]} : vector<16x128xf32> to vector<8x128xf32>
    %45 = vector.extract_strided_slice %43 {offsets = [8, 0], sizes = [8, 128], strides = [1, 1]} : vector<16x128xf32> to vector<8x128xf32>
    %46 = arith.subf %44, %45 : vector<8x128xf32>
    %47 = arith.truncf %46 : vector<8x128xf32> to vector<8x128xbf16>
    %c0_23 = arith.constant 0 : index
    %c0_24 = arith.constant 0 : index
    %48 = vector.load %arg10[%c0_23, %c0_24] : memref<128x128xbf16, #tpu.memory_space<vmem>>, vector<128x128xbf16>
    %cst_25 = arith.constant dense<0.000000e+00> : vector<8x128xf32>
    %49 = tpu.matmul %47, %48, %cst_25 {dimension_numbers = #tpu.dot_dimension_numbers<[1], [0], [0], [1], [0, 0, 1, 1], [], []>} : vector<8x128xbf16>, vector<128x128xbf16>, vector<8x128xf32> -> vector<8x128xf32>
    %c0_26 = arith.constant 0 : index
    %c0_27 = arith.constant 0 : index
    %50 = vector.load %arg11[%c0_26, %c0_27] : memref<1x128xf32, #tpu.memory_space<vmem>>, vector<1x128xf32>
    %51 = vector.broadcast %50 : vector<1x128xf32> to vector<8x128xf32>
    %52 = arith.addf %49, %51 : vector<8x128xf32>
    %c0_28 = arith.constant 0 : index
    %c0_29 = arith.constant 0 : index
    %53 = vector.load %arg12[%c0_28, %c0_29] : memref<8x128xf32, #tpu.memory_space<vmem>>, vector<8x128xf32>
    tpu.vector_store %arg12[%c0_28, %c0_29], %52 {strides = array<i32>} : memref<8x128xf32, #tpu.memory_space<vmem>>, vector<8x128xf32>,
    return
  }
  func.func @transform_0(%arg0: i32) -> (i32, i32) {
    %c0_i32 = arith.constant 0 : i32
    %c0_i32_0 = arith.constant 0 : i32
    return %arg0, %c0_i32 : i32, i32
  }
  func.func @transform_1(%arg0: i32) -> (i32, i32) {
    %c0_i32 = arith.constant 0 : i32
    %c0_i32_0 = arith.constant 0 : i32
    %c0_i32_1 = arith.constant 0 : i32
    return %c0_i32, %c0_i32_0 : i32, i32
  }
  func.func @transform_2(%arg0: i32) -> (i32, i32) {
    %c0_i32 = arith.constant 0 : i32
    %c0_i32_0 = arith.constant 0 : i32
    %c0_i32_1 = arith.constant 0 : i32
    return %c0_i32, %c0_i32_0 : i32, i32
  }
  func.func @transform_3(%arg0: i32) -> (i32, i32) {
    %c0_i32 = arith.constant 0 : i32
    %c0_i32_0 = arith.constant 0 : i32
    %c0_i32_1 = arith.constant 0 : i32
    return %c0_i32, %c0_i32_0 : i32, i32
  }
  func.func @transform_4(%arg0: i32) -> (i32, i32) {
    %c0_i32 = arith.constant 0 : i32
    %c0_i32_0 = arith.constant 0 : i32
    %c0_i32_1 = arith.constant 0 : i32
    return %c0_i32, %c0_i32_0 : i32, i32
  }
  func.func @transform_5(%arg0: i32) -> (i32, i32) {
    %c0_i32 = arith.constant 0 : i32
    %c0_i32_0 = arith.constant 0 : i32
    %c0_i32_1 = arith.constant 0 : i32
    return %c0_i32, %c0_i32_0 : i32, i32
  }
  func.func @transform_6(%arg0: i32) -> (i32, i32) {
    %c0_i32 = arith.constant 0 : i32
    %c0_i32_0 = arith.constant 0 : i32
    %c0_i32_1 = arith.constant 0 : i32
    return %c0_i32, %c0_i32_0 : i32, i32
  }
  func.func @transform_7(%arg0: i32) -> (i32, i32) {
    %c0_i32 = arith.constant 0 : i32
    %c0_i32_0 = arith.constant 0 : i32
    %c0_i32_1 = arith.constant 0 : i32
    return %c0_i32, %c0_i32_0 : i32, i32
  }
  func.func @transform_8(%arg0: i32) -> (i32, i32) {
    %c0_i32 = arith.constant 0 : i32
    %c0_i32_0 = arith.constant 0 : i32
    %c0_i32_1 = arith.constant 0 : i32
    return %c0_i32, %c0_i32_0 : i32, i32
  }
  func.func @transform_9(%arg0: i32) -> (i32, i32) {
    %c0_i32 = arith.constant 0 : i32
    %c0_i32_0 = arith.constant 0 : i32
    %c0_i32_1 = arith.constant 0 : i32
    return %c0_i32, %c0_i32_0 : i32, i32
  }
  func.func @transform_10(%arg0: i32) -> (i32, i32) {
    %c0_i32 = arith.constant 0 : i32
    %c0_i32_0 = arith.constant 0 : i32
    %c0_i32_1 = arith.constant 0 : i32
    return %c0_i32, %c0_i32_0 : i32, i32
  }
  func.func @transform_11(%arg0: i32) -> (i32, i32) {
    %c0_i32 = arith.constant 0 : i32
    %c0_i32_0 = arith.constant 0 : i32
    return %arg0, %c0_i32 : i32, i32
  }
}

</mosaic_0001>

<bundles_post_ra>
// kernel: b_siamese_forward.1
= control target key start
LH: loop header
LB: loop body
LE: loop exit
PB: predicated region body
PF: predicated region fallthrough
CT: control target
= control target key end

     0   :  { %16 = vsyncpa [#allocation3], 0  ;;  %s10285_s0 = inlined_call_operand.vmem [shape: bf16[16,256], index: 0, kind: input, shape index: {}]   ;;  %s10286_s1 = inlined_call_operand.hbm [shape: bf16[256,3584], index: 1, kind: input, shape index: {}]   ;;  %s10287_s2 = inlined_call_operand.hbm [shape: f32[1,3584], index: 2, kind: input, shape index: {}]   ;;  %s10288_s3 = inlined_call_operand.hbm [shape: bf16[896,1024], index: 3, kind: input, shape index: {}]   ;;  %s10289_s4 = inlined_call_operand.hbm [shape: f32[1,1024], index: 4, kind: input, shape index: {}]   ;;  %s10290_s5 = inlined_call_operand.hbm [shape: bf16[256,128], index: 5, kind: input, shape index: {}]   ;;  %s10291_s6 = inlined_call_operand.hbm [shape: f32[1,128], index: 6, kind: input, shape index: {}]   ;;  %s10292_s7 = inlined_call_operand.hbm [shape: bf16[128,128], index: 7, kind: input, shape index: {}]   ;;  %s10293_s8 = inlined_call_operand.hbm [shape: f32[1,128], index: 8, kind: input, shape index: {}]   ;;  %s10294_s9 = inlined_call_operand.hbm [shape: bf16[128,128], index: 9, kind: input, shape index: {}]   ;;  %s10295_s10 = inlined_call_operand.hbm [shape: f32[1,128], index: 10, kind: input, shape index: {}]   ;;  %s10296_s11 = inlined_call_operand.vmem [shape: f32[8,128], index: 11, kind: output, shape index: {}]  }
   0x1   :  { %17 = vsyncpa [#allocation5], 0 }
   0x2   :  { %18 = vsyncpa [#allocation8], 0 }
   0x3   :  { %19 = vsyncpa [#allocation11], 0 }
   0x4   :  { %20 = vsyncpa [#allocation14], 0 }
   0x5   :  { %21 = vsyncpa [#allocation17], 0  ;;  %s9622_s17 = smov [#allocation4]   ;;  %s9623_s19 = smov [#allocation7]  }
   0x6   :  { %s42_s18 = sshll.u32 %s9622_s17, 4  ;;  %s64_s20 = sshll.u32 %s9623_s19, 4  ;;  %s43_s18 = int_to_ptr.vmem [resolvable:$true] %s42_s18  ;;  %s65_s20 = int_to_ptr.vmem [resolvable:$true] %s64_s20 }
   0x7   :  { %s9390_s23 = scalar_lea.hbm %s10287_s2, 448 }
   0x8   :  { %p9391_p0 = scmp.ne.s32.totalorder %s10287_s2, %s9390_s23  ;;  %p9394_p1 = scmp.lt.u32.totalorder %s9390_s23, %s10287_s2 }
   0xa   :  { %p9396_p2 = pnand %p9394_p1, %p9391_p0 }
   0xc   :  { %9399 = shalt.err (!%p9396_p2)
}
   0xd   :  { %s9400_s28 = scalar_lea.vmem %s43_s18, 448  ;;  %p9405_p4 = scmp.lt.s32.totalorder %s43_s18, %s43_s18 }
   0xe   :  { %p9401_p3 = scmp.ne.s32.totalorder %s43_s18, %s9400_s28  ;;  %p9406_p5 = scmp.lt.s32.totalorder %s9400_s28, %s9400_s28 }
  0x10   :  { %p9407_p6 = por %p9406_p5, %p9405_p4 }
  0x12   :  { %p9408_p7 = pnand %p9407_p6, %p9401_p3 }
  0x14   :  { %9411 = shalt.err (!%p9408_p7)
}
  0x15   :  { %45 = dma.hbm_to_vmem [thread:$0]  %s10287_s2, 448, %s43_s18, [#allocation5]  }
  0x16   :  { %s9412_s14 = scalar_lea.hbm %s10289_s4, 128 }
  0x17   :  { %p9413_p8 = scmp.ne.s32.totalorder %s10289_s4, %s9412_s14  ;;  %p9416_p9 = scmp.lt.u32.totalorder %s9412_s14, %s10289_s4 }
  0x19   :  { %p9418_p10 = pnand %p9416_p9, %p9413_p8 }
  0x1b   :  { %9421 = shalt.err (!%p9418_p10)
}
  0x1c   :  { %s9422_s21 = scalar_lea.vmem %s65_s20, 128  ;;  %p9427_p12 = scmp.lt.s32.totalorder %s65_s20, %s65_s20 }
  0x1d   :  { %p9423_p11 = scmp.ne.s32.totalorder %s65_s20, %s9422_s21  ;;  %p9428_p13 = scmp.lt.s32.totalorder %s9422_s21, %s9422_s21 }
  0x1f   :  { %p9429_p0 = por %p9428_p13, %p9427_p12 }
  0x21   :  { %p9430_p1 = pnand %p9429_p0, %p9423_p11 }
  0x23   :  { %9433 = shalt.err (!%p9430_p1)
}
  0x24   :  { %67 = dma.hbm_to_vmem [thread:$0]  %s10289_s4, 128, %s65_s20, [#allocation8]  }
  0x25   :  { %s9624_s22 = smov [#allocation10]   ;;  %s9625_s24 = smov [#allocation13]  }
  0x26   :  { %s86_s23 = sshll.u32 %s9624_s22, 4  ;;  %s108_s25 = sshll.u32 %s9625_s24, 4  ;;  %s87_s23 = int_to_ptr.vmem [resolvable:$true] %s86_s23  ;;  %s109_s25 = int_to_ptr.vmem [resolvable:$true] %s108_s25 }
  0x27   :  { %s9434_s28 = scalar_lea.hbm %s10291_s6, 16 }
  0x28   :  { %p9435_p2 = scmp.ne.s32.totalorder %s10291_s6, %s9434_s28  ;;  %p9438_p3 = scmp.lt.u32.totalorder %s9434_s28, %s10291_s6 }
  0x2a   :  { %p9440_p4 = pnand %p9438_p3, %p9435_p2 }
  0x2c   :  { %9443 = shalt.err (!%p9440_p4)
}
  0x2d   :  { %s9444_s4 = scalar_lea.vmem %s87_s23, 16  ;;  %s9448_s20 = scalar_lea.vmem %s87_s23, 32 }
  0x2e   :  { %p9445_p5 = scmp.ne.s32.totalorder %s87_s23, %s9444_s4  ;;  %p9449_p6 = scmp.lt.s32.totalorder %s87_s23, %s87_s23 }
  0x2f   :  { %p9450_p7 = scmp.lt.s32.totalorder %s9448_s20, %s9444_s4 }
  0x31   :  { %p9451_p8 = por %p9450_p7, %p9449_p6 }
  0x33   :  { %p9452_p9 = pnand %p9451_p8, %p9445_p5 }
  0x35   :  { %9455 = shalt.err (!%p9452_p9)
}
  0x36   :  { %89 = dma.hbm_to_vmem [thread:$0]  %s10291_s6, 16, %s87_s23, [#allocation11]  }
  0x37   :  { %s9456_s19 = scalar_lea.hbm %s10293_s8, 16 }
  0x38   :  { %p9457_p10 = scmp.ne.s32.totalorder %s10293_s8, %s9456_s19  ;;  %p9460_p11 = scmp.lt.u32.totalorder %s9456_s19, %s10293_s8 }
  0x3a   :  { %p9462_p12 = pnand %p9460_p11, %p9457_p10 }
  0x3c   :  { %9465 = shalt.err (!%p9462_p12)
}
  0x3d   :  { %s9466_s24 = scalar_lea.vmem %s109_s25, 16  ;;  %s9470_s26 = scalar_lea.vmem %s109_s25, 32 }
  0x3e   :  { %p9467_p13 = scmp.ne.s32.totalorder %s109_s25, %s9466_s24  ;;  %p9471_p0 = scmp.lt.s32.totalorder %s109_s25, %s109_s25 }
  0x3f   :  { %p9472_p1 = scmp.lt.s32.totalorder %s9470_s26, %s9466_s24 }
  0x41   :  { %p9473_p2 = por %p9472_p1, %p9471_p0 }
  0x43   :  { %p9474_p3 = pnand %p9473_p2, %p9467_p13 }
  0x45   :  { %9477 = shalt.err (!%p9474_p3)
}
  0x46   :  { %111 = dma.hbm_to_vmem [thread:$0]  %s10293_s8, 16, %s109_s25, [#allocation14]  }
  0x47   :  { %s9626_s27 = smov [#allocation2]   ;;  %s9478_s12 = scalar_lea.hbm %s10286_s1, 57344 }
  0x48   :  { %s29_s28 = sshll.u32 %s9626_s27, 4  ;;  %p9479_p4 = scmp.ne.s32.totalorder %s10286_s1, %s9478_s12  ;;  %s30_s28 = int_to_ptr.vmem [resolvable:$true] %s29_s28 }
  0x49   :  { %p9482_p5 = scmp.lt.u32.totalorder %s9478_s12, %s10286_s1 }
  0x4b   :  { %p9484_p6 = pnand %p9482_p5, %p9479_p4 }
  0x4d   :  { %9487 = shalt.err (!%p9484_p6)
}
  0x4e   :  { %s9488_s15 = scalar_lea.vmem %s30_s28, 57344  ;;  %p9493_p8 = scmp.lt.s32.totalorder %s30_s28, %s30_s28 }
  0x4f   :  { %p9489_p7 = scmp.ne.s32.totalorder %s30_s28, %s9488_s15  ;;  %p9494_p9 = scmp.lt.s32.totalorder %s9488_s15, %s9488_s15 }
  0x51   :  { %p9495_p10 = por %p9494_p9, %p9493_p8 }
  0x53   :  { %p9496_p11 = pnand %p9495_p10, %p9489_p7 }
  0x55   :  { %9499 = shalt.err (!%p9496_p11)
}
  0x56   :  { %s9627_s8 = smov 1792   ;;  %s9628_s25 = smov 112  }
  0x57   :  { %35 = dma.hbm_to_vmem [thread:$0]  %s10286_s1, 57344, %s30_s28, [#allocation3], %s9627_s8, %s9627_s8, %s9628_s25  }
  0x58   :  { %s9629_s19 = smov [#allocation6]   ;;  %s9500_s22 = scalar_lea.hbm %s10288_s3, 57344 }
  0x59   :  { %s51_s21 = sshll.u32 %s9629_s19, 4  ;;  %p9501_p12 = scmp.ne.s32.totalorder %s10288_s3, %s9500_s22  ;;  %s52_s21 = int_to_ptr.vmem [resolvable:$true] %s51_s21 }
  0x5a   :  { %p9504_p13 = scmp.lt.u32.totalorder %s9500_s22, %s10288_s3 }
  0x5c   :  { %p9506_p0 = pnand %p9504_p13, %p9501_p12 }
  0x5e   :  { %9509 = shalt.err (!%p9506_p0)
}
  0x5f   :  { %s9510_s27 = scalar_lea.vmem %s52_s21, 57344  ;;  %p9515_p2 = scmp.lt.s32.totalorder %s52_s21, %s52_s21 }
  0x60   :  { %p9511_p1 = scmp.ne.s32.totalorder %s52_s21, %s9510_s27  ;;  %p9516_p3 = scmp.lt.s32.totalorder %s9510_s27, %s9510_s27 }
  0x62   :  { %p9517_p4 = por %p9516_p3, %p9515_p2 }
  0x64   :  { %p9518_p5 = pnand %p9517_p4, %p9511_p1 }
  0x66   :  { %9521 = shalt.err (!%p9518_p5)
}
  0x67   :  { %s9630_s1 = smov 512   ;;  %s9631_s28 = smov 32  }
  0x68   :  { %57 = dma.hbm_to_vmem [thread:$0]  %s10288_s3, 57344, %s52_s21, [#allocation5], %s9630_s1, %s9630_s1, %s9631_s28  }
  0x69   :  { %s9632_s12 = smov [#allocation9]   ;;  %s9522_s14 = scalar_lea.hbm %s10290_s5, 2048 }
  0x6a   :  { %s73_s13 = sshll.u32 %s9632_s12, 4  ;;  %p9523_p6 = scmp.ne.s32.totalorder %s10290_s5, %s9522_s14  ;;  %s74_s13 = int_to_ptr.vmem [resolvable:$true] %s73_s13 }
  0x6b   :  { %p9526_p7 = scmp.lt.u32.totalorder %s9522_s14, %s10290_s5 }
  0x6d   :  { %p9528_p8 = pnand %p9526_p7, %p9523_p6 }
  0x6f   :  { %9531 = shalt.err (!%p9528_p8)
}
  0x70   :  { %s9532_s17 = scalar_lea.vmem %s74_s13, 2048  ;;  %p9537_p10 = scmp.lt.s32.totalorder %s74_s13, %s74_s13 }
  0x71   :  { %p9533_p9 = scmp.ne.s32.totalorder %s74_s13, %s9532_s17  ;;  %p9538_p11 = scmp.lt.s32.totalorder %s9532_s17, %s9532_s17 }
  0x73   :  { %p9539_p12 = por %p9538_p11, %p9537_p10 }
  0x75   :  { %p9540_p13 = pnand %p9539_p12, %p9533_p9 }
  0x77   :  { %9543 = shalt.err (!%p9540_p13)
}
  0x78   :  { %s9633_s3 = smov 64   ;;  %s9634_s19 = smov 4  }
  0x79   :  { %79 = dma.hbm_to_vmem [thread:$0]  %s10290_s5, 2048, %s74_s13, [#allocation8], %s9633_s3, %s9633_s3, %s9634_s19  }
  0x7a   :  { %s9635_s18 = smov [#allocation12]   ;;  %s9636_s24 = smov [#allocation15]  }
  0x7b   :  { %s95_s22 = sshll.u32 %s9635_s18, 4  ;;  %s117_s26 = sshll.u32 %s9636_s24, 4  ;;  %s96_s22 = int_to_ptr.vmem [resolvable:$true] %s95_s22  ;;  %s118_s26 = int_to_ptr.vmem [resolvable:$true] %s117_s26 }
  0x7c   :  { %s9544_s27 = scalar_lea.hbm %s10292_s7, 1024 }
  0x7d   :  { %p9545_p0 = scmp.ne.s32.totalorder %s10292_s7, %s9544_s27  ;;  %p9548_p1 = scmp.lt.u32.totalorder %s9544_s27, %s10292_s7 }
  0x7f   :  { %p9550_p2 = pnand %p9548_p1, %p9545_p0 }
  0x81   :  { %9553 = shalt.err (!%p9550_p2)
}
  0x82   :  { %s9554_s5 = scalar_lea.vmem %s96_s22, 1024  ;;  %p9559_p4 = scmp.lt.s32.totalorder %s96_s22, %s96_s22 }
  0x83   :  { %p9555_p3 = scmp.ne.s32.totalorder %s96_s22, %s9554_s5  ;;  %p9560_p5 = scmp.lt.s32.totalorder %s9554_s5, %s9554_s5 }
  0x85   :  { %p9561_p6 = por %p9560_p5, %p9559_p4 }
  0x87   :  { %p9562_p7 = pnand %p9561_p6, %p9555_p3 }
  0x89   :  { %9565 = shalt.err (!%p9562_p7)
}
  0x8a   :  { %101 = dma.hbm_to_vmem [thread:$0]  %s10292_s7, 1024, %s96_s22, [#allocation11], %s9633_s3, %s9633_s3, %s9634_s19  }
  0x8b   :  { %s9566_s14 = scalar_lea.hbm %s10294_s9, 1024 }
  0x8c   :  { %p9567_p8 = scmp.ne.s32.totalorder %s10294_s9, %s9566_s14  ;;  %p9570_p9 = scmp.lt.u32.totalorder %s9566_s14, %s10294_s9 }
  0x8e   :  { %p9572_p10 = pnand %p9570_p9, %p9567_p8 }
  0x90   :  { %9575 = shalt.err (!%p9572_p10)
}
  0x91   :  { %s9576_s17 = scalar_lea.vmem %s118_s26, 1024  ;;  %p9581_p12 = scmp.lt.s32.totalorder %s118_s26, %s118_s26 }
  0x92   :  { %p9577_p11 = scmp.ne.s32.totalorder %s118_s26, %s9576_s17  ;;  %p9582_p13 = scmp.lt.s32.totalorder %s9576_s17, %s9576_s17 }
  0x94   :  { %p9583_p0 = por %p9582_p13, %p9581_p12 }
  0x96   :  { %p9584_p1 = pnand %p9583_p0, %p9577_p11 }
  0x98   :  { %9587 = shalt.err (!%p9584_p1)
}
  0x99   :  { %123 = dma.hbm_to_vmem [thread:$0]  %s10294_s9, 1024, %s118_s26, [#allocation14], %s9633_s3, %s9633_s3, %s9634_s19  }
  0x9a   :  { %s9637_s2 = smov [#allocation16]   ;;  %s9588_s6 = scalar_lea.hbm %s10295_s10, 16 }
  0x9b   :  { %s130_s18 = sshll.u32 %s9637_s2, 4  ;;  %p9589_p2 = scmp.ne.s32.totalorder %s10295_s10, %s9588_s6  ;;  %s131_s18 = int_to_ptr.vmem [resolvable:$true] %s130_s18 }
  0x9c   :  { %p9592_p3 = scmp.lt.u32.totalorder %s9588_s6, %s10295_s10 }
  0x9e   :  { %p9594_p4 = pnand %p9592_p3, %p9589_p2 }
  0xa0   :  { %9597 = shalt.err (!%p9594_p4)
}
  0xa1   :  { %s9598_s29 = scalar_lea.vmem %s131_s18, 16  ;;  %s9602_s9 = scalar_lea.vmem %s131_s18, 32 }
  0xa2   :  { %p9599_p5 = scmp.ne.s32.totalorder %s131_s18, %s9598_s29  ;;  %p9603_p6 = scmp.lt.s32.totalorder %s131_s18, %s131_s18 }
  0xa3   :  { %p9604_p7 = scmp.lt.s32.totalorder %s9602_s9, %s9598_s29 }
  0xa5   :  { %p9605_p8 = por %p9604_p7, %p9603_p6 }
  0xa7   :  { %p9606_p9 = pnand %p9605_p8, %p9599_p5 }
  0xa9   :  { %9609 = shalt.err (!%p9606_p9)
}
  0xaa   :  { %133 = dma.hbm_to_vmem [thread:$0]  %s10295_s10, 16, %s131_s18, [#allocation17]  }
  0xab   :  { %9610 = dma.done.wait [#allocation3], 57344  }
  0xac   :  { %9611 = vsyncadd [#allocation3], 4294909952 }
  0xad   :  { %9612 = dma.done.wait [#allocation5], 57792  }
  0xae   :  { %9613 = vsyncadd [#allocation5], 4294909504 }
  0xaf   :  { %9614 = dma.done.wait [#allocation8], 2176  }
  0xb0   :  { %9615 = vsyncadd [#allocation8], 4294965120 }
  0xb1   :  { %9616 = dma.done.wait [#allocation11], 1040  }
  0xb2   :  { %9617 = vsyncadd [#allocation11], 4294966256 }
  0xb3   :  { %9618 = dma.done.wait [#allocation14], 1040  }
  0xb4   :  { %9619 = vsyncadd [#allocation14], 4294966256 }
  0xb5   :  { %9620 = dma.done.wait [#allocation17], 16  }
  0xb6   :  { %9621 = vsyncadd [#allocation17], 4294967280  ;;  %v8679_v0 = vld [vmem:[#allocation2 + $0x4] ss:$112 sps:$4 sm:$0xff]   ;;  %v8681_v1 = vld [vmem:[#allocation2 + $0xc] ss:$112 sps:$4 sm:$0xff]  }
  0xb7   :  { %3013 = vmatprep.subr.bf16.mxu0 %v8679_v0  ;;  %v8683_v2 = vld [vmem:[#allocation2] ss:$112 sps:$4 sm:$0xff]   ;;  %v8684_v3 = vld [vmem:[#allocation2 + $0x8] ss:$112 sps:$4 sm:$0xff]   ;;  %3056 = vmatprep.subr.bf16.mxu1 %v8681_v1  ;;  %v8685_v4 = vld [vmem:[#allocation2 + $0xe4] ss:$112 sps:$4 sm:$0xff]  }
  0xb8   :  { %3014 = vmatpush1.bf16.msra.mxu0 %v8683_v2  ;;  %3057 = vmatpush1.bf16.msra.mxu1 %v8684_v3  ;;  %v8687_v5 = vld [vmem:[#allocation2 + $0xec] ss:$112 sps:$4 sm:$0xff]   ;;  %v8689_v6 = vld [vmem:[#allocation2 + $0xe0] ss:$112 sps:$4 sm:$0xff]   ;;  %v8690_v7 = vld [vmem:[#allocation2 + $0xe8] ss:$112 sps:$4 sm:$0xff]  }
  0xb9   :  { %3015 = vmatprep.subr.bf16.mxu0 %v8685_v4  ;;  %3058 = vmatprep.subr.bf16.mxu1 %v8687_v5  ;;  %v8691_v8 = vld [vmem:[#allocation2 + $0x1c4] ss:$112 sps:$4 sm:$0xff]   ;;  %v8693_v9 = vld [vmem:[#allocation2 + $0x1cc] ss:$112 sps:$4 sm:$0xff]   ;;  %v8695_v10 = vld [vmem:[#allocation2 + $0x1c0] ss:$112 sps:$4 sm:$0xff]  }
  0xba   :  { %v8696_v11 = vld [vmem:[#allocation2 + $0x1c8] ss:$112 sps:$4 sm:$0xff]   ;;  %v8697_v12 = vld [vmem:[#allocation2 + $0x2a4] ss:$112 sps:$4 sm:$0xff]   ;;  %v8699_v13 = vld [vmem:[#allocation2 + $0x2ac] ss:$112 sps:$4 sm:$0xff]  }
  0xbb   :  { %v8701_v14 = vld [vmem:[#allocation2 + $0x2a0] ss:$112 sps:$4 sm:$0xff]   ;;  %v8702_v15 = vld [vmem:[#allocation2 + $0x2a8] ss:$112 sps:$4 sm:$0xff]   ;;  %v8703_v16 = vld [vmem:[#allocation2 + $0x384] ss:$112 sps:$4 sm:$0xff]  }
  0xbc   :  { %3016 = vmatpush1.bf16.msra.mxu0 %v8689_v6  ;;  %3059 = vmatpush1.bf16.msra.mxu1 %v8690_v7  ;;  %v8705_v17 = vld [vmem:[#allocation2 + $0x38c] ss:$112 sps:$4 sm:$0xff]   ;;  %v8707_v18 = vld [vmem:[#allocation2 + $0x380] ss:$112 sps:$4 sm:$0xff]   ;;  %v8708_v19 = vld [vmem:[#allocation2 + $0x388] ss:$112 sps:$4 sm:$0xff]  }
  0xbd   :  { %3017 = vmatprep.subr.bf16.mxu0 %v8691_v8  ;;  %3060 = vmatprep.subr.bf16.mxu1 %v8693_v9  ;;  %v8709_v20 = vld [vmem:[#allocation2 + $0x464] ss:$112 sps:$4 sm:$0xff]   ;;  %v8711_v21 = vld [vmem:[#allocation2 + $0x46c] ss:$112 sps:$4 sm:$0xff]   ;;  %v8713_v22 = vld [vmem:[#allocation2 + $0x460] ss:$112 sps:$4 sm:$0xff]  }
  0xbe   :  { %v8714_v23 = vld [vmem:[#allocation2 + $0x468] ss:$112 sps:$4 sm:$0xff]   ;;  %v8715_v24 = vld [vmem:[#allocation2 + $0x544] ss:$112 sps:$4 sm:$0xff]   ;;  %v8717_v25 = vld [vmem:[#allocation2 + $0x54c] ss:$112 sps:$4 sm:$0xff]  }
  0xbf   :  { %v8719_v26 = vld [vmem:[#allocation2 + $0x540] ss:$112 sps:$4 sm:$0xff]   ;;  %v8720_v27 = vld [vmem:[#allocation2 + $0x548] ss:$112 sps:$4 sm:$0xff]   ;;  %v8721_v28 = vld [vmem:[#allocation2 + $0x624] ss:$112 sps:$4 sm:$0xff]  }
  0xc0   :  { %3018 = vmatpush1.bf16.msra.mxu0 %v8695_v10  ;;  %3061 = vmatpush1.bf16.msra.mxu1 %v8696_v11  ;;  %v8723_v29 = vld [vmem:[#allocation2 + $0x62c] ss:$112 sps:$4 sm:$0xff]   ;;  %v8725_v30 = vld [vmem:[#allocation2 + $0x620] ss:$112 sps:$4 sm:$0xff]   ;;  %v8726_v31 = vld [vmem:[#allocation2 + $0x628] ss:$112 sps:$4 sm:$0xff]  }
  0xc1   :  { %3019 = vmatprep.subr.bf16.mxu0 %v8697_v12  ;;  %3062 = vmatprep.subr.bf16.mxu1 %v8699_v13  ;;  %v8727_v32 = vld [vmem:[#allocation2 + $0x704] ss:$112 sps:$4 sm:$0xff]   ;;  %v8729_v33 = vld [vmem:[#allocation2 + $0x70c] ss:$112 sps:$4 sm:$0xff]   ;;  %v8731_v34 = vld [vmem:[#allocation2 + $0x700] ss:$112 sps:$4 sm:$0xff]  }
  0xc2   :  { %v8732_v35 = vld [vmem:[#allocation2 + $0x708] ss:$112 sps:$4 sm:$0xff]   ;;  %v8733_v36 = vld [vmem:[#allocation2 + $0x7e4] ss:$112 sps:$4 sm:$0xff]   ;;  %v8735_v37 = vld [vmem:[#allocation2 + $0x7ec] ss:$112 sps:$4 sm:$0xff]  }
  0xc3   :  { %v8737_v38 = vld [vmem:[#allocation2 + $0x7e0] ss:$112 sps:$4 sm:$0xff]   ;;  %v8738_v39 = vld [vmem:[#allocation2 + $0x7e8] ss:$112 sps:$4 sm:$0xff]   ;;  %v8739_v40 = vld [vmem:[#allocation2 + $0x8c4] ss:$112 sps:$4 sm:$0xff]  }
  0xc4   :  { %3020 = vmatpush1.bf16.msra.mxu0 %v8701_v14  ;;  %3063 = vmatpush1.bf16.msra.mxu1 %v8702_v15  ;;  %v8741_v41 = vld [vmem:[#allocation2 + $0x8cc] ss:$112 sps:$4 sm:$0xff]   ;;  %v8743_v42 = vld [vmem:[#allocation2 + $0x8c0] ss:$112 sps:$4 sm:$0xff]   ;;  %v8744_v43 = vld [vmem:[#allocation2 + $0x8c8] ss:$112 sps:$4 sm:$0xff]  }
  0xc5   :  { %3021 = vmatprep.subr.bf16.mxu0 %v8703_v16  ;;  %3064 = vmatprep.subr.bf16.mxu1 %v8705_v17  ;;  %v8745_v44 = vld [vmem:[#allocation2 + $0x9a4] ss:$112 sps:$4 sm:$0xff]   ;;  %v8747_v45 = vld [vmem:[#allocation2 + $0x9ac] ss:$112 sps:$4 sm:$0xff]   ;;  %v8749_v46 = vld [vmem:[#allocation2 + $0x9a0] ss:$112 sps:$4 sm:$0xff]  }
  0xc6   :  { %v8750_v47 = vld [vmem:[#allocation2 + $0x9a8] ss:$112 sps:$4 sm:$0xff]   ;;  %v9833_v48 = vld [vmem:[%s10285_s0 + $0x4] ss:$8 sps:$4 sm:$0xff]   ;;  %v8755_v51 = vld [vmem:[#allocation2 + $0xa80] ss:$112 sps:$4 sm:$0xff]  }
  0xc7   :  { %v8751_v49 = vld [vmem:[#allocation2 + $0xa84] ss:$112 sps:$4 sm:$0xff]   ;;  %v8753_v50 = vld [vmem:[#allocation2 + $0xa8c] ss:$112 sps:$4 sm:$0xff]   ;;  %3045 = vmatprep.mubr.bf16.mxu0 %v9833_v48  ;;  %3088 = vmatprep.mubr.bf16.mxu1 %v9833_v48  ;;  %v8756_v52 = vld [vmem:[#allocation2 + $0xa88] ss:$112 sps:$4 sm:$0xff]  }
  0xc8   :  { %3022 = vmatpush1.bf16.msra.mxu0 %v8707_v18  ;;  %3065 = vmatpush1.bf16.msra.mxu1 %v8708_v19  ;;  %v8757_v53 = vld [vmem:[#allocation2 + $0xb64] ss:$112 sps:$4 sm:$0xff]   ;;  %v8759_v54 = vld [vmem:[#allocation2 + $0xb6c] ss:$112 sps:$4 sm:$0xff]   ;;  %v8761_v55 = vld [vmem:[#allocation2 + $0xb60] ss:$112 sps:$4 sm:$0xff]  }
  0xc9   :  { %3023 = vmatprep.subr.bf16.mxu0 %v8709_v20  ;;  %3066 = vmatprep.subr.bf16.mxu1 %v8711_v21  ;;  %v8762_v56 = vld [vmem:[#allocation2 + $0xb68] ss:$112 sps:$4 sm:$0xff]   ;;  %v8763_v57 = vld [vmem:[#allocation2 + $0xc44] ss:$112 sps:$4 sm:$0xff]   ;;  %v8765_v58 = vld [vmem:[#allocation2 + $0xc4c] ss:$112 sps:$4 sm:$0xff]  }
  0xca   :  { %v8767_v59 = vld [vmem:[#allocation2 + $0xc40] ss:$112 sps:$4 sm:$0xff]   ;;  %v8768_v60 = vld [vmem:[#allocation2 + $0xc48] ss:$112 sps:$4 sm:$0xff]   ;;  %v8769_v61 = vld [vmem:[#allocation2 + $0xd24] ss:$112 sps:$4 sm:$0xff]  }
  0xcb   :  { %v8771_v62 = vld [vmem:[#allocation2 + $0xd2c] ss:$112 sps:$4 sm:$0xff]   ;;  %v8773_v63 = vld [vmem:[#allocation2 + $0xd20] ss:$112 sps:$4 sm:$0xff]   ;;  %v8774_v0 = vld [vmem:[#allocation2 + $0xd28] ss:$112 sps:$4 sm:$0xff]  }
  0xcc   :  { %3024 = vmatpush1.bf16.msra.mxu0 %v8713_v22  ;;  %3067 = vmatpush1.bf16.msra.mxu1 %v8714_v23  ;;  %v8780_v1 = vld [vmem:[#allocation2 + $0x14] ss:$112 sps:$4 sm:$0xff]   ;;  %v8783_v2 = vld [vmem:[#allocation2 + $0x1c] ss:$112 sps:$4 sm:$0xff]   ;;  %v9840_v3 = vld [vmem:[%s10285_s0] ss:$8 sps:$4 sm:$0xff]  }
  0xcd   :  { %3025 = vmatprep.subr.bf16.mxu0 %v8715_v24  ;;  %3068 = vmatprep.subr.bf16.mxu1 %v8717_v25  ;;  %v8778_v4 = vld [vmem:[#allocation2 + $0x10] ss:$112 sps:$4 sm:$0xff]   ;;  %v8781_v5 = vld [vmem:[#allocation2 + $0x18] ss:$112 sps:$4 sm:$0xff]   ;;  %v8786_v6 = vld [vmem:[#allocation2 + $0xf4] ss:$112 sps:$4 sm:$0xff]  }
  0xce   :  { %v8789_v7 = vld [vmem:[#allocation2 + $0xfc] ss:$112 sps:$4 sm:$0xff]   ;;  %v8784_v8 = vld [vmem:[#allocation2 + $0xf0] ss:$112 sps:$4 sm:$0xff]   ;;  %v8787_v9 = vld [vmem:[#allocation2 + $0xf8] ss:$112 sps:$4 sm:$0xff]  }
  0xcf   :  { %v8792_v10 = vld [vmem:[#allocation2 + $0x1d4] ss:$112 sps:$4 sm:$0xff]   ;;  %v8795_v11 = vld [vmem:[#allocation2 + $0x1dc] ss:$112 sps:$4 sm:$0xff]   ;;  %v8790_v12 = vld [vmem:[#allocation2 + $0x1d0] ss:$112 sps:$4 sm:$0xff]  }
  0xd0   :  { %3026 = vmatpush1.bf16.msra.mxu0 %v8719_v26  ;;  %3069 = vmatpush1.bf16.msra.mxu1 %v8720_v27  ;;  %v8793_v13 = vld [vmem:[#allocation2 + $0x1d8] ss:$112 sps:$4 sm:$0xff]   ;;  %v8798_v14 = vld [vmem:[#allocation2 + $0x2b4] ss:$112 sps:$4 sm:$0xff]   ;;  %v8801_v15 = vld [vmem:[#allocation2 + $0x2bc] ss:$112 sps:$4 sm:$0xff]  }
  0xd1   :  { %3027 = vmatprep.subr.bf16.mxu0 %v8721_v28  ;;  %3070 = vmatprep.subr.bf16.mxu1 %v8723_v29  ;;  %v8796_v16 = vld [vmem:[#allocation2 + $0x2b0] ss:$112 sps:$4 sm:$0xff]   ;;  %v8799_v17 = vld [vmem:[#allocation2 + $0x2b8] ss:$112 sps:$4 sm:$0xff]   ;;  %v8804_v18 = vld [vmem:[#allocation2 + $0x394] ss:$112 sps:$4 sm:$0xff]  }
  0xd2   :  { %v8807_v19 = vld [vmem:[#allocation2 + $0x39c] ss:$112 sps:$4 sm:$0xff]   ;;  %v8802_v20 = vld [vmem:[#allocation2 + $0x390] ss:$112 sps:$4 sm:$0xff]   ;;  %v8805_v21 = vld [vmem:[#allocation2 + $0x398] ss:$112 sps:$4 sm:$0xff]  }
  0xd3   :  { %v8810_v22 = vld [vmem:[#allocation2 + $0x474] ss:$112 sps:$4 sm:$0xff]   ;;  %v8813_v23 = vld [vmem:[#allocation2 + $0x47c] ss:$112 sps:$4 sm:$0xff]   ;;  %v8808_v24 = vld [vmem:[#allocation2 + $0x470] ss:$112 sps:$4 sm:$0xff]  }
  0xd4   :  { %3028 = vmatpush1.bf16.msra.mxu0 %v8725_v30  ;;  %3071 = vmatpush1.bf16.msra.mxu1 %v8726_v31  ;;  %v8811_v25 = vld [vmem:[#allocation2 + $0x478] ss:$112 sps:$4 sm:$0xff]   ;;  %v8816_v26 = vld [vmem:[#allocation2 + $0x554] ss:$112 sps:$4 sm:$0xff]   ;;  %v8819_v27 = vld [vmem:[#allocation2 + $0x55c] ss:$112 sps:$4 sm:$0xff]  }
  0xd5   :  { %3029 = vmatprep.subr.bf16.mxu0 %v8727_v32  ;;  %3072 = vmatprep.subr.bf16.mxu1 %v8729_v33  ;;  %v8814_v28 = vld [vmem:[#allocation2 + $0x550] ss:$112 sps:$4 sm:$0xff]   ;;  %v8817_v29 = vld [vmem:[#allocation2 + $0x558] ss:$112 sps:$4 sm:$0xff]   ;;  %v8822_v30 = vld [vmem:[#allocation2 + $0x634] ss:$112 sps:$4 sm:$0xff]  }
  0xd6   :  { %v8825_v31 = vld [vmem:[#allocation2 + $0x63c] ss:$112 sps:$4 sm:$0xff]   ;;  %v8820_v32 = vld [vmem:[#allocation2 + $0x630] ss:$112 sps:$4 sm:$0xff]   ;;  %v8823_v33 = vld [vmem:[#allocation2 + $0x638] ss:$112 sps:$4 sm:$0xff]  }
  0xd7   :  { %vm9640_vm0 = vmmov 0  }
  0xd8   :  { %3030 = vmatpush1.bf16.msra.mxu0 %v8731_v34  ;;  %3073 = vmatpush1.bf16.msra.mxu1 %v8732_v35  ;;  %v8828_v34 = vld [vmem:[#allocation2 + $0x714] ss:$112 sps:$4 sm:$0xff]   ;;  %v8831_v35 = vld [vmem:[#allocation2 + $0x71c] ss:$112 sps:$4 sm:$0xff]  }
  0xd9   :  { %3031 = vmatprep.subr.bf16.mxu0 %v8733_v36  ;;  %3074 = vmatprep.subr.bf16.mxu1 %v8735_v37  ;;  %v8826_v36 = vld [vmem:[#allocation2 + $0x710] ss:$112 sps:$4 sm:$0xff]   ;;  %v8829_v37 = vld [vmem:[#allocation2 + $0x718] ss:$112 sps:$4 sm:$0xff]  }
  0xdc   :  { %3032 = vmatpush1.bf16.msra.mxu0 %v8737_v38  ;;  %3075 = vmatpush1.bf16.msra.mxu1 %v8738_v39  ;;  %v8834_v38 = vld [vmem:[#allocation2 + $0x7f4] ss:$112 sps:$4 sm:$0xff]   ;;  %v8837_v39 = vld [vmem:[#allocation2 + $0x7fc] ss:$112 sps:$4 sm:$0xff]  }
  0xdd   :  { %3033 = vmatprep.subr.bf16.mxu0 %v8739_v40  ;;  %3076 = vmatprep.subr.bf16.mxu1 %v8741_v41  ;;  %v8832_v40 = vld [vmem:[#allocation2 + $0x7f0] ss:$112 sps:$4 sm:$0xff]   ;;  %v8835_v41 = vld [vmem:[#allocation2 + $0x7f8] ss:$112 sps:$4 sm:$0xff]  }
  0xe0   :  { %3034 = vmatpush1.bf16.msra.mxu0 %v8743_v42  ;;  %3077 = vmatpush1.bf16.msra.mxu1 %v8744_v43  ;;  %v8840_v42 = vld [vmem:[#allocation2 + $0x8d4] ss:$112 sps:$4 sm:$0xff]   ;;  %v8843_v43 = vld [vmem:[#allocation2 + $0x8dc] ss:$112 sps:$4 sm:$0xff]  }
  0xe1   :  { %3035 = vmatprep.subr.bf16.mxu0 %v8745_v44  ;;  %3078 = vmatprep.subr.bf16.mxu1 %v8747_v45  ;;  %v8838_v44 = vld [vmem:[#allocation2 + $0x8d0] ss:$112 sps:$4 sm:$0xff]   ;;  %v8841_v45 = vld [vmem:[#allocation2 + $0x8d8] ss:$112 sps:$4 sm:$0xff]  }
  0xe4   :  { %3036 = vmatpush1.bf16.msra.mxu0 %v8749_v46  ;;  %3079 = vmatpush1.bf16.msra.mxu1 %v8750_v47  ;;  %v8846_v46 = vld [vmem:[#allocation2 + $0x9b4] ss:$112 sps:$4 sm:$0xff]   ;;  %v8849_v47 = vld [vmem:[#allocation2 + $0x9bc] ss:$112 sps:$4 sm:$0xff]  }
  0xe5   :  { %3037 = vmatprep.subr.bf16.mxu0 %v8751_v49  ;;  %3080 = vmatprep.subr.bf16.mxu1 %v8753_v50  ;;  %v8844_v49 = vld [vmem:[#allocation2 + $0x9b0] ss:$112 sps:$4 sm:$0xff]   ;;  %v8847_v50 = vld [vmem:[#allocation2 + $0x9b8] ss:$112 sps:$4 sm:$0xff]  }
  0xe8   :  { %3038 = vmatpush1.bf16.msra.mxu0 %v8755_v51  ;;  %3081 = vmatpush1.bf16.msra.mxu1 %v8756_v52  ;;  %v8852_v51 = vld [vmem:[#allocation2 + $0xa94] ss:$112 sps:$4 sm:$0xff]   ;;  %v8855_v52 = vld [vmem:[#allocation2 + $0xa9c] ss:$112 sps:$4 sm:$0xff]  }
  0xe9   :  { %3039 = vmatprep.subr.bf16.mxu0 %v8757_v53  ;;  %3082 = vmatprep.subr.bf16.mxu1 %v8759_v54  ;;  %v8850_v53 = vld [vmem:[#allocation2 + $0xa90] ss:$112 sps:$4 sm:$0xff]   ;;  %v8853_v54 = vld [vmem:[#allocation2 + $0xa98] ss:$112 sps:$4 sm:$0xff]  }
  0xec   :  { %3040 = vmatpush1.bf16.msra.mxu0 %v8761_v55  ;;  %3083 = vmatpush1.bf16.msra.mxu1 %v8762_v56  ;;  %v8858_v55 = vld [vmem:[#allocation2 + $0xb74] ss:$112 sps:$4 sm:$0xff]   ;;  %v8861_v56 = vld [vmem:[#allocation2 + $0xb7c] ss:$112 sps:$4 sm:$0xff]  }
  0xed   :  { %3041 = vmatprep.subr.bf16.mxu0 %v8763_v57  ;;  %3084 = vmatprep.subr.bf16.mxu1 %v8765_v58  ;;  %v8856_v57 = vld [vmem:[#allocation2 + $0xb70] ss:$112 sps:$4 sm:$0xff]   ;;  %v8859_v58 = vld [vmem:[#allocation2 + $0xb78] ss:$112 sps:$4 sm:$0xff]  }
  0xf0   :  { %3042 = vmatpush1.bf16.msra.mxu0 %v8767_v59  ;;  %3085 = vmatpush1.bf16.msra.mxu1 %v8768_v60  ;;  %v8864_v59 = vld [vmem:[#allocation2 + $0xc54] ss:$112 sps:$4 sm:$0xff]   ;;  %v8867_v60 = vld [vmem:[#allocation2 + $0xc5c] ss:$112 sps:$4 sm:$0xff]  }
  0xf1   :  { %3043 = vmatprep.subr.bf16.mxu0 %v8769_v61  ;;  %3086 = vmatprep.subr.bf16.mxu1 %v8771_v62  ;;  %v8862_v61 = vld [vmem:[#allocation2 + $0xc50] ss:$112 sps:$4 sm:$0xff]   ;;  %v8865_v62 = vld [vmem:[#allocation2 + $0xc58] ss:$112 sps:$4 sm:$0xff]  }
  0xf4   :  { %3044 = vmatpush1.bf16.msra.mxu0 %v8773_v63  ;;  %3087 = vmatpush1.bf16.msra.mxu1 %v8774_v0  ;;  %v8870_v63 = vld [vmem:[#allocation2 + $0xd34] ss:$112 sps:$4 sm:$0xff]   ;;  %v8873_v0 = vld [vmem:[#allocation2 + $0xd3c] ss:$112 sps:$4 sm:$0xff]  }
  0xf5   :  { %3099 = vmatprep.subr.bf16.mxu0 %v8780_v1  ;;  %3142 = vmatprep.subr.bf16.mxu1 %v8783_v2  ;;  %v8868_v1 = vld [vmem:[#allocation2 + $0xd30] ss:$112 sps:$4 sm:$0xff]   ;;  %v8871_v2 = vld [vmem:[#allocation2 + $0xd38] ss:$112 sps:$4 sm:$0xff]  }
  0xf7   :  { %3046 = vmatmul.mubr.bf16.vlgmr.msra.gmra.mrb[0].mxu0 %v9840_v3  ;;  %3089 = vmatmul.mubr.bf16.vlgmr.msra.gmra.mrb[0].mxu1 %v9840_v3 }
  0xf8   :  { %3100 = vmatpush1.bf16.msra.mxu0 %v8778_v4  ;;  %3143 = vmatpush1.bf16.msra.mxu1 %v8781_v5  ;;  %v8876_v4 = vld [vmem:[#allocation2 + $0x24] ss:$112 sps:$4 sm:$0xff]   ;;  %v8879_v5 = vld [vmem:[#allocation2 + $0x2c] ss:$112 sps:$4 sm:$0xff]  }
  0xf9   :  { %3101 = vmatprep.subr.bf16.mxu0 %v8786_v6  ;;  %3144 = vmatprep.subr.bf16.mxu1 %v8789_v7  ;;  %v8874_v6 = vld [vmem:[#allocation2 + $0x20] ss:$112 sps:$4 sm:$0xff]   ;;  %v8877_v7 = vld [vmem:[#allocation2 + $0x28] ss:$112 sps:$4 sm:$0xff]  }
  0xfa   :  { %3131 = vmatprep.mubr.bf16.mxu0 %v9833_v48  ;;  %3174 = vmatprep.mubr.bf16.mxu1 %v9833_v48 }
  0xfc   :  { %3102 = vmatpush1.bf16.msra.mxu0 %v8784_v8  ;;  %3145 = vmatpush1.bf16.msra.mxu1 %v8787_v9  ;;  %v8882_v8 = vld [vmem:[#allocation2 + $0x104] ss:$112 sps:$4 sm:$0xff]   ;;  %v8885_v9 = vld [vmem:[#allocation2 + $0x10c] ss:$112 sps:$4 sm:$0xff]  }
  0xfd   :  { %3103 = vmatprep.subr.bf16.mxu0 %v8792_v10  ;;  %3146 = vmatprep.subr.bf16.mxu1 %v8795_v11  ;;  %v8880_v10 = vld [vmem:[#allocation2 + $0x100] ss:$112 sps:$4 sm:$0xff]   ;;  %v8883_v11 = vld [vmem:[#allocation2 + $0x108] ss:$112 sps:$4 sm:$0xff]  }
 0x100   :  { %3104 = vmatpush1.bf16.msra.mxu0 %v8790_v12  ;;  %3147 = vmatpush1.bf16.msra.mxu1 %v8793_v13  ;;  %v8888_v12 = vld [vmem:[#allocation2 + $0x1e4] ss:$112 sps:$4 sm:$0xff]   ;;  %v8891_v13 = vld [vmem:[#allocation2 + $0x1ec] ss:$112 sps:$4 sm:$0xff]  }
 0x101   :  { %3105 = vmatprep.subr.bf16.mxu0 %v8798_v14  ;;  %3148 = vmatprep.subr.bf16.mxu1 %v8801_v15  ;;  %v8886_v14 = vld [vmem:[#allocation2 + $0x1e0] ss:$112 sps:$4 sm:$0xff]   ;;  %v8889_v15 = vld [vmem:[#allocation2 + $0x1e8] ss:$112 sps:$4 sm:$0xff]  }
 0x104   :  { %3106 = vmatpush1.bf16.msra.mxu0 %v8796_v16  ;;  %3149 = vmatpush1.bf16.msra.mxu1 %v8799_v17  ;;  %v8894_v16 = vld [vmem:[#allocation2 + $0x2c4] ss:$112 sps:$4 sm:$0xff]   ;;  %v8897_v17 = vld [vmem:[#allocation2 + $0x2cc] ss:$112 sps:$4 sm:$0xff]  }
 0x105   :  { %3107 = vmatprep.subr.bf16.mxu0 %v8804_v18  ;;  %3150 = vmatprep.subr.bf16.mxu1 %v8807_v19  ;;  %v8892_v18 = vld [vmem:[#allocation2 + $0x2c0] ss:$112 sps:$4 sm:$0xff]   ;;  %v8895_v19 = vld [vmem:[#allocation2 + $0x2c8] ss:$112 sps:$4 sm:$0xff]  }
 0x108   :  { %3108 = vmatpush1.bf16.msra.mxu0 %v8802_v20  ;;  %3151 = vmatpush1.bf16.msra.mxu1 %v8805_v21  ;;  %v8900_v20 = vld [vmem:[#allocation2 + $0x3a4] ss:$112 sps:$4 sm:$0xff]   ;;  %v8903_v21 = vld [vmem:[#allocation2 + $0x3ac] ss:$112 sps:$4 sm:$0xff]  }
 0x109   :  { %3109 = vmatprep.subr.bf16.mxu0 %v8810_v22  ;;  %3152 = vmatprep.subr.bf16.mxu1 %v8813_v23  ;;  %v8898_v22 = vld [vmem:[#allocation2 + $0x3a0] ss:$112 sps:$4 sm:$0xff]   ;;  %v8901_v23 = vld [vmem:[#allocation2 + $0x3a8] ss:$112 sps:$4 sm:$0xff]  }
 0x10c   :  { %3110 = vmatpush1.bf16.msra.mxu0 %v8808_v24  ;;  %3153 = vmatpush1.bf16.msra.mxu1 %v8811_v25  ;;  %v8909_v24 = vld [vmem:[#allocation2 + $0x48c] ss:$112 sps:$4 sm:$0xff]   ;;  %v8904_v25 = vld [vmem:[#allocation2 + $0x480] ss:$112 sps:$4 sm:$0xff]  }
 0x10d   :  { %3111 = vmatprep.subr.bf16.mxu0 %v8816_v26  ;;  %3154 = vmatprep.subr.bf16.mxu1 %v8819_v27  ;;  %v8907_v26 = vld [vmem:[#allocation2 + $0x488] ss:$112 sps:$4 sm:$0xff]   ;;  %v8912_v27 = vld [vmem:[#allocation2 + $0x564] ss:$112 sps:$4 sm:$0xff]  }
 0x110   :  { %3112 = vmatpush1.bf16.msra.mxu0 %v8814_v28  ;;  %3155 = vmatpush1.bf16.msra.mxu1 %v8817_v29  ;;  %v8915_v28 = vld [vmem:[#allocation2 + $0x56c] ss:$112 sps:$4 sm:$0xff]   ;;  %v8910_v29 = vld [vmem:[#allocation2 + $0x560] ss:$112 sps:$4 sm:$0xff]  }
 0x111   :  { %3113 = vmatprep.subr.bf16.mxu0 %v8822_v30  ;;  %3156 = vmatprep.subr.bf16.mxu1 %v8825_v31  ;;  %v8913_v30 = vld [vmem:[#allocation2 + $0x568] ss:$112 sps:$4 sm:$0xff]   ;;  %v8918_v31 = vld [vmem:[#allocation2 + $0x644] ss:$112 sps:$4 sm:$0xff]  }
 0x114   :  { %3114 = vmatpush1.bf16.msra.mxu0 %v8820_v32  ;;  %3157 = vmatpush1.bf16.msra.mxu1 %v8823_v33  ;;  %v8921_v32 = vld [vmem:[#allocation2 + $0x64c] ss:$112 sps:$4 sm:$0xff]   ;;  %v8916_v33 = vld [vmem:[#allocation2 + $0x640] ss:$112 sps:$4 sm:$0xff]  }
 0x115   :  { %3115 = vmatprep.subr.bf16.mxu0 %v8828_v34  ;;  %3158 = vmatprep.subr.bf16.mxu1 %v8831_v35  ;;  %v8919_v34 = vld [vmem:[#allocation2 + $0x648] ss:$112 sps:$4 sm:$0xff]   ;;  %v8924_v35 = vld [vmem:[#allocation2 + $0x724] ss:$112 sps:$4 sm:$0xff]  }
 0x118   :  { %3116 = vmatpush1.bf16.msra.mxu0 %v8826_v36  ;;  %3159 = vmatpush1.bf16.msra.mxu1 %v8829_v37  ;;  %v8927_v36 = vld [vmem:[#allocation2 + $0x72c] ss:$112 sps:$4 sm:$0xff]   ;;  %v8922_v37 = vld [vmem:[#allocation2 + $0x720] ss:$112 sps:$4 sm:$0xff]  }
 0x119   :  { %3117 = vmatprep.subr.bf16.mxu0 %v8834_v38  ;;  %3160 = vmatprep.subr.bf16.mxu1 %v8837_v39  ;;  %v8925_v38 = vld [vmem:[#allocation2 + $0x728] ss:$112 sps:$4 sm:$0xff]   ;;  %v8930_v39 = vld [vmem:[#allocation2 + $0x804] ss:$112 sps:$4 sm:$0xff]  }
 0x11c   :  { %3118 = vmatpush1.bf16.msra.mxu0 %v8832_v40  ;;  %3161 = vmatpush1.bf16.msra.mxu1 %v8835_v41  ;;  %v8933_v40 = vld [vmem:[#allocation2 + $0x80c] ss:$112 sps:$4 sm:$0xff]   ;;  %v8928_v41 = vld [vmem:[#allocation2 + $0x800] ss:$112 sps:$4 sm:$0xff]  }
 0x11d   :  { %3119 = vmatprep.subr.bf16.mxu0 %v8840_v42  ;;  %3162 = vmatprep.subr.bf16.mxu1 %v8843_v43  ;;  %v8931_v42 = vld [vmem:[#allocation2 + $0x808] ss:$112 sps:$4 sm:$0xff]   ;;  %v8936_v43 = vld [vmem:[#allocation2 + $0x8e4] ss:$112 sps:$4 sm:$0xff]  }
 0x120   :  { %3120 = vmatpush1.bf16.msra.mxu0 %v8838_v44  ;;  %3163 = vmatpush1.bf16.msra.mxu1 %v8841_v45  ;;  %v8939_v44 = vld [vmem:[#allocation2 + $0x8ec] ss:$112 sps:$4 sm:$0xff]   ;;  %v8934_v45 = vld [vmem:[#allocation2 + $0x8e0] ss:$112 sps:$4 sm:$0xff]  }
 0x121   :  { %3121 = vmatprep.subr.bf16.mxu0 %v8846_v46  ;;  %3164 = vmatprep.subr.bf16.mxu1 %v8849_v47  ;;  %v8937_v46 = vld [vmem:[#allocation2 + $0x8e8] ss:$112 sps:$4 sm:$0xff]   ;;  %v8942_v47 = vld [vmem:[#allocation2 + $0x9c4] ss:$112 sps:$4 sm:$0xff]  }
 0x124   :  { %3122 = vmatpush1.bf16.msra.mxu0 %v8844_v49  ;;  %3165 = vmatpush1.bf16.msra.mxu1 %v8847_v50  ;;  %v8945_v49 = vld [vmem:[#allocation2 + $0x9cc] ss:$112 sps:$4 sm:$0xff]   ;;  %v8940_v50 = vld [vmem:[#allocation2 + $0x9c0] ss:$112 sps:$4 sm:$0xff]  }
 0x125   :  { %3123 = vmatprep.subr.bf16.mxu0 %v8852_v51  ;;  %3166 = vmatprep.subr.bf16.mxu1 %v8855_v52  ;;  %v8943_v51 = vld [vmem:[#allocation2 + $0x9c8] ss:$112 sps:$4 sm:$0xff]   ;;  %v8948_v52 = vld [vmem:[#allocation2 + $0xaa4] ss:$112 sps:$4 sm:$0xff]  }
 0x128   :  { %3124 = vmatpush1.bf16.msra.mxu0 %v8850_v53  ;;  %3167 = vmatpush1.bf16.msra.mxu1 %v8853_v54  ;;  %v8951_v53 = vld [vmem:[#allocation2 + $0xaac] ss:$112 sps:$4 sm:$0xff]   ;;  %v8946_v54 = vld [vmem:[#allocation2 + $0xaa0] ss:$112 sps:$4 sm:$0xff]  }
 0x129   :  { %3125 = vmatprep.subr.bf16.mxu0 %v8858_v55  ;;  %3168 = vmatprep.subr.bf16.mxu1 %v8861_v56  ;;  %v8949_v55 = vld [vmem:[#allocation2 + $0xaa8] ss:$112 sps:$4 sm:$0xff]   ;;  %v8954_v56 = vld [vmem:[#allocation2 + $0xb84] ss:$112 sps:$4 sm:$0xff]  }
 0x12c   :  { %3126 = vmatpush1.bf16.msra.mxu0 %v8856_v57  ;;  %3169 = vmatpush1.bf16.msra.mxu1 %v8859_v58  ;;  %v8957_v57 = vld [vmem:[#allocation2 + $0xb8c] ss:$112 sps:$4 sm:$0xff]   ;;  %v8952_v58 = vld [vmem:[#allocation2 + $0xb80] ss:$112 sps:$4 sm:$0xff]  }
 0x12d   :  { %3127 = vmatprep.subr.bf16.mxu0 %v8864_v59  ;;  %3170 = vmatprep.subr.bf16.mxu1 %v8867_v60  ;;  %v8955_v59 = vld [vmem:[#allocation2 + $0xb88] ss:$112 sps:$4 sm:$0xff]   ;;  %v8960_v60 = vld [vmem:[#allocation2 + $0xc64] ss:$112 sps:$4 sm:$0xff]  }
 0x130   :  { %3128 = vmatpush1.bf16.msra.mxu0 %v8862_v61  ;;  %3171 = vmatpush1.bf16.msra.mxu1 %v8865_v62  ;;  %v8963_v61 = vld [vmem:[#allocation2 + $0xc6c] ss:$112 sps:$4 sm:$0xff]   ;;  %v8958_v62 = vld [vmem:[#allocation2 + $0xc60] ss:$112 sps:$4 sm:$0xff]  }
 0x131   :  { %3129 = vmatprep.subr.bf16.mxu0 %v8870_v63  ;;  %3172 = vmatprep.subr.bf16.mxu1 %v8873_v0  ;;  %v8961_v63 = vld [vmem:[#allocation2 + $0xc68] ss:$112 sps:$4 sm:$0xff]   ;;  %v8966_v0 = vld [vmem:[#allocation2 + $0xd44] ss:$112 sps:$4 sm:$0xff]  }
 0x134   :  { %3130 = vmatpush1.bf16.msra.mxu0 %v8868_v1  ;;  %3173 = vmatpush1.bf16.msra.mxu1 %v8871_v2  ;;  %v8969_v1 = vld [vmem:[#allocation2 + $0xd4c] ss:$112 sps:$4 sm:$0xff]   ;;  %v8964_v2 = vld [vmem:[#allocation2 + $0xd40] ss:$112 sps:$4 sm:$0xff]  }
 0x135   :  { %3185 = vmatprep.subr.bf16.mxu0 %v8876_v4  ;;  %3228 = vmatprep.subr.bf16.mxu1 %v8879_v5  ;;  %v8967_v4 = vld [vmem:[#allocation2 + $0xd48] ss:$112 sps:$4 sm:$0xff]   ;;  %v8972_v5 = vld [vmem:[#allocation2 + $0x34] ss:$112 sps:$4 sm:$0xff]  }
 0x137   :  { %3132 = vmatmul.mubr.bf16.vlgmr.msra.gmra.mrb[4].mxu0 %v9840_v3  ;;  %3175 = vmatmul.mubr.bf16.vlgmr.msra.gmra.mrb[4].mxu1 %v9840_v3 }
 0x138   :  { %3186 = vmatpush1.bf16.msra.mxu0 %v8874_v6  ;;  %3229 = vmatpush1.bf16.msra.mxu1 %v8877_v7  ;;  %v8975_v6 = vld [vmem:[#allocation2 + $0x3c] ss:$112 sps:$4 sm:$0xff]   ;;  %v8970_v7 = vld [vmem:[#allocation2 + $0x30] ss:$112 sps:$4 sm:$0xff]  }
 0x139   :  { %3187 = vmatprep.subr.bf16.mxu0 %v8882_v8  ;;  %3230 = vmatprep.subr.bf16.mxu1 %v8885_v9  ;;  %v8973_v8 = vld [vmem:[#allocation2 + $0x38] ss:$112 sps:$4 sm:$0xff]   ;;  %v8978_v9 = vld [vmem:[#allocation2 + $0x114] ss:$112 sps:$4 sm:$0xff]  }
 0x13a   :  { %3217 = vmatprep.mubr.bf16.mxu0 %v9833_v48  ;;  %3260 = vmatprep.mubr.bf16.mxu1 %v9833_v48  ;;  %v8906_v48 = vld [vmem:[#allocation2 + $0x484] ss:$112 sps:$4 sm:$0xff]  }
 0x13c   :  { %3188 = vmatpush1.bf16.msra.mxu0 %v8880_v10  ;;  %3231 = vmatpush1.bf16.msra.mxu1 %v8883_v11  ;;  %v8981_v10 = vld [vmem:[#allocation2 + $0x11c] ss:$112 sps:$4 sm:$0xff]   ;;  %v8976_v11 = vld [vmem:[#allocation2 + $0x110] ss:$112 sps:$4 sm:$0xff]  }
 0x13d   :  { %3189 = vmatprep.subr.bf16.mxu0 %v8888_v12  ;;  %3232 = vmatprep.subr.bf16.mxu1 %v8891_v13  ;;  %v8979_v12 = vld [vmem:[#allocation2 + $0x118] ss:$112 sps:$4 sm:$0xff]   ;;  %v8984_v13 = vld [vmem:[#allocation2 + $0x1f4] ss:$112 sps:$4 sm:$0xff]  }
 0x140   :  { %3190 = vmatpush1.bf16.msra.mxu0 %v8886_v14  ;;  %3233 = vmatpush1.bf16.msra.mxu1 %v8889_v15  ;;  %v8987_v14 = vld [vmem:[#allocation2 + $0x1fc] ss:$112 sps:$4 sm:$0xff]  }
 0x141   :  { %3191 = vmatprep.subr.bf16.mxu0 %v8894_v16  ;;  %3234 = vmatprep.subr.bf16.mxu1 %v8897_v17  ;;  %v9855_v15 = vld [vmem:[%s10285_s0 + $0x4] ss:$8 sps:$4 sm:$0xff]   ;;  %v8982_v16 = vld [vmem:[#allocation2 + $0x1f0] ss:$112 sps:$4 sm:$0xff]  }
 0x142   :  { %v8990_v17 = vld [vmem:[#allocation2 + $0x2d4] ss:$112 sps:$4 sm:$0xff]  }
 0x144   :  { %3192 = vmatpush1.bf16.msra.mxu0 %v8892_v18  ;;  %3235 = vmatpush1.bf16.msra.mxu1 %v8895_v19  ;;  %v8993_v18 = vld [vmem:[#allocation2 + $0x2dc] ss:$112 sps:$4 sm:$0xff]   ;;  %v8988_v19 = vld [vmem:[#allocation2 + $0x2d0] ss:$112 sps:$4 sm:$0xff]  }
 0x145   :  { %3193 = vmatprep.subr.bf16.mxu0 %v8900_v20  ;;  %3236 = vmatprep.subr.bf16.mxu1 %v8903_v21  ;;  %v8991_v20 = vld [vmem:[#allocation2 + $0x2d8] ss:$112 sps:$4 sm:$0xff]   ;;  %v8996_v21 = vld [vmem:[#allocation2 + $0x3b4] ss:$112 sps:$4 sm:$0xff]  }
 0x148   :  { %3194 = vmatpush1.bf16.msra.mxu0 %v8898_v22  ;;  %3237 = vmatpush1.bf16.msra.mxu1 %v8901_v23  ;;  %v8999_v22 = vld [vmem:[#allocation2 + $0x3bc] ss:$112 sps:$4 sm:$0xff]   ;;  %v8994_v23 = vld [vmem:[#allocation2 + $0x3b0] ss:$112 sps:$4 sm:$0xff]  }
 0x149   :  { %3195 = vmatprep.subr.bf16.mxu0 %v8906_v48  ;;  %3238 = vmatprep.subr.bf16.mxu1 %v8909_v24  ;;  %v8997_v48 = vld [vmem:[#allocation2 + $0x3b8] ss:$112 sps:$4 sm:$0xff]   ;;  %v9002_v24 = vld [vmem:[#allocation2 + $0x494] ss:$112 sps:$4 sm:$0xff]  }
 0x14c   :  { %3196 = vmatpush1.bf16.msra.mxu0 %v8904_v25  ;;  %3239 = vmatpush1.bf16.msra.mxu1 %v8907_v26  ;;  %v9005_v25 = vld [vmem:[#allocation2 + $0x49c] ss:$112 sps:$4 sm:$0xff]   ;;  %v9000_v26 = vld [vmem:[#allocation2 + $0x490] ss:$112 sps:$4 sm:$0xff]  }
 0x14d   :  { %3197 = vmatprep.subr.bf16.mxu0 %v8912_v27  ;;  %3240 = vmatprep.subr.bf16.mxu1 %v8915_v28  ;;  %v9003_v27 = vld [vmem:[#allocation2 + $0x498] ss:$112 sps:$4 sm:$0xff]   ;;  %v9008_v28 = vld [vmem:[#allocation2 + $0x574] ss:$112 sps:$4 sm:$0xff]  }
 0x150   :  { %3198 = vmatpush1.bf16.msra.mxu0 %v8910_v29  ;;  %3241 = vmatpush1.bf16.msra.mxu1 %v8913_v30  ;;  %v9011_v29 = vld [vmem:[#allocation2 + $0x57c] ss:$112 sps:$4 sm:$0xff]   ;;  %v9006_v30 = vld [vmem:[#allocation2 + $0x570] ss:$112 sps:$4 sm:$0xff]  }
 0x151   :  { %3199 = vmatprep.subr.bf16.mxu0 %v8918_v31  ;;  %3242 = vmatprep.subr.bf16.mxu1 %v8921_v32  ;;  %v9009_v31 = vld [vmem:[#allocation2 + $0x578] ss:$112 sps:$4 sm:$0xff]   ;;  %v9014_v32 = vld [vmem:[#allocation2 + $0x654] ss:$112 sps:$4 sm:$0xff]  }
 0x154   :  { %3200 = vmatpush1.bf16.msra.mxu0 %v8916_v33  ;;  %3243 = vmatpush1.bf16.msra.mxu1 %v8919_v34  ;;  %v9017_v33 = vld [vmem:[#allocation2 + $0x65c] ss:$112 sps:$4 sm:$0xff]   ;;  %v9012_v34 = vld [vmem:[#allocation2 + $0x650] ss:$112 sps:$4 sm:$0xff]  }
 0x155   :  { %3201 = vmatprep.subr.bf16.mxu0 %v8924_v35  ;;  %3244 = vmatprep.subr.bf16.mxu1 %v8927_v36  ;;  %v9015_v35 = vld [vmem:[#allocation2 + $0x658] ss:$112 sps:$4 sm:$0xff]   ;;  %v9020_v36 = vld [vmem:[#allocation2 + $0x734] ss:$112 sps:$4 sm:$0xff]  }
 0x158   :  { %3202 = vmatpush1.bf16.msra.mxu0 %v8922_v37  ;;  %3245 = vmatpush1.bf16.msra.mxu1 %v8925_v38  ;;  %v9023_v37 = vld [vmem:[#allocation2 + $0x73c] ss:$112 sps:$4 sm:$0xff]   ;;  %v9018_v38 = vld [vmem:[#allocation2 + $0x730] ss:$112 sps:$4 sm:$0xff]  }
 0x159   :  { %3203 = vmatprep.subr.bf16.mxu0 %v8930_v39  ;;  %3246 = vmatprep.subr.bf16.mxu1 %v8933_v40  ;;  %v9021_v39 = vld [vmem:[#allocation2 + $0x738] ss:$112 sps:$4 sm:$0xff]   ;;  %v9026_v40 = vld [vmem:[#allocation2 + $0x814] ss:$112 sps:$4 sm:$0xff]  }
 0x15c   :  { %3204 = vmatpush1.bf16.msra.mxu0 %v8928_v41  ;;  %3247 = vmatpush1.bf16.msra.mxu1 %v8931_v42  ;;  %v9029_v41 = vld [vmem:[#allocation2 + $0x81c] ss:$112 sps:$4 sm:$0xff]   ;;  %v9024_v42 = vld [vmem:[#allocation2 + $0x810] ss:$112 sps:$4 sm:$0xff]  }
 0x15d   :  { %3205 = vmatprep.subr.bf16.mxu0 %v8936_v43  ;;  %3248 = vmatprep.subr.bf16.mxu1 %v8939_v44  ;;  %v9027_v43 = vld [vmem:[#allocation2 + $0x818] ss:$112 sps:$4 sm:$0xff]   ;;  %v9032_v44 = vld [vmem:[#allocation2 + $0x8f4] ss:$112 sps:$4 sm:$0xff]  }
 0x160   :  { %3206 = vmatpush1.bf16.msra.mxu0 %v8934_v45  ;;  %3249 = vmatpush1.bf16.msra.mxu1 %v8937_v46  ;;  %v9035_v45 = vld [vmem:[#allocation2 + $0x8fc] ss:$112 sps:$4 sm:$0xff]   ;;  %v9030_v46 = vld [vmem:[#allocation2 + $0x8f0] ss:$112 sps:$4 sm:$0xff]  }
 0x161   :  { %3207 = vmatprep.subr.bf16.mxu0 %v8942_v47  ;;  %3250 = vmatprep.subr.bf16.mxu1 %v8945_v49  ;;  %v9033_v47 = vld [vmem:[#allocation2 + $0x8f8] ss:$112 sps:$4 sm:$0xff]   ;;  %v9038_v49 = vld [vmem:[#allocation2 + $0x9d4] ss:$112 sps:$4 sm:$0xff]  }
 0x164   :  { %3208 = vmatpush1.bf16.msra.mxu0 %v8940_v50  ;;  %3251 = vmatpush1.bf16.msra.mxu1 %v8943_v51  ;;  %v9041_v50 = vld [vmem:[#allocation2 + $0x9dc] ss:$112 sps:$4 sm:$0xff]   ;;  %v9036_v51 = vld [vmem:[#allocation2 + $0x9d0] ss:$112 sps:$4 sm:$0xff]  }
 0x165   :  { %3209 = vmatprep.subr.bf16.mxu0 %v8948_v52  ;;  %3252 = vmatprep.subr.bf16.mxu1 %v8951_v53  ;;  %v9039_v52 = vld [vmem:[#allocation2 + $0x9d8] ss:$112 sps:$4 sm:$0xff]   ;;  %v9044_v53 = vld [vmem:[#allocation2 + $0xab4] ss:$112 sps:$4 sm:$0xff]  }
 0x168   :  { %3210 = vmatpush1.bf16.msra.mxu0 %v8946_v54  ;;  %3253 = vmatpush1.bf16.msra.mxu1 %v8949_v55  ;;  %v9047_v54 = vld [vmem:[#allocation2 + $0xabc] ss:$112 sps:$4 sm:$0xff]   ;;  %v9042_v55 = vld [vmem:[#allocation2 + $0xab0] ss:$112 sps:$4 sm:$0xff]  }
 0x169   :  { %3211 = vmatprep.subr.bf16.mxu0 %v8954_v56  ;;  %3254 = vmatprep.subr.bf16.mxu1 %v8957_v57  ;;  %v9045_v56 = vld [vmem:[#allocation2 + $0xab8] ss:$112 sps:$4 sm:$0xff]   ;;  %v9050_v57 = vld [vmem:[#allocation2 + $0xb94] ss:$112 sps:$4 sm:$0xff]  }
 0x16c   :  { %3212 = vmatpush1.bf16.msra.mxu0 %v8952_v58  ;;  %3255 = vmatpush1.bf16.msra.mxu1 %v8955_v59  ;;  %v9053_v58 = vld [vmem:[#allocation2 + $0xb9c] ss:$112 sps:$4 sm:$0xff]   ;;  %v9048_v59 = vld [vmem:[#allocation2 + $0xb90] ss:$112 sps:$4 sm:$0xff]  }
 0x16d   :  { %3213 = vmatprep.subr.bf16.mxu0 %v8960_v60  ;;  %3256 = vmatprep.subr.bf16.mxu1 %v8963_v61  ;;  %v9051_v60 = vld [vmem:[#allocation2 + $0xb98] ss:$112 sps:$4 sm:$0xff]   ;;  %v9056_v61 = vld [vmem:[#allocation2 + $0xc74] ss:$112 sps:$4 sm:$0xff]  }
 0x170   :  { %3214 = vmatpush1.bf16.msra.mxu0 %v8958_v62  ;;  %3257 = vmatpush1.bf16.msra.mxu1 %v8961_v63  ;;  %v9059_v62 = vld [vmem:[#allocation2 + $0xc7c] ss:$112 sps:$4 sm:$0xff]   ;;  %v9054_v63 = vld [vmem:[#allocation2 + $0xc70] ss:$112 sps:$4 sm:$0xff]  }
 0x171   :  { %3215 = vmatprep.subr.bf16.mxu0 %v8966_v0  ;;  %3258 = vmatprep.subr.bf16.mxu1 %v8969_v1  ;;  %v9057_v0 = vld [vmem:[#allocation2 + $0xc78] ss:$112 sps:$4 sm:$0xff]   ;;  %v9062_v1 = vld [vmem:[#allocation2 + $0xd54] ss:$112 sps:$4 sm:$0xff]  }
 0x174   :  { %3216 = vmatpush1.bf16.msra.mxu0 %v8964_v2  ;;  %3259 = vmatpush1.bf16.msra.mxu1 %v8967_v4  ;;  %v9065_v2 = vld [vmem:[#allocation2 + $0xd5c] ss:$112 sps:$4 sm:$0xff]   ;;  %v9060_v4 = vld [vmem:[#allocation2 + $0xd50] ss:$112 sps:$4 sm:$0xff]  }
 0x175   :  { %3271 = vmatprep.subr.bf16.mxu0 %v8972_v5  ;;  %3314 = vmatprep.subr.bf16.mxu1 %v8975_v6  ;;  %v9063_v5 = vld [vmem:[#allocation2 + $0xd58] ss:$112 sps:$4 sm:$0xff]   ;;  %v9068_v6 = vld [vmem:[#allocation2 + $0x44] ss:$112 sps:$4 sm:$0xff]  }
 0x177   :  { %3218 = vmatmul.mubr.bf16.vlgmr.msra.gmra.mrb[8].mxu0 %v9840_v3  ;;  %3261 = vmatmul.mubr.bf16.vlgmr.msra.gmra.mrb[8].mxu1 %v9840_v3  ;;  %v8985_v3 = vld [vmem:[#allocation2 + $0x1f8] ss:$112 sps:$4 sm:$0xff]  }
 0x178   :  { %3272 = vmatpush1.bf16.msra.mxu0 %v8970_v7  ;;  %3315 = vmatpush1.bf16.msra.mxu1 %v8973_v8  ;;  %v9071_v7 = vld [vmem:[#allocation2 + $0x4c] ss:$112 sps:$4 sm:$0xff]   ;;  %v9066_v8 = vld [vmem:[#allocation2 + $0x40] ss:$112 sps:$4 sm:$0xff]  }
 0x179   :  { %3273 = vmatprep.subr.bf16.mxu0 %v8978_v9  ;;  %3316 = vmatprep.subr.bf16.mxu1 %v8981_v10  ;;  %v9069_v9 = vld [vmem:[#allocation2 + $0x48] ss:$112 sps:$4 sm:$0xff]   ;;  %v9074_v10 = vld [vmem:[#allocation2 + $0x124] ss:$112 sps:$4 sm:$0xff]  }
 0x17a   :  { %3303 = vmatprep.mubr.bf16.mxu0 %v9855_v15  ;;  %3346 = vmatprep.mubr.bf16.mxu1 %v9855_v15 }
 0x17c   :  { %3274 = vmatpush1.bf16.msra.mxu0 %v8976_v11  ;;  %3317 = vmatpush1.bf16.msra.mxu1 %v8979_v12  ;;  %v9077_v11 = vld [vmem:[#allocation2 + $0x12c] ss:$112 sps:$4 sm:$0xff]   ;;  %v9862_v12 = vld [vmem:[%s10285_s0] ss:$8 sps:$4 sm:$0xff]  }
 0x17d   :  { %3275 = vmatprep.subr.bf16.mxu0 %v8984_v13  ;;  %3318 = vmatprep.subr.bf16.mxu1 %v8987_v14  ;;  %v9072_v13 = vld [vmem:[#allocation2 + $0x120] ss:$112 sps:$4 sm:$0xff]   ;;  %v9075_v14 = vld [vmem:[#allocation2 + $0x128] ss:$112 sps:$4 sm:$0xff]  }
 0x180   :  { %3276 = vmatpush1.bf16.msra.mxu0 %v8982_v16  ;;  %3319 = vmatpush1.bf16.msra.mxu1 %v8985_v3  ;;  %v9080_v16 = vld [vmem:[#allocation2 + $0x204] ss:$112 sps:$4 sm:$0xff]   ;;  %v9083_v3 = vld [vmem:[#allocation2 + $0x20c] ss:$112 sps:$4 sm:$0xff]  }
 0x181   :  { %3277 = vmatprep.subr.bf16.mxu0 %v8990_v17  ;;  %3320 = vmatprep.subr.bf16.mxu1 %v8993_v18  ;;  %v623_v17 = vlaneseq  ;;  %v9078_v18 = vld [vmem:[#allocation2 + $0x200] ss:$112 sps:$4 sm:$0xff]  }
 0x184   :  { %3278 = vmatpush1.bf16.msra.mxu0 %v8988_v19  ;;  %3321 = vmatpush1.bf16.msra.mxu1 %v8991_v20  ;;  %v9081_v19 = vld [vmem:[#allocation2 + $0x208] ss:$112 sps:$4 sm:$0xff]   ;;  %v9086_v20 = vld [vmem:[#allocation2 + $0x2e4] ss:$112 sps:$4 sm:$0xff]  }
 0x185   :  { %3279 = vmatprep.subr.bf16.mxu0 %v8996_v21  ;;  %3322 = vmatprep.subr.bf16.mxu1 %v8999_v22  ;;  %v9089_v21 = vld [vmem:[#allocation2 + $0x2ec] ss:$112 sps:$4 sm:$0xff]   ;;  %v9868_v22 = vshrl.u32 %v623_v17, 7 }
 0x186   :  { %v9149_v17 = vld [vmem:[#allocation2 + $0xbac] ss:$112 sps:$4 sm:$0xff]  }
 0x188   :  { %3280 = vmatpush1.bf16.msra.mxu0 %v8994_v23  ;;  %3323 = vmatpush1.bf16.msra.mxu1 %v8997_v48  ;;  %v9084_v23 = vld [vmem:[#allocation2 + $0x2e0] ss:$112 sps:$4 sm:$0xff]   ;;  %v9087_v48 = vld [vmem:[#allocation2 + $0x2e8] ss:$112 sps:$4 sm:$0xff]  }
 0x189   :  { %3281 = vmatprep.subr.bf16.mxu0 %v9002_v24  ;;  %3324 = vmatprep.subr.bf16.mxu1 %v9005_v25  ;;  %v9092_v24 = vld [vmem:[#allocation2 + $0x3c4] ss:$112 sps:$4 sm:$0xff]   ;;  %v9095_v25 = vld [vmem:[#allocation2 + $0x3cc] ss:$112 sps:$4 sm:$0xff]  }
 0x18c   :  { %3282 = vmatpush1.bf16.msra.mxu0 %v9000_v26  ;;  %3325 = vmatpush1.bf16.msra.mxu1 %v9003_v27  ;;  %v9090_v26 = vld [vmem:[#allocation2 + $0x3c0] ss:$112 sps:$4 sm:$0xff]   ;;  %v9871_v27 = vsub.s32 2, %v9868_v22 }
 0x18d   :  { %3283 = vmatprep.subr.bf16.mxu0 %v9008_v28  ;;  %3326 = vmatprep.subr.bf16.mxu1 %v9011_v29  ;;  %v9093_v28 = vld [vmem:[#allocation2 + $0x3c8] ss:$112 sps:$4 sm:$0xff]   ;;  %v9873_v29 = vld [vmem:[#allocation4] sm:$0xff] }
 0x190   :  { %3284 = vmatpush1.bf16.msra.mxu0 %v9006_v30  ;;  %3327 = vmatpush1.bf16.msra.mxu1 %v9009_v31  ;;  %v9876_v30 = vsub.s32 3, %v9868_v22  ;;  %v9098_v31 = vld [vmem:[#allocation2 + $0x4a4] ss:$112 sps:$4 sm:$0xff]  }
 0x191   :  { %3285 = vmatprep.subr.bf16.mxu0 %v9014_v32  ;;  %3328 = vmatprep.subr.bf16.mxu1 %v9017_v33  ;;  %v9101_v32 = vld [vmem:[#allocation2 + $0x4ac] ss:$112 sps:$4 sm:$0xff]   ;;  %v9096_v33 = vld [vmem:[#allocation2 + $0x4a0] ss:$112 sps:$4 sm:$0xff]  }
 0x194   :  { %3286 = vmatpush1.bf16.msra.mxu0 %v9012_v34  ;;  %3329 = vmatpush1.bf16.msra.mxu1 %v9015_v35  ;;  %v634_v34 = vrot.slane %v9873_v29, %v9871_v27  ;;  %v638_v35 = vrot.slane %v9873_v29, %v9876_v30 }
 0x195   :  { %3287 = vmatprep.subr.bf16.mxu0 %v9020_v36  ;;  %3330 = vmatprep.subr.bf16.mxu1 %v9023_v37  ;;  %v9099_v36 = vld [vmem:[#allocation2 + $0x4a8] ss:$112 sps:$4 sm:$0xff]   ;;  %v9104_v37 = vld [vmem:[#allocation2 + $0x584] ss:$112 sps:$4 sm:$0xff]  }
 0x198   :  { %3288 = vmatpush1.bf16.msra.mxu0 %v9018_v38  ;;  %3331 = vmatpush1.bf16.msra.mxu1 %v9021_v39  ;;  %v9107_v38 = vld [vmem:[#allocation2 + $0x58c] ss:$112 sps:$4 sm:$0xff]  }
 0x199   :  { %3289 = vmatprep.subr.bf16.mxu0 %v9026_v40  ;;  %3332 = vmatprep.subr.bf16.mxu1 %v9029_v41  ;;  %v9102_v41 = vld [vmem:[#allocation2 + $0x580] ss:$112 sps:$4 sm:$0xff]  }
 0x19c   :  { %3290 = vmatpush1.bf16.msra.mxu0 %v9024_v42  ;;  %3333 = vmatpush1.bf16.msra.mxu1 %v9027_v43  ;;  %v9105_v42 = vld [vmem:[#allocation2 + $0x588] ss:$112 sps:$4 sm:$0xff]  }
 0x19d   :  { %3291 = vmatprep.subr.bf16.mxu0 %v9032_v44  ;;  %3334 = vmatprep.subr.bf16.mxu1 %v9035_v45 }
 0x1a0   :  { %3292 = vmatpush1.bf16.msra.mxu0 %v9030_v46  ;;  %3335 = vmatpush1.bf16.msra.mxu1 %v9033_v47 }
 0x1a1   :  { %3293 = vmatprep.subr.bf16.mxu0 %v9038_v49  ;;  %3336 = vmatprep.subr.bf16.mxu1 %v9041_v50 }
 0x1a4   :  { %3294 = vmatpush1.bf16.msra.mxu0 %v9036_v51  ;;  %3337 = vmatpush1.bf16.msra.mxu1 %v9039_v52 }
 0x1a5   :  { %3295 = vmatprep.subr.bf16.mxu0 %v9044_v53  ;;  %3338 = vmatprep.subr.bf16.mxu1 %v9047_v54  ;;  %v9110_v53 = vld [vmem:[#allocation2 + $0x664] ss:$112 sps:$4 sm:$0xff]   ;;  %v9113_v54 = vld [vmem:[#allocation2 + $0x66c] ss:$112 sps:$4 sm:$0xff]  }
 0x1a8   :  { %3296 = vmatpush1.bf16.msra.mxu0 %v9042_v55  ;;  %3339 = vmatpush1.bf16.msra.mxu1 %v9045_v56  ;;  %v9108_v56 = vld [vmem:[#allocation2 + $0x660] ss:$112 sps:$4 sm:$0xff]  }
 0x1a9   :  { %3297 = vmatprep.subr.bf16.mxu0 %v9050_v57  ;;  %3340 = vmatprep.subr.bf16.mxu1 %v9053_v58  ;;  %v9111_v57 = vld [vmem:[#allocation2 + $0x668] ss:$112 sps:$4 sm:$0xff]   ;;  %v9116_v58 = vld [vmem:[#allocation2 + $0x744] ss:$112 sps:$4 sm:$0xff]  }
 0x1ac   :  { %3298 = vmatpush1.bf16.msra.mxu0 %v9048_v59  ;;  %3341 = vmatpush1.bf16.msra.mxu1 %v9051_v60  ;;  %v9119_v59 = vld [vmem:[#allocation2 + $0x74c] ss:$112 sps:$4 sm:$0xff]   ;;  %v9114_v60 = vld [vmem:[#allocation2 + $0x740] ss:$112 sps:$4 sm:$0xff]  }
 0x1ad   :  { %3299 = vmatprep.subr.bf16.mxu0 %v9056_v61  ;;  %3342 = vmatprep.subr.bf16.mxu1 %v9059_v62  ;;  %v9117_v61 = vld [vmem:[#allocation2 + $0x748] ss:$112 sps:$4 sm:$0xff]   ;;  %v9122_v62 = vld [vmem:[#allocation2 + $0x824] ss:$112 sps:$4 sm:$0xff]  }
 0x1b0   :  { %3300 = vmatpush1.bf16.msra.mxu0 %v9054_v63  ;;  %3343 = vmatpush1.bf16.msra.mxu1 %v9057_v0  ;;  %v9125_v63 = vld [vmem:[#allocation2 + $0x82c] ss:$112 sps:$4 sm:$0xff]   ;;  %v9120_v0 = vld [vmem:[#allocation2 + $0x820] ss:$112 sps:$4 sm:$0xff]  }
 0x1b1   :  { %3301 = vmatprep.subr.bf16.mxu0 %v9062_v1  ;;  %3344 = vmatprep.subr.bf16.mxu1 %v9065_v2  ;;  %v9123_v1 = vld [vmem:[#allocation2 + $0x828] ss:$112 sps:$4 sm:$0xff]   ;;  %v9128_v2 = vld [vmem:[#allocation2 + $0x904] ss:$112 sps:$4 sm:$0xff]  }
 0x1b4   :  { %3302 = vmatpush1.bf16.msra.mxu0 %v9060_v4  ;;  %3345 = vmatpush1.bf16.msra.mxu1 %v9063_v5  ;;  %v9131_v4 = vld [vmem:[#allocation2 + $0x90c] ss:$112 sps:$4 sm:$0xff]   ;;  %v9126_v5 = vld [vmem:[#allocation2 + $0x900] ss:$112 sps:$4 sm:$0xff]  }
 0x1b5   :  { %3357 = vmatprep.subr.bf16.mxu0 %v9068_v6  ;;  %3400 = vmatprep.subr.bf16.mxu1 %v9071_v7  ;;  %v9129_v6 = vld [vmem:[#allocation2 + $0x908] ss:$112 sps:$4 sm:$0xff]   ;;  %v9134_v7 = vld [vmem:[#allocation2 + $0x9e4] ss:$112 sps:$4 sm:$0xff]  }
 0x1b7   :  { %3304 = vmatmul.mubr.bf16.vlgmr.msra.gmra.mrb[12].mxu0 %v9862_v12  ;;  %3347 = vmatmul.mubr.bf16.vlgmr.msra.gmra.mrb[12].mxu1 %v9862_v12 }
 0x1b8   :  { %3358 = vmatpush1.bf16.msra.mxu0 %v9066_v8  ;;  %3401 = vmatpush1.bf16.msra.mxu1 %v9069_v9  ;;  %v9137_v8 = vld [vmem:[#allocation2 + $0x9ec] ss:$112 sps:$4 sm:$0xff]   ;;  %v9132_v9 = vld [vmem:[#allocation2 + $0x9e0] ss:$112 sps:$4 sm:$0xff]  }
 0x1b9   :  { %3359 = vmatprep.subr.bf16.mxu0 %v9074_v10  ;;  %3402 = vmatprep.subr.bf16.mxu1 %v9077_v11  ;;  %v9135_v10 = vld [vmem:[#allocation2 + $0x9e8] ss:$112 sps:$4 sm:$0xff]   ;;  %v9140_v11 = vld [vmem:[#allocation2 + $0xac4] ss:$112 sps:$4 sm:$0xff]  }
 0x1ba   :  { %3389 = vmatprep.mubr.bf16.mxu0 %v9855_v15  ;;  %3432 = vmatprep.mubr.bf16.mxu1 %v9855_v15 }
 0x1bc   :  { %3360 = vmatpush1.bf16.msra.mxu0 %v9072_v13  ;;  %3403 = vmatpush1.bf16.msra.mxu1 %v9075_v14  ;;  %v9143_v13 = vld [vmem:[#allocation2 + $0xacc] ss:$112 sps:$4 sm:$0xff]   ;;  %v9138_v14 = vld [vmem:[#allocation2 + $0xac0] ss:$112 sps:$4 sm:$0xff]  }
 0x1bd   :  { %3361 = vmatprep.subr.bf16.mxu0 %v9080_v16  ;;  %3404 = vmatprep.subr.bf16.mxu1 %v9083_v3  ;;  %v9141_v16 = vld [vmem:[#allocation2 + $0xac8] ss:$112 sps:$4 sm:$0xff]   ;;  %v9146_v3 = vld [vmem:[#allocation2 + $0xba4] ss:$112 sps:$4 sm:$0xff]  }
 0x1c0   :  { %3362 = vmatpush1.bf16.msra.mxu0 %v9078_v18  ;;  %3405 = vmatpush1.bf16.msra.mxu1 %v9081_v19  ;;  %v9144_v18 = vld [vmem:[#allocation2 + $0xba0] ss:$112 sps:$4 sm:$0xff]   ;;  %v9147_v19 = vld [vmem:[#allocation2 + $0xba8] ss:$112 sps:$4 sm:$0xff]  }
 0x1c1   :  { %3363 = vmatprep.subr.bf16.mxu0 %v9086_v20  ;;  %3406 = vmatprep.subr.bf16.mxu1 %v9089_v21  ;;  %v9152_v20 = vld [vmem:[#allocation2 + $0xc84] ss:$112 sps:$4 sm:$0xff]   ;;  %v9155_v21 = vld [vmem:[#allocation2 + $0xc8c] ss:$112 sps:$4 sm:$0xff]  }
 0x1c4   :  { %3364 = vmatpush1.bf16.msra.mxu0 %v9084_v23  ;;  %3407 = vmatpush1.bf16.msra.mxu1 %v9087_v48  ;;  %v9150_v23 = vld [vmem:[#allocation2 + $0xc80] ss:$112 sps:$4 sm:$0xff]   ;;  %v9153_v48 = vld [vmem:[#allocation2 + $0xc88] ss:$112 sps:$4 sm:$0xff]  }
 0x1c5   :  { %3365 = vmatprep.subr.bf16.mxu0 %v9092_v24  ;;  %3408 = vmatprep.subr.bf16.mxu1 %v9095_v25  ;;  %v9158_v24 = vld [vmem:[#allocation2 + $0xd64] ss:$112 sps:$4 sm:$0xff]   ;;  %v9161_v25 = vld [vmem:[#allocation2 + $0xd6c] ss:$112 sps:$4 sm:$0xff]  }
 0x1c8   :  { %3366 = vmatpush1.bf16.msra.mxu0 %v9090_v26  ;;  %3409 = vmatpush1.bf16.msra.mxu1 %v9093_v28  ;;  %v9156_v26 = vld [vmem:[#allocation2 + $0xd60] ss:$112 sps:$4 sm:$0xff]   ;;  %v9159_v28 = vld [vmem:[#allocation2 + $0xd68] ss:$112 sps:$4 sm:$0xff]  }
 0x1c9   :  { %3367 = vmatprep.subr.bf16.mxu0 %v9098_v31  ;;  %3410 = vmatprep.subr.bf16.mxu1 %v9101_v32  ;;  %v9164_v31 = vld [vmem:[#allocation2 + $0x54] ss:$112 sps:$4 sm:$0xff]   ;;  %v9167_v32 = vld [vmem:[#allocation2 + $0x5c] ss:$112 sps:$4 sm:$0xff]  }
 0x1ca   :  { %v9882_v39 = vpop.f32.mrb[0].mxu0  ;;  %v3090_v40 = vpop.f32.mrb[0].mxu1 }
 0x1cb   :  { %v9884_v43 = vadd.f32 %v3090_v40, %v634_v34  ;;  %v9886_v44 = vpop.f32.mrb[1].mxu0  ;;  %v3092_v45 = vpop.f32.mrb[1].mxu1  ;;  %v9176_v40 = vld [vmem:[#allocation2 + $0x214] ss:$112 sps:$4 sm:$0xff]  }
 0x1cc   :  { %v9888_v46 = vadd.f32 %v3092_v45, %v638_v35  ;;  %v9890_v47 = vpop.f32.mrb[2].mxu0  ;;  %v3094_v49 = vpop.f32.mrb[2].mxu1  ;;  %3368 = vmatpush1.bf16.msra.mxu0 %v9096_v33  ;;  %3411 = vmatpush1.bf16.msra.mxu1 %v9099_v36  ;;  %v9162_v33 = vld [vmem:[#allocation2 + $0x50] ss:$112 sps:$4 sm:$0xff]   ;;  %v9173_v36 = vld [vmem:[#allocation2 + $0x13c] ss:$112 sps:$4 sm:$0xff]  }
 0x1cd   :  { %v9892_v50 = vadd.f32 %v3094_v49, %v634_v34  ;;  %v9894_v51 = vpop.f32.mrb[3].mxu0  ;;  %v3096_v52 = vpop.f32.mrb[3].mxu1  ;;  %3369 = vmatprep.subr.bf16.mxu0 %v9104_v37  ;;  %3412 = vmatprep.subr.bf16.mxu1 %v9107_v38  ;;  %v9165_v34 = vld [vmem:[#allocation2 + $0x58] ss:$112 sps:$4 sm:$0xff]   ;;  %v9168_v37 = vld [vmem:[#allocation2 + $0x130] ss:$112 sps:$4 sm:$0xff]  }
 0x1ce   :  { %v9896_v55 = vadd.f32 %v3096_v52, %v638_v35  ;;  %v9170_v35 = vld [vmem:[#allocation2 + $0x134] ss:$112 sps:$4 sm:$0xff]   ;;  %v9171_v38 = vld [vmem:[#allocation2 + $0x138] ss:$112 sps:$4 sm:$0xff]   ;;  %v9185_v52 = vld [vmem:[#allocation2 + $0x2fc] ss:$112 sps:$4 sm:$0xff]  }
 0x1cf   :  { %v9177_v45 = vld [vmem:[#allocation2 + $0x218] ss:$112 sps:$4 sm:$0xff]   ;;  %v9182_v49 = vld [vmem:[#allocation2 + $0x2f4] ss:$112 sps:$4 sm:$0xff]  }
 0x1d0   :  { %3370 = vmatpush1.bf16.msra.mxu0 %v9102_v41  ;;  %3413 = vmatpush1.bf16.msra.mxu1 %v9105_v42  ;;  %v9179_v41 = vld [vmem:[#allocation2 + $0x21c] ss:$112 sps:$4 sm:$0xff]   ;;  %v9174_v42 = vld [vmem:[#allocation2 + $0x210] ss:$112 sps:$4 sm:$0xff]  }
 0x1d1   :  { %3371 = vmatprep.subr.bf16.mxu0 %v9110_v53  ;;  %3414 = vmatprep.subr.bf16.mxu1 %v9113_v54  ;;  %v9180_v53 = vld [vmem:[#allocation2 + $0x2f0] ss:$112 sps:$4 sm:$0xff]   ;;  %v9183_v54 = vld [vmem:[#allocation2 + $0x2f8] ss:$112 sps:$4 sm:$0xff]  }
 0x1d4   :  { %3372 = vmatpush1.bf16.msra.mxu0 %v9108_v56  ;;  %3415 = vmatpush1.bf16.msra.mxu1 %v9111_v57  ;;  %v9188_v56 = vld [vmem:[#allocation2 + $0x3d4] ss:$112 sps:$4 sm:$0xff]   ;;  %v9191_v57 = vld [vmem:[#allocation2 + $0x3dc] ss:$112 sps:$4 sm:$0xff]  }
 0x1d5   :  { %3373 = vmatprep.subr.bf16.mxu0 %v9116_v58  ;;  %3416 = vmatprep.subr.bf16.mxu1 %v9119_v59  ;;  %v9903_v58 = vsub.s32 0, %v9868_v22  ;;  %v9909_v59 = vsub.s32 6, %v9868_v22 }
 0x1d7   :  { %10300 = vst [vmem:[#allocation24_spill] sm:$0xff] %v9909_v59 }
 0x1d8   :  { %3374 = vmatpush1.bf16.msra.mxu0 %v9114_v60  ;;  %3417 = vmatpush1.bf16.msra.mxu1 %v9117_v61  ;;  %v9186_v60 = vld [vmem:[#allocation2 + $0x3d0] ss:$112 sps:$4 sm:$0xff]   ;;  %v9189_v61 = vld [vmem:[#allocation2 + $0x3d8] ss:$112 sps:$4 sm:$0xff]  }
 0x1d9   :  { %3375 = vmatprep.subr.bf16.mxu0 %v9122_v62  ;;  %3418 = vmatprep.subr.bf16.mxu1 %v9125_v63  ;;  %v9912_v62 = vsub.s32 5, %v9868_v22  ;;  %v9915_v63 = vsub.s32 7, %v9868_v22 }
 0x1db   :  { %10301 = vst [vmem:[#allocation25_spill] sm:$0xff] %v9912_v62  ;;  %10302 = vst [vmem:[#allocation26_spill] sm:$0xff] %v9915_v63 }
 0x1dc   :  { %3376 = vmatpush1.bf16.msra.mxu0 %v9120_v0  ;;  %3419 = vmatpush1.bf16.msra.mxu1 %v9123_v1  ;;  %v9194_v0 = vld [vmem:[#allocation2 + $0x4b4] ss:$112 sps:$4 sm:$0xff]   ;;  %v9197_v1 = vld [vmem:[#allocation2 + $0x4bc] ss:$112 sps:$4 sm:$0xff]  }
 0x1dd   :  { %3377 = vmatprep.subr.bf16.mxu0 %v9128_v2  ;;  %3420 = vmatprep.subr.bf16.mxu1 %v9131_v4  ;;  %v626_v2 = vrot.slane %v9873_v29, %v9903_v58 }
 0x1e0   :  { %3378 = vmatpush1.bf16.msra.mxu0 %v9126_v5  ;;  %3421 = vmatpush1.bf16.msra.mxu1 %v9129_v6  ;;  %v650_v5 = vrot.slane %v9873_v29, %v9909_v59  ;;  %v646_v6 = vrot.slane %v9873_v29, %v9912_v62 }
 0x1e1   :  { %3379 = vmatprep.subr.bf16.mxu0 %v9134_v7  ;;  %3422 = vmatprep.subr.bf16.mxu1 %v9137_v8  ;;  %v654_v7 = vrot.slane %v9873_v29, %v9915_v63  ;;  %v9192_v8 = vld [vmem:[#allocation2 + $0x4b0] ss:$112 sps:$4 sm:$0xff]  }
 0x1e4   :  { %3380 = vmatpush1.bf16.msra.mxu0 %v9132_v9  ;;  %3423 = vmatpush1.bf16.msra.mxu1 %v9135_v10  ;;  %v9195_v9 = vld [vmem:[#allocation2 + $0x4b8] ss:$112 sps:$4 sm:$0xff]   ;;  %v9200_v10 = vld [vmem:[#allocation2 + $0x594] ss:$112 sps:$4 sm:$0xff]  }
 0x1e5   :  { %3381 = vmatprep.subr.bf16.mxu0 %v9140_v11  ;;  %3424 = vmatprep.subr.bf16.mxu1 %v9143_v13  ;;  %v9203_v11 = vld [vmem:[#allocation2 + $0x59c] ss:$112 sps:$4 sm:$0xff]   ;;  %v3048_v13 = vadd.f32 %v9882_v39, %v626_v2 }
 0x1e8   :  { %3382 = vmatpush1.bf16.msra.mxu0 %v9138_v14  ;;  %3425 = vmatpush1.bf16.msra.mxu1 %v9141_v16 }
 0x1e9   :  { %3383 = vmatprep.subr.bf16.mxu0 %v9146_v3  ;;  %3426 = vmatprep.subr.bf16.mxu1 %v9149_v17 }
 0x1ec   :  { %3384 = vmatpush1.bf16.msra.mxu0 %v9144_v18  ;;  %3427 = vmatpush1.bf16.msra.mxu1 %v9147_v19 }
 0x1ed   :  { %3385 = vmatprep.subr.bf16.mxu0 %v9152_v20  ;;  %3428 = vmatprep.subr.bf16.mxu1 %v9155_v21  ;;  %v3052_v20 = vadd.f32 %v9890_v47, %v626_v2  ;;  %v3615_v47 = vmax.f32 %v3048_v13, 0.0  ;;  %v9227_v2 = vld [vmem:[#allocation2 + $0x91c] ss:$112 sps:$4 sm:$0xff]   ;;  %v9234_v13 = vld [vmem:[#allocation2 + $0xad0] ss:$112 sps:$4 sm:$0xff]  }
 0x1f0   :  { %3386 = vmatpush1.bf16.msra.mxu0 %v9150_v23  ;;  %3429 = vmatpush1.bf16.msra.mxu1 %v9153_v48 }
 0x1f1   :  { %3387 = vmatprep.subr.bf16.mxu0 %v9158_v24  ;;  %3430 = vmatprep.subr.bf16.mxu1 %v9161_v25  ;;  %v9198_v25 = vld [vmem:[#allocation2 + $0x590] ss:$112 sps:$4 sm:$0xff]  }
 0x1f4   :  { %3388 = vmatpush1.bf16.msra.mxu0 %v9156_v26  ;;  %3431 = vmatpush1.bf16.msra.mxu1 %v9159_v28  ;;  %v9201_v26 = vld [vmem:[#allocation2 + $0x598] ss:$112 sps:$4 sm:$0xff]  }
 0x1f5   :  { %3443 = vmatprep.subr.bf16.mxu0 %v9164_v31  ;;  %3486 = vmatprep.subr.bf16.mxu1 %v9167_v32 }
 0x1f7   :  { %3390 = vmatmul.mubr.bf16.vlgmr.msra.gmra.mrb[16].mxu0 %v9862_v12  ;;  %3433 = vmatmul.mubr.bf16.vlgmr.msra.gmra.mrb[16].mxu1 %v9862_v12 }
 0x1f8   :  { %3444 = vmatpush1.bf16.msra.mxu0 %v9162_v33  ;;  %3487 = vmatpush1.bf16.msra.mxu1 %v9165_v34  ;;  %v9206_v33 = vld [vmem:[#allocation2 + $0x674] ss:$112 sps:$4 sm:$0xff]   ;;  %v9209_v34 = vld [vmem:[#allocation2 + $0x67c] ss:$112 sps:$4 sm:$0xff]  }
 0x1f9   :  { %3445 = vmatprep.subr.bf16.mxu0 %v9170_v35  ;;  %3488 = vmatprep.subr.bf16.mxu1 %v9173_v36 }
 0x1fa   :  { %3475 = vmatprep.mubr.bf16.mxu0 %v9855_v15  ;;  %3518 = vmatprep.mubr.bf16.mxu1 %v9855_v15  ;;  %v9906_v15 = vsub.s32 4, %v9868_v22 }
 0x1fc   :  { %3446 = vmatpush1.bf16.msra.mxu0 %v9168_v37  ;;  %3489 = vmatpush1.bf16.msra.mxu1 %v9171_v38  ;;  %v642_v4 = vrot.slane %v9873_v29, %v9906_v15  ;;  %v3643_v38 = vmax.f32 %v3052_v20, 0.0  ;;  %v9243_v20 = vld [vmem:[#allocation2 + $0xbb8] ss:$112 sps:$4 sm:$0xff]  }
 0x1fd   :  { %3447 = vmatprep.subr.bf16.mxu0 %v9176_v40  ;;  %3490 = vmatprep.subr.bf16.mxu1 %v9179_v41 }
 0x200   :  { %3448 = vmatpush1.bf16.msra.mxu0 %v9174_v42  ;;  %3491 = vmatpush1.bf16.msra.mxu1 %v9177_v45  ;;  %v9204_v42 = vld [vmem:[#allocation2 + $0x670] ss:$112 sps:$4 sm:$0xff]   ;;  %v9207_v45 = vld [vmem:[#allocation2 + $0x678] ss:$112 sps:$4 sm:$0xff]  }
 0x201   :  { %3449 = vmatprep.subr.bf16.mxu0 %v9182_v49  ;;  %3492 = vmatprep.subr.bf16.mxu1 %v9185_v52  ;;  %v9212_v49 = vld [vmem:[#allocation2 + $0x754] ss:$112 sps:$4 sm:$0xff]   ;;  %v9215_v52 = vld [vmem:[#allocation2 + $0x75c] ss:$112 sps:$4 sm:$0xff]  }
 0x204   :  { %3450 = vmatpush1.bf16.msra.mxu0 %v9180_v53  ;;  %3493 = vmatpush1.bf16.msra.mxu1 %v9183_v54  ;;  %v9210_v54 = vld [vmem:[#allocation2 + $0x750] ss:$112 sps:$4 sm:$0xff]  }
 0x205   :  { %3451 = vmatprep.subr.bf16.mxu0 %v9188_v56  ;;  %3494 = vmatprep.subr.bf16.mxu1 %v9191_v57  ;;  %v9213_v56 = vld [vmem:[#allocation2 + $0x758] ss:$112 sps:$4 sm:$0xff]   ;;  %v9218_v57 = vld [vmem:[#allocation2 + $0x834] ss:$112 sps:$4 sm:$0xff]  }
 0x208   :  { %3452 = vmatpush1.bf16.msra.mxu0 %v9186_v60  ;;  %3495 = vmatpush1.bf16.msra.mxu1 %v9189_v61  ;;  %v9221_v60 = vld [vmem:[#allocation2 + $0x83c] ss:$112 sps:$4 sm:$0xff]   ;;  %v9216_v61 = vld [vmem:[#allocation2 + $0x830] ss:$112 sps:$4 sm:$0xff]  }
 0x209   :  { %3453 = vmatprep.subr.bf16.mxu0 %v9194_v0  ;;  %3496 = vmatprep.subr.bf16.mxu1 %v9197_v1  ;;  %v9219_v0 = vld [vmem:[#allocation2 + $0x838] ss:$112 sps:$4 sm:$0xff]   ;;  %v9224_v1 = vld [vmem:[#allocation2 + $0x914] ss:$112 sps:$4 sm:$0xff]  }
 0x20a   :  { %v3133_v14 = vpop.f32.mrb[4].mxu0  ;;  %v3176_v16 = vpop.f32.mrb[4].mxu1 }
 0x20b   :  { %v9928_v3 = vadd.f32 %v3133_v14, %v642_v4  ;;  %v9930_v17 = vadd.f32 %v3176_v16, %v650_v5  ;;  %v3135_v18 = vpop.f32.mrb[5].mxu0  ;;  %v3178_v19 = vpop.f32.mrb[5].mxu1  ;;  %v9237_v14 = vld [vmem:[#allocation2 + $0xad8] ss:$112 sps:$4 sm:$0xff]   ;;  %v9242_v16 = vld [vmem:[#allocation2 + $0xbb4] ss:$112 sps:$4 sm:$0xff]  }
 0x20c   :  { %v9933_v21 = vadd.f32 %v3135_v18, %v646_v6  ;;  %v3179_v23 = vadd.f32 %v3178_v19, %v654_v7  ;;  %v3137_v48 = vpop.f32.mrb[6].mxu0  ;;  %v3180_v24 = vpop.f32.mrb[6].mxu1  ;;  %3454 = vmatpush1.bf16.msra.mxu0 %v9192_v8  ;;  %3497 = vmatpush1.bf16.msra.mxu1 %v9195_v9  ;;  %v9228_v8 = vld [vmem:[#allocation2 + $0x9f0] ss:$112 sps:$4 sm:$0xff]   ;;  %v9231_v9 = vld [vmem:[#allocation2 + $0x9f8] ss:$112 sps:$4 sm:$0xff]  }
 0x20d   :  { %v9935_v39 = vadd.f32 %v3137_v48, %v642_v4  ;;  %v9937_v28 = vadd.f32 %v3180_v24, %v650_v5  ;;  %v3139_v31 = vpop.f32.mrb[7].mxu0  ;;  %v3182_v32 = vpop.f32.mrb[7].mxu1  ;;  %3455 = vmatprep.subr.bf16.mxu0 %v9200_v10  ;;  %3498 = vmatprep.subr.bf16.mxu1 %v9203_v11  ;;  %v9222_v4 = vld [vmem:[#allocation2 + $0x910] ss:$112 sps:$4 sm:$0xff]   ;;  %v9225_v5 = vld [vmem:[#allocation2 + $0x918] ss:$112 sps:$4 sm:$0xff]  }
 0x20e   :  { %v3622_v35 = vmax.f32 %v3179_v23, 0.0  ;;  %v9939_v36 = vadd.f32 %v3139_v31, %v646_v6  ;;  %v3183_v37 = vadd.f32 %v3182_v32, %v654_v7  ;;  %v9230_v6 = vld [vmem:[#allocation2 + $0x9f4] ss:$112 sps:$4 sm:$0xff]   ;;  %v9233_v7 = vld [vmem:[#allocation2 + $0x9fc] ss:$112 sps:$4 sm:$0xff]  }
 0x20f   :  { %v9236_v10 = vld [vmem:[#allocation2 + $0xad4] ss:$112 sps:$4 sm:$0xff]   ;;  %v9239_v11 = vld [vmem:[#allocation2 + $0xadc] ss:$112 sps:$4 sm:$0xff]   ;;  %v9240_v19 = vld [vmem:[#allocation2 + $0xbb0] ss:$112 sps:$4 sm:$0xff]  }
 0x210   :  { %v9941_v40 = vmax.f32 %v3615_v47, %v3622_v35  ;;  %v3650_v41 = vmax.f32 %v3183_v37, 0.0  ;;  %3456 = vmatpush1.bf16.msra.mxu0 %v9198_v25  ;;  %3499 = vmatpush1.bf16.msra.mxu1 %v9201_v26  ;;  %v9245_v18 = vld [vmem:[#allocation2 + $0xbbc] ss:$112 sps:$4 sm:$0xff]   ;;  %v9248_v23 = vld [vmem:[#allocation2 + $0xc94] ss:$112 sps:$4 sm:$0xff]  }
 0x211   :  { %3457 = vmatprep.subr.bf16.mxu0 %v9206_v33  ;;  %3500 = vmatprep.subr.bf16.mxu1 %v9209_v34  ;;  %v9251_v48 = vld [vmem:[#allocation2 + $0xc9c] ss:$112 sps:$4 sm:$0xff]   ;;  %v9246_v24 = vld [vmem:[#allocation2 + $0xc90] ss:$112 sps:$4 sm:$0xff]   ;;  %v9249_v25 = vld [vmem:[#allocation2 + $0xc98] ss:$112 sps:$4 sm:$0xff]  }
 0x212   :  { %v9943_v53 = vmax.f32 %v3643_v38, %v3650_v41  ;;  %v9254_v26 = vld [vmem:[#allocation2 + $0xd74] ss:$112 sps:$4 sm:$0xff]   ;;  %v9257_v31 = vld [vmem:[#allocation2 + $0xd7c] ss:$112 sps:$4 sm:$0xff]   ;;  %v9252_v32 = vld [vmem:[#allocation2 + $0xd70] ss:$112 sps:$4 sm:$0xff]  }
 0x213   :  { %v9255_v33 = vld [vmem:[#allocation2 + $0xd78] ss:$112 sps:$4 sm:$0xff]   ;;  %v9260_v34 = vld [vmem:[#allocation2 + $0x64] ss:$112 sps:$4 sm:$0xff]   ;;  %v9263_v47 = vld [vmem:[#allocation2 + $0x6c] ss:$112 sps:$4 sm:$0xff]  }
 0x214   :  { %3458 = vmatpush1.bf16.msra.mxu0 %v9204_v42  ;;  %3501 = vmatpush1.bf16.msra.mxu1 %v9207_v45  ;;  %v9258_v35 = vld [vmem:[#allocation2 + $0x60] ss:$112 sps:$4 sm:$0xff]   ;;  %v9261_v37 = vld [vmem:[#allocation2 + $0x68] ss:$112 sps:$4 sm:$0xff]   ;;  %v9266_v38 = vld [vmem:[#allocation2 + $0x144] ss:$112 sps:$4 sm:$0xff]  }
 0x215   :  { %3459 = vmatprep.subr.bf16.mxu0 %v9212_v49  ;;  %3502 = vmatprep.subr.bf16.mxu1 %v9215_v52  ;;  %v9269_v41 = vld [vmem:[#allocation2 + $0x14c] ss:$112 sps:$4 sm:$0xff]   ;;  %v9264_v42 = vld [vmem:[#allocation2 + $0x140] ss:$112 sps:$4 sm:$0xff]   ;;  %v9267_v45 = vld [vmem:[#allocation2 + $0x148] ss:$112 sps:$4 sm:$0xff]  }
 0x216   :  { %v9272_v49 = vld [vmem:[#allocation2 + $0x224] ss:$112 sps:$4 sm:$0xff]   ;;  %v9275_v52 = vld [vmem:[#allocation2 + $0x22c] ss:$112 sps:$4 sm:$0xff]  }
 0x218   :  { %3460 = vmatpush1.bf16.msra.mxu0 %v9210_v54  ;;  %3503 = vmatpush1.bf16.msra.mxu1 %v9213_v56  ;;  %v9388_v54 = vld [vmem:[%s10285_s0 + $0x4] ss:$8 sps:$4 sm:$0xff]   ;;  %v9270_v56 = vld [vmem:[#allocation2 + $0x220] ss:$112 sps:$4 sm:$0xff]  }
 0x219   :  { %3461 = vmatprep.subr.bf16.mxu0 %v9218_v57  ;;  %3504 = vmatprep.subr.bf16.mxu1 %v9221_v60  ;;  %v9273_v57 = vld [vmem:[#allocation2 + $0x228] ss:$112 sps:$4 sm:$0xff]   ;;  %v9278_v60 = vld [vmem:[#allocation2 + $0x304] ss:$112 sps:$4 sm:$0xff]  }
 0x21c   :  { %3462 = vmatpush1.bf16.msra.mxu0 %v9216_v61  ;;  %3505 = vmatpush1.bf16.msra.mxu1 %v9219_v0  ;;  %v9281_v61 = vld [vmem:[#allocation2 + $0x30c] ss:$112 sps:$4 sm:$0xff]   ;;  %v9276_v0 = vld [vmem:[#allocation2 + $0x300] ss:$112 sps:$4 sm:$0xff]  }
 0x21d   :  { %3463 = vmatprep.subr.bf16.mxu0 %v9224_v1  ;;  %3506 = vmatprep.subr.bf16.mxu1 %v9227_v2  ;;  %v9279_v1 = vld [vmem:[#allocation2 + $0x308] ss:$112 sps:$4 sm:$0xff]  }
 0x220   :  { %3464 = vmatpush1.bf16.msra.mxu0 %v9222_v4  ;;  %3507 = vmatpush1.bf16.msra.mxu1 %v9225_v5  ;;  %v9284_v4 = vld [vmem:[#allocation2 + $0x3e4] ss:$112 sps:$4 sm:$0xff]   ;;  %v9287_v5 = vld [vmem:[#allocation2 + $0x3ec] ss:$112 sps:$4 sm:$0xff]  }
 0x221   :  { %3465 = vmatprep.subr.bf16.mxu0 %v9230_v6  ;;  %3508 = vmatprep.subr.bf16.mxu1 %v9233_v7  ;;  %v9282_v6 = vld [vmem:[#allocation2 + $0x3e0] ss:$112 sps:$4 sm:$0xff]   ;;  %v9955_v7 = vld [vmem:[#allocation4 + $0x8] sm:$0xff] }
 0x224   :  { %3466 = vmatpush1.bf16.msra.mxu0 %v9228_v8  ;;  %3509 = vmatpush1.bf16.msra.mxu1 %v9231_v9  ;;  %v9290_v9 = vld [vmem:[#allocation2 + $0x4c4] ss:$112 sps:$4 sm:$0xff]  }
 0x225   :  { %3467 = vmatprep.subr.bf16.mxu0 %v9236_v10  ;;  %3510 = vmatprep.subr.bf16.mxu1 %v9239_v11  ;;  %v9293_v10 = vld [vmem:[#allocation2 + $0x4cc] ss:$112 sps:$4 sm:$0xff]  }
 0x228   :  { %3468 = vmatpush1.bf16.msra.mxu0 %v9234_v13  ;;  %3511 = vmatpush1.bf16.msra.mxu1 %v9237_v14  ;;  %v666_v13 = vrot.slane %v9955_v7, %v9871_v27 }
 0x229   :  { %3469 = vmatprep.subr.bf16.mxu0 %v9242_v16  ;;  %3512 = vmatprep.subr.bf16.mxu1 %v9245_v18  ;;  %v9288_v16 = vld [vmem:[#allocation2 + $0x4c0] ss:$112 sps:$4 sm:$0xff]   ;;  %v9291_v18 = vld [vmem:[#allocation2 + $0x4c8] ss:$112 sps:$4 sm:$0xff]  }
 0x22c   :  { %3470 = vmatpush1.bf16.msra.mxu0 %v9240_v19  ;;  %3513 = vmatpush1.bf16.msra.mxu1 %v9243_v20  ;;  %v3617_v19 = vmax.f32 %v9884_v43, 0.0  ;;  %v9297_v43 = vld [vmem:[#allocation2 + $0x5a8] ss:$112 sps:$4 sm:$0xff]  }
 0x22d   :  { %3471 = vmatprep.subr.bf16.mxu0 %v9248_v23  ;;  %3514 = vmatprep.subr.bf16.mxu1 %v9251_v48  ;;  %v9299_v23 = vld [vmem:[#allocation2 + $0x5ac] ss:$112 sps:$4 sm:$0xff]   ;;  %v3618_v48 = vmax.f32 %v9888_v46, 0.0 }
 0x230   :  { %3472 = vmatpush1.bf16.msra.mxu0 %v9246_v24  ;;  %3515 = vmatpush1.bf16.msra.mxu1 %v9249_v25  ;;  %v3645_v24 = vmax.f32 %v9892_v50, 0.0  ;;  %v9302_v50 = vld [vmem:[#allocation2 + $0x684] ss:$112 sps:$4 sm:$0xff]  }
 0x231   :  { %3473 = vmatprep.subr.bf16.mxu0 %v9254_v26  ;;  %3516 = vmatprep.subr.bf16.mxu1 %v9257_v31  ;;  %v9294_v31 = vld [vmem:[#allocation2 + $0x5a0] ss:$112 sps:$4 sm:$0xff]  }
 0x234   :  { %3474 = vmatpush1.bf16.msra.mxu0 %v9252_v32  ;;  %3517 = vmatpush1.bf16.msra.mxu1 %v9255_v33  ;;  %v3646_v33 = vmax.f32 %v9896_v55, 0.0 }
 0x235   :  { %3529 = vmatprep.subr.bf16.mxu0 %v9260_v34  ;;  %3572 = vmatprep.subr.bf16.mxu1 %v9263_v47 }
 0x237   :  { %3476 = vmatmul.mubr.bf16.vlgmr.msra.gmra.mrb[20].mxu0 %v9862_v12  ;;  %3519 = vmatmul.mubr.bf16.vlgmr.msra.gmra.mrb[20].mxu1 %v9862_v12  ;;  %v9951_v12 = vsub.s32 1, %v9868_v22  ;;  %v9285_v22 = vld [vmem:[#allocation2 + $0x3e8] ss:$112 sps:$4 sm:$0xff]  }
 0x238   :  { %3530 = vmatpush1.bf16.msra.mxu0 %v9258_v35  ;;  %3573 = vmatpush1.bf16.msra.mxu1 %v9261_v37 }
 0x239   :  { %3531 = vmatprep.subr.bf16.mxu0 %v9266_v38  ;;  %3574 = vmatprep.subr.bf16.mxu1 %v9269_v41  ;;  %v630_v2 = vrot.slane %v9873_v29, %v9951_v12  ;;  %v658_v29 = vrot.slane %v9955_v7, %v9903_v58  ;;  %v662_v14 = vrot.slane %v9955_v7, %v9951_v12  ;;  %v3619_v38 = vmax.f32 %v9928_v3, 0.0 }
 0x23a   :  { %3561 = vmatprep.mubr.bf16.mxu0 %v9388_v54  ;;  %3604 = vmatprep.mubr.bf16.mxu1 %v9388_v54  ;;  %v3647_v41 = vmax.f32 %v9935_v39, 0.0 }
 0x23b   :  { %v3050_v8 = vadd.f32 %v9886_v44, %v630_v2  ;;  %v3054_v11 = vadd.f32 %v9894_v51, %v630_v2  ;;  %v670_v44 = vrot.slane %v9955_v7, %v9876_v30  ;;  %v9296_v51 = vld [vmem:[#allocation2 + $0x5a4] ss:$112 sps:$4 sm:$0xff]  }
 0x23c   :  { %3532 = vmatpush1.bf16.msra.mxu0 %v9264_v42  ;;  %3575 = vmatpush1.bf16.msra.mxu1 %v9267_v45 }
 0x23d   :  { %3533 = vmatprep.subr.bf16.mxu0 %v9272_v49  ;;  %3576 = vmatprep.subr.bf16.mxu1 %v9275_v52  ;;  %v3616_v20 = vmax.f32 %v3050_v8, 0.0  ;;  %v3644_v32 = vmax.f32 %v3054_v11, 0.0  ;;  %v9300_v11 = vld [vmem:[#allocation2 + $0x680] ss:$112 sps:$4 sm:$0xff]  }
 0x240   :  { %3534 = vmatpush1.bf16.msra.mxu0 %v9270_v56  ;;  %3577 = vmatpush1.bf16.msra.mxu1 %v9273_v57 }
 0x241   :  { %3535 = vmatprep.subr.bf16.mxu0 %v9278_v60  ;;  %3578 = vmatprep.subr.bf16.mxu1 %v9281_v61  ;;  %v9305_v61 = vld [vmem:[#allocation2 + $0x68c] ss:$112 sps:$4 sm:$0xff]  }
 0x244   :  { %3536 = vmatpush1.bf16.msra.mxu0 %v9276_v0  ;;  %3579 = vmatpush1.bf16.msra.mxu1 %v9279_v1 }
 0x245   :  { %3537 = vmatprep.subr.bf16.mxu0 %v9284_v4  ;;  %3580 = vmatprep.subr.bf16.mxu1 %v9287_v5 }
 0x248   :  { %3538 = vmatpush1.bf16.msra.mxu0 %v9282_v6  ;;  %3581 = vmatpush1.bf16.msra.mxu1 %v9285_v22 }
 0x249   :  { %3539 = vmatprep.subr.bf16.mxu0 %v9290_v9  ;;  %3582 = vmatprep.subr.bf16.mxu1 %v9293_v10 }
 0x24a   :  { %v3219_v25 = vpop.f32.mrb[8].mxu0  ;;  %v3262_v26 = vpop.f32.mrb[8].mxu1 }
 0x24b   :  { %v3220_v34 = vadd.f32 %v3219_v25, %v658_v29  ;;  %v3263_v47 = vadd.f32 %v3262_v26, %v666_v13  ;;  %v3221_v35 = vpop.f32.mrb[9].mxu0  ;;  %v3264_v37 = vpop.f32.mrb[9].mxu1  ;;  %v9312_v25 = vld [vmem:[#allocation2 + $0x840] ss:$112 sps:$4 sm:$0xff]   ;;  %v9315_v26 = vld [vmem:[#allocation2 + $0x848] ss:$112 sps:$4 sm:$0xff]  }
 0x24c   :  { %v3222_v42 = vadd.f32 %v3221_v35, %v662_v14  ;;  %v3265_v45 = vadd.f32 %v3264_v37, %v670_v44  ;;  %v3223_v46 = vpop.f32.mrb[10].mxu0  ;;  %v3266_v49 = vpop.f32.mrb[10].mxu1  ;;  %3540 = vmatpush1.bf16.msra.mxu0 %v9288_v16  ;;  %3583 = vmatpush1.bf16.msra.mxu1 %v9291_v18  ;;  %v9311_v16 = vld [vmem:[#allocation2 + $0x76c] ss:$112 sps:$4 sm:$0xff]   ;;  %v9324_v35 = vld [vmem:[#allocation2 + $0xa00] ss:$112 sps:$4 sm:$0xff]  }
 0x24d   :  { %v3623_v52 = vmax.f32 %v3220_v34, 0.0  ;;  %v3625_v54 = vmax.f32 %v3263_v47, 0.0  ;;  %v3224_v56 = vadd.f32 %v3223_v46, %v658_v29  ;;  %v3267_v55 = vadd.f32 %v3266_v49, %v666_v13  ;;  %v3225_v57 = vpop.f32.mrb[11].mxu0  ;;  %v3268_v60 = vpop.f32.mrb[11].mxu1  ;;  %3541 = vmatprep.subr.bf16.mxu0 %v9296_v51  ;;  %3584 = vmatprep.subr.bf16.mxu1 %v9299_v23  ;;  %v9303_v29 = vld [vmem:[#allocation2 + $0x688] ss:$112 sps:$4 sm:$0xff]  }
 0x24e   :  { %v3624_v0 = vmax.f32 %v3222_v42, 0.0  ;;  %v3626_v3 = vmax.f32 %v3265_v45, 0.0  ;;  %v3226_v1 = vadd.f32 %v3225_v57, %v662_v14  ;;  %v3269_v39 = vadd.f32 %v3268_v60, %v670_v44  ;;  %v9308_v44 = vld [vmem:[#allocation2 + $0x764] ss:$112 sps:$4 sm:$0xff]   ;;  %v9309_v51 = vld [vmem:[#allocation2 + $0x768] ss:$112 sps:$4 sm:$0xff]  }
 0x24f   :  { %v9973_v2 = vmax.f32 %v3616_v20, %v3623_v52  ;;  %v9975_v4 = vmax.f32 %v3618_v48, %v3625_v54  ;;  %v3651_v5 = vmax.f32 %v3224_v56, 0.0  ;;  %v3653_v6 = vmax.f32 %v3267_v55, 0.0  ;;  %v9306_v20 = vld [vmem:[#allocation2 + $0x760] ss:$112 sps:$4 sm:$0xff]   ;;  %v9314_v23 = vld [vmem:[#allocation2 + $0x844] ss:$112 sps:$4 sm:$0xff]  }
 0x250   :  { %v9977_v22 = vmax.f32 %v3617_v19, %v3624_v0  ;;  %v9979_v8 = vmax.f32 %v3619_v38, %v3626_v3  ;;  %v3652_v9 = vmax.f32 %v3226_v1, 0.0  ;;  %v3654_v10 = vmax.f32 %v3269_v39, 0.0  ;;  %3542 = vmatpush1.bf16.msra.mxu0 %v9294_v31  ;;  %3585 = vmatpush1.bf16.msra.mxu1 %v9297_v43  ;;  %v9317_v48 = vld [vmem:[#allocation2 + $0x84c] ss:$112 sps:$4 sm:$0xff]   ;;  %v9320_v31 = vld [vmem:[#allocation2 + $0x924] ss:$112 sps:$4 sm:$0xff]  }
 0x251   :  { %v9981_v13 = vmax.f32 %v3644_v32, %v3651_v5  ;;  %v9983_v14 = vmax.f32 %v3646_v33, %v3653_v6  ;;  %3543 = vmatprep.subr.bf16.mxu0 %v9302_v50  ;;  %3586 = vmatprep.subr.bf16.mxu1 %v9305_v61  ;;  %v9323_v32 = vld [vmem:[#allocation2 + $0x92c] ss:$112 sps:$4 sm:$0xff]   ;;  %v9321_v33 = vld [vmem:[#allocation2 + $0x928] ss:$112 sps:$4 sm:$0xff]   ;;  %v9326_v34 = vld [vmem:[#allocation2 + $0xa04] ss:$112 sps:$4 sm:$0xff]  }
 0x252   :  { %v9985_v18 = vmax.f32 %v3645_v24, %v3652_v9  ;;  %v9987_v19 = vmax.f32 %v3647_v41, %v3654_v10  ;;  %v9318_v24 = vld [vmem:[#allocation2 + $0x920] ss:$112 sps:$4 sm:$0xff]   ;;  %v9329_v47 = vld [vmem:[#allocation2 + $0xa0c] ss:$112 sps:$4 sm:$0xff]   ;;  %v9327_v37 = vld [vmem:[#allocation2 + $0xa08] ss:$112 sps:$4 sm:$0xff]  }
 0x253   :  { %v9332_v43 = vld [vmem:[#allocation2 + $0xae4] ss:$112 sps:$4 sm:$0xff]   ;;  %v9335_v38 = vld [vmem:[#allocation2 + $0xaec] ss:$112 sps:$4 sm:$0xff]   ;;  %v9330_v41 = vld [vmem:[#allocation2 + $0xae0] ss:$112 sps:$4 sm:$0xff]  }
 0x254   :  { %3544 = vmatpush1.bf16.msra.mxu0 %v9300_v11  ;;  %3587 = vmatpush1.bf16.msra.mxu1 %v9303_v29  ;;  %v9333_v42 = vld [vmem:[#allocation2 + $0xae8] ss:$112 sps:$4 sm:$0xff]   ;;  %v9338_v45 = vld [vmem:[#allocation2 + $0xbc4] ss:$112 sps:$4 sm:$0xff]   ;;  %v9341_v46 = vld [vmem:[#allocation2 + $0xbcc] ss:$112 sps:$4 sm:$0xff]  }
 0x255   :  { %3545 = vmatprep.subr.bf16.mxu0 %v9308_v44  ;;  %3588 = vmatprep.subr.bf16.mxu1 %v9311_v16  ;;  %v9336_v49 = vld [vmem:[#allocation2 + $0xbc0] ss:$112 sps:$4 sm:$0xff]   ;;  %v9339_v50 = vld [vmem:[#allocation2 + $0xbc8] ss:$112 sps:$4 sm:$0xff]   ;;  %v9344_v52 = vld [vmem:[#allocation2 + $0xca4] ss:$112 sps:$4 sm:$0xff]  }
 0x256   :  { %v9347_v54 = vld [vmem:[#allocation2 + $0xcac] ss:$112 sps:$4 sm:$0xff]   ;;  %v9342_v56 = vld [vmem:[#allocation2 + $0xca0] ss:$112 sps:$4 sm:$0xff]   ;;  %v9345_v55 = vld [vmem:[#allocation2 + $0xca8] ss:$112 sps:$4 sm:$0xff]  }
 0x257   :  { %v9350_v57 = vld [vmem:[#allocation2 + $0xd84] ss:$112 sps:$4 sm:$0xff]   ;;  %v9353_v60 = vld [vmem:[#allocation2 + $0xd8c] ss:$112 sps:$4 sm:$0xff]   ;;  %v9348_v39 = vld [vmem:[#allocation2 + $0xd80] ss:$112 sps:$4 sm:$0xff]  }
 0x258   :  { %3546 = vmatpush1.bf16.msra.mxu0 %v9306_v20  ;;  %3589 = vmatpush1.bf16.msra.mxu1 %v9309_v51  ;;  %v3720_v61 = vld [vmem:[#allocation6] sm:$0xff]  ;;  %v3721_v3 = vld [vmem:[#allocation6 + $0x8] sm:$0xff] }
 0x259   :  { %3547 = vmatprep.subr.bf16.mxu0 %v9314_v23  ;;  %3590 = vmatprep.subr.bf16.mxu1 %v9317_v48  ;;  %v3724_v0 = vld [vmem:[#allocation6 + $0x20] sm:$0xff]  ;;  %v3725_v1 = vld [vmem:[#allocation6 + $0x28] sm:$0xff] }
 0x25a   :  { %v9351_v5 = vld [vmem:[#allocation2 + $0xd88] ss:$112 sps:$4 sm:$0xff]   ;;  %v8034_v6 = vcombine.high %v3720_v61, %v3724_v0  ;;  %v8036_v9 = vcombine.high %v3721_v3, %v3725_v1  ;;  %v3728_v10 = vld [vmem:[#allocation6 + $0x40] sm:$0xff]  ;;  %v8033_v16 = vcombine.low %v3720_v61, %v3724_v0  ;;  %v8035_v20 = vcombine.low %v3721_v3, %v3725_v1 }
 0x25b   :  { %v3732_v11 = vld [vmem:[#allocation6 + $0x60] sm:$0xff]  ;;  %v3729_v29 = vld [vmem:[#allocation6 + $0x48] sm:$0xff] }
 0x25c   :  { %3548 = vmatpush1.bf16.msra.mxu0 %v9312_v25  ;;  %3591 = vmatpush1.bf16.msra.mxu1 %v9315_v26  ;;  %v3733_v44 = vld [vmem:[#allocation6 + $0x68] sm:$0xff]  ;;  %v8042_v51 = vcombine.high %v3728_v10, %v3732_v11  ;;  %v3736_v48 = vld [vmem:[#allocation6 + $0x80] sm:$0xff] }
 0x25d   :  { %3549 = vmatprep.subr.bf16.mxu0 %v9320_v31  ;;  %3592 = vmatprep.subr.bf16.mxu1 %v9323_v32  ;;  %v8044_v23 = vcombine.high %v3729_v29, %v3733_v44  ;;  %v3740_v25 = vld [vmem:[#allocation6 + $0xa0] sm:$0xff]  ;;  %v3737_v26 = vld [vmem:[#allocation6 + $0x88] sm:$0xff] }
 0x25e   :  { %v3741_v31 = vld [vmem:[#allocation6 + $0xa8] sm:$0xff]  ;;  %v3760_v61 = vld [vmem:[#allocation6 + $0x140] sm:$0xff] }
 0x25f   :  { %v9389_v32 = vld [vmem:[%s10285_s0] ss:$8 sps:$4 sm:$0xff]  }
 0x260   :  { %3550 = vmatpush1.bf16.msra.mxu0 %v9318_v24  ;;  %3593 = vmatpush1.bf16.msra.mxu1 %v9321_v33  ;;  %v8041_v24 = vcombine.low %v3728_v10, %v3732_v11  ;;  %v8043_v33 = vcombine.low %v3729_v29, %v3733_v44  ;;  %v3764_v0 = vld [vmem:[#allocation6 + $0x160] sm:$0xff]  ;;  %v3761_v3 = vld [vmem:[#allocation6 + $0x148] sm:$0xff] }
 0x261   :  { %3551 = vmatprep.subr.bf16.mxu0 %v9326_v34  ;;  %3594 = vmatprep.subr.bf16.mxu1 %v9329_v47  ;;  %v8050_v34 = vcombine.high %v3736_v48, %v3740_v25  ;;  %v8052_v47 = vcombine.high %v3737_v26, %v3741_v31  ;;  %v3765_v1 = vld [vmem:[#allocation6 + $0x168] sm:$0xff]  ;;  %v3768_v10 = vld [vmem:[#allocation6 + $0x180] sm:$0xff] }
 0x262   :  { %v3772_v11 = vld [vmem:[#allocation6 + $0x1a0] sm:$0xff]  ;;  %v3769_v29 = vld [vmem:[#allocation6 + $0x188] sm:$0xff] }
 0x263   :  { %v3773_v44 = vld [vmem:[#allocation6 + $0x1a8] sm:$0xff] }
 0x264   :  { %3552 = vmatpush1.bf16.msra.mxu0 %v9324_v35  ;;  %3595 = vmatpush1.bf16.msra.mxu1 %v9327_v37  ;;  %v3744_v35 = vld [vmem:[#allocation6 + $0xc0] sm:$0xff] }
 0x265   :  { %3553 = vmatprep.subr.bf16.mxu0 %v9332_v43  ;;  %3596 = vmatprep.subr.bf16.mxu1 %v9335_v38  ;;  %v3748_v37 = vld [vmem:[#allocation6 + $0xe0] sm:$0xff]  ;;  %v3745_v43 = vld [vmem:[#allocation6 + $0xc8] sm:$0xff] }
 0x266   :  { %v3749_v38 = vld [vmem:[#allocation6 + $0xe8] sm:$0xff] }
 0x268   :  { %3554 = vmatpush1.bf16.msra.mxu0 %v9330_v41  ;;  %3597 = vmatpush1.bf16.msra.mxu1 %v9333_v42  ;;  %v8049_v41 = vcombine.low %v3736_v48, %v3740_v25  ;;  %v8051_v42 = vcombine.low %v3737_v26, %v3741_v31  ;;  %v8082_v48 = vcombine.high %v3768_v10, %v3772_v11  ;;  %v3776_v26 = vld [vmem:[#allocation6 + $0x1c0] sm:$0xff] }
 0x269   :  { %3555 = vmatprep.subr.bf16.mxu0 %v9338_v45  ;;  %3598 = vmatprep.subr.bf16.mxu1 %v9341_v46  ;;  %v8058_v45 = vcombine.high %v3744_v35, %v3748_v37  ;;  %v8060_v46 = vcombine.high %v3745_v43, %v3749_v38  ;;  %v8084_v25 = vcombine.high %v3769_v29, %v3773_v44 }
 0x26c   :  { %3556 = vmatpush1.bf16.msra.mxu0 %v9336_v49  ;;  %3599 = vmatpush1.bf16.msra.mxu1 %v9339_v50  ;;  %v3752_v49 = vld [vmem:[#allocation6 + $0x100] sm:$0xff] }
 0x26d   :  { %3557 = vmatprep.subr.bf16.mxu0 %v9344_v52  ;;  %3600 = vmatprep.subr.bf16.mxu1 %v9347_v54  ;;  %v3756_v50 = vld [vmem:[#allocation6 + $0x120] sm:$0xff]  ;;  %v3753_v52 = vld [vmem:[#allocation6 + $0x108] sm:$0xff] }
 0x26e   :  { %v3757_v54 = vld [vmem:[#allocation6 + $0x128] sm:$0xff] }
 0x270   :  { %3558 = vmatpush1.bf16.msra.mxu0 %v9342_v56  ;;  %3601 = vmatpush1.bf16.msra.mxu1 %v9345_v55  ;;  %v8057_v56 = vcombine.low %v3744_v35, %v3748_v37  ;;  %v8059_v55 = vcombine.low %v3745_v43, %v3749_v38  ;;  %v3620_v43 = vmax.f32 %v9933_v21, 0.0  ;;  %v3621_v21 = vmax.f32 %v9930_v17, 0.0 }
 0x271   :  { %3559 = vmatprep.subr.bf16.mxu0 %v9350_v57  ;;  %3602 = vmatprep.subr.bf16.mxu1 %v9353_v60  ;;  %v8066_v57 = vcombine.high %v3752_v49, %v3756_v50  ;;  %v8068_v60 = vcombine.high %v3753_v52, %v3757_v54 }
 0x274   :  { %3560 = vmatpush1.bf16.msra.mxu0 %v9348_v39  ;;  %3603 = vmatpush1.bf16.msra.mxu1 %v9351_v5  ;;  %v8065_v39 = vcombine.low %v3752_v49, %v3756_v50  ;;  %v8067_v5 = vcombine.low %v3753_v52, %v3757_v54 }
 0x275   :  { %6450 = vmatprep.subr.bf16.mxu0 %v8034_v6  ;;  %6622 = vmatprep.subr.bf16.mxu1 %v8036_v9  ;;  %v8074_v6 = vcombine.high %v3760_v61, %v3764_v0  ;;  %v8076_v9 = vcombine.high %v3761_v3, %v3765_v1 }
 0x277   :  { %3562 = vmatmul.mubr.bf16.vlgmr.msra.gmra.mrb[24].mxu0 %v9389_v32  ;;  %3605 = vmatmul.mubr.bf16.vlgmr.msra.gmra.mrb[24].mxu1 %v9389_v32 }
 0x278   :  { %6451 = vmatpush1.bf16.msra.mxu0 %v8033_v16  ;;  %6623 = vmatpush1.bf16.msra.mxu1 %v8035_v20  ;;  %v674_v16 = vrot.slane %v9955_v7, %v9906_v15  ;;  %v678_v20 = vrot.slane %v9955_v7, %v9912_v62 }
 0x279   :  { %6452 = vmatprep.subr.bf16.mxu0 %v8042_v51  ;;  %6624 = vmatprep.subr.bf16.mxu1 %v8044_v23  ;;  %v8073_v51 = vcombine.low %v3760_v61, %v3764_v0  ;;  %v8075_v23 = vcombine.low %v3761_v3, %v3765_v1  ;;  %v3788_v0 = vld [vmem:[#allocation6 + $0x220] sm:$0xff]  ;;  %v3785_v3 = vld [vmem:[#allocation6 + $0x208] sm:$0xff] }
 0x27a   :  { %v3789_v1 = vld [vmem:[#allocation6 + $0x228] sm:$0xff] }
 0x27c   :  { %6453 = vmatpush1.bf16.msra.mxu0 %v8041_v24  ;;  %6625 = vmatpush1.bf16.msra.mxu1 %v8043_v33  ;;  %v3780_v24 = vld [vmem:[#allocation6 + $0x1e0] sm:$0xff]  ;;  %v3777_v33 = vld [vmem:[#allocation6 + $0x1c8] sm:$0xff] }
 0x27d   :  { %6454 = vmatprep.subr.bf16.mxu0 %v8050_v34  ;;  %6626 = vmatprep.subr.bf16.mxu1 %v8052_v47  ;;  %v3781_v34 = vld [vmem:[#allocation6 + $0x1e8] sm:$0xff] }
 0x280   :  { %6455 = vmatpush1.bf16.msra.mxu0 %v8049_v41  ;;  %6627 = vmatpush1.bf16.msra.mxu1 %v8051_v42 }
 0x281   :  { %6456 = vmatprep.subr.bf16.mxu0 %v8058_v45  ;;  %6628 = vmatprep.subr.bf16.mxu1 %v8060_v46  ;;  %v8081_v45 = vcombine.low %v3768_v10, %v3772_v11  ;;  %v8083_v46 = vcombine.low %v3769_v29, %v3773_v44  ;;  %v8089_v29 = vcombine.low %v3776_v26, %v3780_v24 }
 0x282   :  { %v8091_v44 = vcombine.low %v3777_v33, %v3781_v34 }
 0x284   :  { %6457 = vmatpush1.bf16.msra.mxu0 %v8057_v56  ;;  %6629 = vmatpush1.bf16.msra.mxu1 %v8059_v55  ;;  %v8090_v56 = vcombine.high %v3776_v26, %v3780_v24  ;;  %v8092_v55 = vcombine.high %v3777_v33, %v3781_v34  ;;  %v10018_v26 = vld [vmem:[#allocation6 + $0x420] sm:$0xff]  ;;  %v10020_v24 = vld [vmem:[#allocation6 + $0x408] sm:$0xff] }
 0x285   :  { %6458 = vmatprep.subr.bf16.mxu0 %v8066_v57  ;;  %6630 = vmatprep.subr.bf16.mxu1 %v8068_v60  ;;  %v3784_v57 = vld [vmem:[#allocation6 + $0x200] sm:$0xff] }
 0x288   :  { %6459 = vmatpush1.bf16.msra.mxu0 %v8065_v39  ;;  %6631 = vmatpush1.bf16.msra.mxu1 %v8067_v5  ;;  %v3649_v39 = vmax.f32 %v9937_v28, 0.0  ;;  %v3648_v5 = vmax.f32 %v9939_v36, 0.0  ;;  %v3796_v36 = vld [vmem:[#allocation6 + $0x260] sm:$0xff] }
 0x289   :  { %6460 = vmatprep.subr.bf16.mxu0 %v8074_v6  ;;  %6632 = vmatprep.subr.bf16.mxu1 %v8076_v9 }
 0x28a   :  { %v3305_v31 = vpop.f32.mrb[12].mxu0  ;;  %v9996_v32 = vpop.f32.mrb[12].mxu1 }
 0x28b   :  { %v3306_v47 = vadd.f32 %v3305_v31, %v674_v16  ;;  %v3307_v35 = vpop.f32.mrb[13].mxu0  ;;  %v9998_v37 = vpop.f32.mrb[13].mxu1  ;;  %v8099_v31 = vcombine.low %v3785_v3, %v3789_v1 }
 0x28c   :  { %v3308_v38 = vadd.f32 %v3307_v35, %v678_v20  ;;  %v3309_v41 = vpop.f32.mrb[14].mxu0  ;;  %v10001_v42 = vpop.f32.mrb[14].mxu1  ;;  %6461 = vmatpush1.bf16.msra.mxu0 %v8073_v51  ;;  %6633 = vmatpush1.bf16.msra.mxu1 %v8075_v23  ;;  %v3792_v51 = vld [vmem:[#allocation6 + $0x240] sm:$0xff]  ;;  %v3793_v23 = vld [vmem:[#allocation6 + $0x248] sm:$0xff] }
 0x28d   :  { %v3627_v49 = vmax.f32 %v3306_v47, 0.0  ;;  %v3310_v50 = vadd.f32 %v3309_v41, %v674_v16  ;;  %v3311_v52 = vpop.f32.mrb[15].mxu0  ;;  %v10003_v54 = vpop.f32.mrb[15].mxu1  ;;  %6462 = vmatprep.subr.bf16.mxu0 %v8082_v48  ;;  %6634 = vmatprep.subr.bf16.mxu1 %v8084_v25  ;;  %v8098_v16 = vcombine.high %v3784_v57, %v3788_v0  ;;  %v3797_v48 = vld [vmem:[#allocation6 + $0x268] sm:$0xff]  ;;  %v8097_v25 = vcombine.low %v3784_v57, %v3788_v0  ;;  %v10016_v47 = vld [vmem:[#allocation6 + $0x400] sm:$0xff] }
 0x28e   :  { %v3628_v60 = vmax.f32 %v3308_v38, 0.0  ;;  %v3312_v61 = vadd.f32 %v3311_v52, %v678_v20  ;;  %v8100_v20 = vcombine.high %v3785_v3, %v3789_v1  ;;  %v8106_v33 = vcombine.high %v3792_v51, %v3796_v36  ;;  %v3800_v35 = vld [vmem:[#allocation6 + $0x280] sm:$0xff]  ;;  %v3801_v41 = vld [vmem:[#allocation6 + $0x288] sm:$0xff] }
 0x28f   :  { %v10008_v6 = vmax.f32 %v3620_v43, %v3627_v49  ;;  %v3655_v9 = vmax.f32 %v3310_v50, 0.0  ;;  %v8108_v34 = vcombine.high %v3793_v23, %v3797_v48  ;;  %v10022_v43 = vld [vmem:[#allocation6 + $0x428] sm:$0xff]  ;;  %v3804_v38 = vld [vmem:[#allocation6 + $0x2a0] sm:$0xff]  ;;  %v8105_v50 = vcombine.low %v3792_v51, %v3796_v36 }
 0x290   :  { %v10010_v10 = vmax.f32 %v3621_v21, %v3628_v60  ;;  %v3656_v11 = vmax.f32 %v3312_v61, 0.0  ;;  %6463 = vmatpush1.bf16.msra.mxu0 %v8081_v45  ;;  %6635 = vmatpush1.bf16.msra.mxu1 %v8083_v46  ;;  %v3805_v45 = vld [vmem:[#allocation6 + $0x2a8] sm:$0xff]  ;;  %v8107_v52 = vcombine.low %v3793_v23, %v3797_v48  ;;  %v3808_v57 = vld [vmem:[#allocation6 + $0x2c0] sm:$0xff]  ;;  %v8113_v0 = vcombine.low %v3800_v35, %v3804_v38 }
 0x291   :  { %v10012_v17 = vmax.f32 %v3648_v5, %v3655_v9  ;;  %6464 = vmatprep.subr.bf16.mxu0 %v8090_v56  ;;  %6636 = vmatprep.subr.bf16.mxu1 %v8092_v55  ;;  %v8114_v56 = vcombine.high %v3800_v35, %v3804_v38  ;;  %v8116_v55 = vcombine.high %v3801_v41, %v3805_v45  ;;  %v3812_v21 = vld [vmem:[#allocation6 + $0x2e0] sm:$0xff]  ;;  %v3809_v60 = vld [vmem:[#allocation6 + $0x2c8] sm:$0xff] }
 0x292   :  { %v10014_v28 = vmax.f32 %v3649_v39, %v3656_v11  ;;  %v3813_v61 = vld [vmem:[#allocation6 + $0x2e8] sm:$0xff]  ;;  %v8115_v3 = vcombine.low %v3801_v41, %v3805_v45  ;;  %v8122_v1 = vcombine.high %v3808_v57, %v3812_v21  ;;  %v3816_v5 = vld [vmem:[#allocation6 + $0x300] sm:$0xff] }
 0x293   :  { %v8124_v39 = vcombine.high %v3809_v60, %v3813_v61  ;;  %v3820_v9 = vld [vmem:[#allocation6 + $0x320] sm:$0xff]  ;;  %v3817_v11 = vld [vmem:[#allocation6 + $0x308] sm:$0xff] }
 0x294   :  { %6465 = vmatpush1.bf16.msra.mxu0 %v8089_v29  ;;  %6637 = vmatpush1.bf16.msra.mxu1 %v8091_v44  ;;  %v3821_v29 = vld [vmem:[#allocation6 + $0x328] sm:$0xff]  ;;  %v8121_v44 = vcombine.low %v3808_v57, %v3812_v21  ;;  %v3824_v36 = vld [vmem:[#allocation6 + $0x340] sm:$0xff] }
 0x295   :  { %6466 = vmatprep.subr.bf16.mxu0 %v8098_v16  ;;  %6638 = vmatprep.subr.bf16.mxu1 %v8100_v20  ;;  %v8123_v16 = vcombine.low %v3809_v60, %v3813_v61  ;;  %v8130_v20 = vcombine.high %v3816_v5, %v3820_v9  ;;  %v8132_v51 = vcombine.high %v3817_v11, %v3821_v29  ;;  %v3828_v23 = vld [vmem:[#allocation6 + $0x360] sm:$0xff]  ;;  %v3825_v48 = vld [vmem:[#allocation6 + $0x348] sm:$0xff] }
 0x296   :  { %v3832_v38 = vld [vmem:[#allocation6 + $0x380] sm:$0xff]  ;;  %v3833_v45 = vld [vmem:[#allocation6 + $0x388] sm:$0xff] }
 0x297   :  { %v3836_v41 = vld [vmem:[#allocation6 + $0x3a0] sm:$0xff]  ;;  %v3841_v61 = vld [vmem:[#allocation6 + $0x3c8] sm:$0xff] }
 0x298   :  { %6467 = vmatpush1.bf16.msra.mxu0 %v8097_v25  ;;  %6639 = vmatpush1.bf16.msra.mxu1 %v8099_v31  ;;  %v3829_v25 = vld [vmem:[#allocation6 + $0x368] sm:$0xff]  ;;  %v8129_v31 = vcombine.low %v3816_v5, %v3820_v9  ;;  %v3840_v21 = vld [vmem:[#allocation6 + $0x3c0] sm:$0xff] }
 0x299   :  { %6468 = vmatprep.subr.bf16.mxu0 %v8106_v33  ;;  %6640 = vmatprep.subr.bf16.mxu1 %v8108_v34  ;;  %v8131_v33 = vcombine.low %v3817_v11, %v3821_v29  ;;  %v8138_v34 = vcombine.high %v3824_v36, %v3828_v23  ;;  %v8140_v35 = vcombine.high %v3825_v48, %v3829_v25  ;;  %v3844_v60 = vld [vmem:[#allocation6 + $0x3e0] sm:$0xff] }
 0x29a   :  { %v8153_v9 = vcombine.low %v3840_v21, %v3844_v60  ;;  %v8162_v29 = vcombine.high %v10016_v47, %v10018_v26 }
 0x29c   :  { %6469 = vmatpush1.bf16.msra.mxu0 %v8105_v50  ;;  %6641 = vmatpush1.bf16.msra.mxu1 %v8107_v52  ;;  %v3837_v50 = vld [vmem:[#allocation6 + $0x3a8] sm:$0xff]  ;;  %v8137_v52 = vcombine.low %v3824_v36, %v3828_v23 }
 0x29d   :  { %6470 = vmatprep.subr.bf16.mxu0 %v8114_v56  ;;  %6642 = vmatprep.subr.bf16.mxu1 %v8116_v55  ;;  %v8139_v56 = vcombine.low %v3825_v48, %v3829_v25  ;;  %v8146_v55 = vcombine.high %v3832_v38, %v3836_v41  ;;  %v8148_v57 = vcombine.high %v3833_v45, %v3837_v50 }
 0x2a0   :  { %6471 = vmatpush1.bf16.msra.mxu0 %v8113_v0  ;;  %6643 = vmatpush1.bf16.msra.mxu1 %v8115_v3  ;;  %v3845_v0 = vld [vmem:[#allocation6 + $0x3e8] sm:$0xff]  ;;  %v8145_v3 = vcombine.low %v3832_v38, %v3836_v41 }
 0x2a1   :  { %6472 = vmatprep.subr.bf16.mxu0 %v8122_v1  ;;  %6644 = vmatprep.subr.bf16.mxu1 %v8124_v39  ;;  %v8147_v1 = vcombine.low %v3833_v45, %v3837_v50  ;;  %v8154_v39 = vcombine.high %v3840_v21, %v3844_v60  ;;  %v8156_v5 = vcombine.high %v3841_v61, %v3845_v0 }
 0x2a2   :  { %v8155_v11 = vcombine.low %v3841_v61, %v3845_v0 }
 0x2a4   :  { %6473 = vmatpush1.bf16.msra.mxu0 %v8121_v44  ;;  %6645 = vmatpush1.bf16.msra.mxu1 %v8123_v16  ;;  %v8164_v44 = vcombine.high %v10020_v24, %v10022_v43 }
 0x2a5   :  { %6474 = vmatprep.subr.bf16.mxu0 %v8130_v20  ;;  %6646 = vmatprep.subr.bf16.mxu1 %v8132_v51 }
 0x2a8   :  { %6475 = vmatpush1.bf16.msra.mxu0 %v8129_v31  ;;  %6647 = vmatpush1.bf16.msra.mxu1 %v8131_v33  ;;  %v10044_v33 = vld [vmem:[#allocation4 + $0x10] sm:$0xff] }
 0x2a9   :  { %6476 = vmatprep.subr.bf16.mxu0 %v8138_v34  ;;  %6648 = vmatprep.subr.bf16.mxu1 %v8140_v35  ;;  %v682_v34 = vrot.slane %v9955_v7, %v9909_v59  ;;  %v686_v35 = vrot.slane %v9955_v7, %v9915_v63  ;;  %v690_v38 = vrot.slane %v10044_v33, %v9903_v58 }
 0x2aa   :  { %v714_v41 = vrot.slane %v10044_v33, %v9909_v59 }
 0x2ab   :  { %v3349_v45 = vadd.f32 %v9996_v32, %v682_v34  ;;  %v3351_v50 = vadd.f32 %v9998_v37, %v686_v35  ;;  %v3355_v60 = vadd.f32 %v10003_v54, %v686_v35 }
 0x2ac   :  { %6477 = vmatpush1.bf16.msra.mxu0 %v8137_v52  ;;  %6649 = vmatpush1.bf16.msra.mxu1 %v8139_v56  ;;  %v710_v52 = vrot.slane %v10044_v33, %v9912_v62  ;;  %v718_v56 = vrot.slane %v10044_v33, %v9915_v63 }
 0x2ad   :  { %6478 = vmatprep.subr.bf16.mxu0 %v8146_v55  ;;  %6650 = vmatprep.subr.bf16.mxu1 %v8148_v57  ;;  %v3353_v55 = vadd.f32 %v10001_v42, %v682_v34  ;;  %v3630_v37 = vmax.f32 %v3351_v50, 0.0  ;;  %v3658_v35 = vmax.f32 %v3355_v60, 0.0  ;;  %v3861_v60 = vld [vmem:[#allocation6 + $0x468] sm:$0xff] }
 0x2b0   :  { %6479 = vmatpush1.bf16.msra.mxu0 %v8145_v3  ;;  %6651 = vmatpush1.bf16.msra.mxu1 %v8147_v1  ;;  %v3629_v1 = vmax.f32 %v3349_v45, 0.0 }
 0x2b1   :  { %6480 = vmatprep.subr.bf16.mxu0 %v8154_v39  ;;  %6652 = vmatprep.subr.bf16.mxu1 %v8156_v5 }
 0x2b4   :  { %6481 = vmatpush1.bf16.msra.mxu0 %v8153_v9  ;;  %6653 = vmatpush1.bf16.msra.mxu1 %v8155_v11 }
 0x2b5   :  { %6493 = vmatprep.subr.bf16.mxu0 %v8162_v29  ;;  %6665 = vmatprep.subr.bf16.mxu1 %v8164_v44  ;;  %v3657_v29 = vmax.f32 %v3353_v55, 0.0 }
 0x2ca   :  { %v3391_v16 = vpop.f32.mrb[16].mxu0  ;;  %v10032_v20 = vpop.f32.mrb[16].mxu1 }
 0x2cb   :  { %v10034_v51 = vpop.f32.mrb[17].mxu0  ;;  %v10036_v36 = vpop.f32.mrb[17].mxu1  ;;  %v3392_v57 = vadd.f32 %v3391_v16, %v690_v38 }
 0x2cc   :  { %v3395_v23 = vpop.f32.mrb[18].mxu0  ;;  %v10038_v48 = vpop.f32.mrb[18].mxu1 }
 0x2cd   :  { %v10040_v25 = vpop.f32.mrb[19].mxu0  ;;  %v10042_v31 = vpop.f32.mrb[19].mxu1  ;;  %v3396_v61 = vadd.f32 %v3395_v23, %v690_v38  ;;  %v3631_v44 = vmax.f32 %v3392_v57, 0.0 }
 0x2cf   :  { %v3659_v38 = vmax.f32 %v3396_v61, 0.0 }
 0x30a   :  { %v10061_v7 = vpop.f32.mrb[20].mxu0  ;;  %v3520_v21 = vpop.f32.mrb[20].mxu1 }
 0x30b   :  { %v3521_v0 = vadd.f32 %v3520_v21, %v714_v41  ;;  %v3479_v3 = vpop.f32.mrb[21].mxu0  ;;  %v3522_v32 = vpop.f32.mrb[21].mxu1 }
 0x30c   :  { %v3480_v39 = vadd.f32 %v3479_v3, %v710_v52  ;;  %v3523_v5 = vadd.f32 %v3522_v32, %v718_v56  ;;  %v10064_v9 = vpop.f32.mrb[22].mxu0  ;;  %v3524_v11 = vpop.f32.mrb[22].mxu1 }
 0x30d   :  { %v3637_v42 = vmax.f32 %v3521_v0, 0.0  ;;  %v3525_v16 = vadd.f32 %v3524_v11, %v714_v41  ;;  %v3483_v34 = vpop.f32.mrb[23].mxu0  ;;  %v3526_v49 = vpop.f32.mrb[23].mxu1  ;;  %v3869_v11 = vld [vmem:[#allocation6 + $0x4a8] sm:$0xff] }
 0x30e   :  { %v3636_v46 = vmax.f32 %v3480_v39, 0.0  ;;  %v3638_v63 = vmax.f32 %v3523_v5, 0.0  ;;  %v3484_v54 = vadd.f32 %v3483_v34, %v710_v52  ;;  %v3527_v23 = vadd.f32 %v3526_v49, %v718_v56  ;;  %v3856_v5 = vld [vmem:[#allocation6 + $0x440] sm:$0xff]  ;;  %v3857_v56 = vld [vmem:[#allocation6 + $0x448] sm:$0xff] }
 0x30f   :  { %v3686_v21 = vmax.f32 %v3630_v37, %v3637_v42  ;;  %v3665_v45 = vmax.f32 %v3525_v16, 0.0  ;;  %v3860_v52 = vld [vmem:[#allocation6 + $0x460] sm:$0xff] }
 0x310   :  { %v3685_v50 = vmax.f32 %v3629_v1, %v3636_v46  ;;  %v3687_v3 = vmax.f32 %v3631_v44, %v3638_v63  ;;  %v3664_v32 = vmax.f32 %v3484_v54, 0.0  ;;  %v3666_v62 = vmax.f32 %v3527_v23, 0.0  ;;  %v3864_v37 = vld [vmem:[#allocation6 + $0x480] sm:$0xff]  ;;  %v3873_v54 = vld [vmem:[#allocation6 + $0x4c8] sm:$0xff] }
 0x311   :  { %v3700_v59 = vmax.f32 %v9973_v2, %v3686_v21  ;;  %v3693_v55 = vmax.f32 %v3658_v35, %v3665_v45  ;;  %v3872_v16 = vld [vmem:[#allocation6 + $0x4c0] sm:$0xff]  ;;  %v3877_v23 = vld [vmem:[#allocation6 + $0x4e8] sm:$0xff] }
 0x312   :  { %v3699_v57 = vmax.f32 %v9941_v40, %v3685_v50  ;;  %v3701_v41 = vmax.f32 %v9977_v22, %v3687_v3  ;;  %v3692_v0 = vmax.f32 %v3657_v29, %v3664_v32  ;;  %v3694_v39 = vmax.f32 %v3659_v38, %v3666_v62  ;;  %v3868_v62 = vld [vmem:[#allocation6 + $0x4a0] sm:$0xff]  ;;  %v3881_v21 = vld [vmem:[#allocation6 + $0x508] sm:$0xff] }
 0x313   :  { %v3707_v49 = vmax.f32 %v9981_v13, %v3693_v55  ;;  %v8170_v40 = vcombine.high %v3856_v5, %v3860_v52  ;;  %v8172_v22 = vcombine.high %v3857_v56, %v3861_v60  ;;  %v3865_v13 = vld [vmem:[#allocation6 + $0x488] sm:$0xff]  ;;  %v8171_v29 = vcombine.low %v3857_v56, %v3861_v60  ;;  %v3876_v34 = vld [vmem:[#allocation6 + $0x4e0] sm:$0xff] }
 0x314   :  { %v3706_v46 = vmax.f32 %v9943_v53, %v3692_v0  ;;  %v3708_v63 = vmax.f32 %v9985_v18, %v3694_v39  ;;  %v10304_v53 = vcombine.low %v10020_v24, %v10022_v43  ;;  %v8169_v18 = vcombine.low %v3856_v5, %v3860_v52  ;;  %v3880_v24 = vld [vmem:[#allocation6 + $0x500] sm:$0xff]  ;;  %v3885_v45 = vld [vmem:[#allocation6 + $0x528] sm:$0xff] }
 0x315   :  { %v10072_v61 = vpack.c.bf16 %v3707_v49, %v3700_v59  ;;  %v10303_v59 = vcombine.low %v10016_v47, %v10018_v26  ;;  %v8178_v44 = vcombine.high %v3864_v37, %v3868_v62  ;;  %v8180_v42 = vcombine.high %v3865_v13, %v3869_v11  ;;  %v3884_v43 = vld [vmem:[#allocation6 + $0x520] sm:$0xff]  ;;  %v3889_v0 = vld [vmem:[#allocation6 + $0x548] sm:$0xff] }
 0x316   :  { %v10074_v2 = vpack.c.bf16 %v3706_v46, %v3699_v57  ;;  %v10076_v1 = vpack.c.bf16 %v3708_v63, %v3701_v41  ;;  %v8177_v35 = vcombine.low %v3864_v37, %v3868_v62  ;;  %v8179_v38 = vcombine.low %v3865_v13, %v3869_v11  ;;  %v3888_v57 = vld [vmem:[#allocation6 + $0x540] sm:$0xff]  ;;  %v3893_v39 = vld [vmem:[#allocation6 + $0x568] sm:$0xff] }
 0x317   :  { %6482 = vmatprep.mubr.bf16.mxu0 %v10072_v61  ;;  %6654 = vmatprep.mubr.bf16.mxu1 %v10072_v61  ;;  %v8186_v47 = vcombine.high %v3872_v16, %v3876_v34  ;;  %v8188_v26 = vcombine.high %v3873_v54, %v3877_v23  ;;  %v8185_v50 = vcombine.low %v3872_v16, %v3876_v34  ;;  %v3892_v41 = vld [vmem:[#allocation6 + $0x560] sm:$0xff]  ;;  %v3897_v63 = vld [vmem:[#allocation6 + $0x588] sm:$0xff] }
 0x318   :  { %6483 = vmatmul.mubr.bf16.vlgmr.msra.gmra.mrb[28].mxu0 %v10074_v2  ;;  %6655 = vmatmul.mubr.bf16.vlgmr.msra.gmra.mrb[28].mxu1 %v10074_v2  ;;  %v8187_v3 = vcombine.low %v3873_v54, %v3877_v23  ;;  %v8194_v32 = vcombine.high %v3880_v24, %v3884_v43  ;;  %v8196_v55 = vcombine.high %v3881_v21, %v3885_v45  ;;  %v3896_v60 = vld [vmem:[#allocation6 + $0x580] sm:$0xff]  ;;  %v3913_v23 = vld [vmem:[#allocation6 + $0x608] sm:$0xff] }
 0x319   :  { %6494 = vmatpush1.bf16.msra.mxu0 %v10303_v59  ;;  %6666 = vmatpush1.bf16.msra.mxu1 %v10304_v53  ;;  %v8193_v5 = vcombine.low %v3880_v24, %v3884_v43  ;;  %v8195_v49 = vcombine.low %v3881_v21, %v3885_v45  ;;  %v8202_v52 = vcombine.high %v3888_v57, %v3892_v41  ;;  %v3900_v46 = vld [vmem:[#allocation6 + $0x5a0] sm:$0xff]  ;;  %v3905_v53 = vld [vmem:[#allocation6 + $0x5c8] sm:$0xff] }
 0x31a   :  { %6495 = vmatprep.subr.bf16.mxu0 %v8170_v40  ;;  %6667 = vmatprep.subr.bf16.mxu1 %v8172_v22  ;;  %v8204_v56 = vcombine.high %v3889_v0, %v3893_v39  ;;  %v3901_v40 = vld [vmem:[#allocation6 + $0x5a8] sm:$0xff]  ;;  %v8201_v22 = vcombine.low %v3888_v57, %v3892_v41  ;;  %v8203_v37 = vcombine.low %v3889_v0, %v3893_v39  ;;  %v3904_v11 = vld [vmem:[#allocation6 + $0x5c0] sm:$0xff] }
 0x31b   :  { %v8210_v62 = vcombine.high %v3896_v60, %v3900_v46  ;;  %v8212_v13 = vcombine.high %v3897_v63, %v3901_v40  ;;  %v3908_v59 = vld [vmem:[#allocation6 + $0x5e0] sm:$0xff]  ;;  %v3921_v45 = vld [vmem:[#allocation6 + $0x648] sm:$0xff] }
 0x31c   :  { %v3912_v34 = vld [vmem:[#allocation6 + $0x600] sm:$0xff]  ;;  %v3929_v39 = vld [vmem:[#allocation6 + $0x688] sm:$0xff] }
 0x31d   :  { %6496 = vmatpush1.bf16.msra.mxu0 %v8169_v18  ;;  %6668 = vmatpush1.bf16.msra.mxu1 %v8171_v29  ;;  %v3909_v18 = vld [vmem:[#allocation6 + $0x5e8] sm:$0xff]  ;;  %v8209_v29 = vcombine.low %v3896_v60, %v3900_v46  ;;  %v3916_v54 = vld [vmem:[#allocation6 + $0x620] sm:$0xff] }
 0x31e   :  { %6497 = vmatprep.subr.bf16.mxu0 %v8178_v44  ;;  %6669 = vmatprep.subr.bf16.mxu1 %v8180_v42  ;;  %v8211_v44 = vcombine.low %v3897_v63, %v3901_v40  ;;  %v8218_v42 = vcombine.high %v3904_v11, %v3908_v59  ;;  %v8220_v16 = vcombine.high %v3905_v53, %v3909_v18  ;;  %v3920_v43 = vld [vmem:[#allocation6 + $0x640] sm:$0xff]  ;;  %v3937_v40 = vld [vmem:[#allocation6 + $0x6c8] sm:$0xff] }
 0x31f   :  { %v3924_v21 = vld [vmem:[#allocation6 + $0x660] sm:$0xff] }
 0x320   :  { %v3928_v41 = vld [vmem:[#allocation6 + $0x680] sm:$0xff] }
 0x321   :  { %6498 = vmatpush1.bf16.msra.mxu0 %v8177_v35  ;;  %6670 = vmatpush1.bf16.msra.mxu1 %v8179_v38  ;;  %v3917_v35 = vld [vmem:[#allocation6 + $0x628] sm:$0xff]  ;;  %v8217_v38 = vcombine.low %v3904_v11, %v3908_v59  ;;  %v3932_v0 = vld [vmem:[#allocation6 + $0x6a0] sm:$0xff] }
 0x322   :  { %6499 = vmatprep.subr.bf16.mxu0 %v8186_v47  ;;  %6671 = vmatprep.subr.bf16.mxu1 %v8188_v26  ;;  %v8219_v47 = vcombine.low %v3905_v53, %v3909_v18  ;;  %v8226_v26 = vcombine.high %v3912_v34, %v3916_v54  ;;  %v8228_v24 = vcombine.high %v3913_v23, %v3917_v35  ;;  %v3936_v46 = vld [vmem:[#allocation6 + $0x6c0] sm:$0xff] }
 0x323   :  { %v3940_v63 = vld [vmem:[#allocation6 + $0x6e0] sm:$0xff]  ;;  %v698_v53 = vrot.slane %v10044_v33, %v9871_v27  ;;  %v694_v18 = vrot.slane %v10044_v33, %v9951_v12 }
 0x324   :  { %v3944_v59 = vld [vmem:[#allocation6 + $0x700] sm:$0xff] }
 0x325   :  { %6500 = vmatpush1.bf16.msra.mxu0 %v8185_v50  ;;  %6672 = vmatpush1.bf16.msra.mxu1 %v8187_v3  ;;  %v3925_v50 = vld [vmem:[#allocation6 + $0x668] sm:$0xff]  ;;  %v8225_v3 = vcombine.low %v3912_v34, %v3916_v54  ;;  %v706_v34 = vrot.slane %v10044_v33, %v9906_v15  ;;  %v8249_v54 = vcombine.low %v3936_v46, %v3940_v63 }
 0x326   :  { %6501 = vmatprep.subr.bf16.mxu0 %v8194_v32  ;;  %6673 = vmatprep.subr.bf16.mxu1 %v8196_v55  ;;  %v8227_v32 = vcombine.low %v3913_v23, %v3917_v35  ;;  %v8234_v55 = vcombine.high %v3920_v43, %v3924_v21  ;;  %v8236_v57 = vcombine.high %v3921_v45, %v3925_v50  ;;  %v618_v35 = vld [vmem:[#allocation4 + $0x18] sm:$0xf] }
 0x329   :  { %6502 = vmatpush1.bf16.msra.mxu0 %v8193_v5  ;;  %6674 = vmatpush1.bf16.msra.mxu1 %v8195_v49  ;;  %v3933_v5 = vld [vmem:[#allocation6 + $0x6a8] sm:$0xff]  ;;  %v8233_v49 = vcombine.low %v3920_v43, %v3924_v21  ;;  %v10101_v21 = vadd.f32 %v10032_v20, %v698_v53 }
 0x32a   :  { %6503 = vmatprep.subr.bf16.mxu0 %v8202_v52  ;;  %6675 = vmatprep.subr.bf16.mxu1 %v8204_v56  ;;  %v8235_v52 = vcombine.low %v3921_v45, %v3925_v50  ;;  %v8242_v56 = vcombine.high %v3928_v41, %v3932_v0  ;;  %v8244_v60 = vcombine.high %v3929_v39, %v3933_v5 }
 0x32b   :  { %v10104_v45 = vadd.f32 %v10034_v51, %v694_v18  ;;  %v10121_v51 = vadd.f32 %v10040_v25, %v694_v18  ;;  %v10160_v18 = vld [vmem:[#allocation6 + $0x800] sm:$0xff] }
 0x32d   :  { %6504 = vmatpush1.bf16.msra.mxu0 %v8201_v22  ;;  %6676 = vmatpush1.bf16.msra.mxu1 %v8203_v37  ;;  %v3941_v22 = vld [vmem:[#allocation6 + $0x6e8] sm:$0xff]  ;;  %v8241_v37 = vcombine.low %v3928_v41, %v3932_v0  ;;  %v730_v41 = vrot.slane %v618_v35, %v9871_v27  ;;  %v734_v0 = vrot.slane %v618_v35, %v9876_v30 }
 0x32e   :  { %6505 = vmatprep.subr.bf16.mxu0 %v8210_v62  ;;  %6677 = vmatprep.subr.bf16.mxu1 %v8212_v13  ;;  %v8243_v62 = vcombine.low %v3929_v39, %v3933_v5  ;;  %v8250_v13 = vcombine.high %v3936_v46, %v3940_v63  ;;  %v8252_v11 = vcombine.high %v3937_v40, %v3941_v22  ;;  %v10125_v39 = vld [vmem:[#allocation6 + $0x780] sm:$0xff]  ;;  %v3633_v46 = vmax.f32 %v10101_v21, 0.0 }
 0x32f   :  { %v8251_v23 = vcombine.low %v3937_v40, %v3941_v22  ;;  %v3632_v63 = vmax.f32 %v10104_v45, 0.0  ;;  %v10147_v22 = vld [vmem:[#allocation6 + $0x7e0] sm:$0xff] }
 0x331   :  { %6506 = vmatpush1.bf16.msra.mxu0 %v8209_v29  ;;  %6678 = vmatpush1.bf16.msra.mxu1 %v8211_v44  ;;  %v702_v29 = vrot.slane %v10044_v33, %v9876_v30  ;;  %v3948_v44 = vld [vmem:[#allocation6 + $0x720] sm:$0xff] }
 0x332   :  { %6507 = vmatprep.subr.bf16.mxu0 %v8218_v42  ;;  %6679 = vmatprep.subr.bf16.mxu1 %v8220_v16  ;;  %v3945_v42 = vld [vmem:[#allocation6 + $0x708] sm:$0xff] }
 0x333   :  { %v3949_v16 = vld [vmem:[#allocation6 + $0x728] sm:$0xff]  ;;  %v10107_v33 = vadd.f32 %v10036_v36, %v702_v29  ;;  %v726_v36 = vrot.slane %v618_v35, %v9951_v12  ;;  %v10130_v5 = vadd.f32 %v10042_v31, %v702_v29  ;;  %v10162_v29 = vld [vmem:[#allocation6 + $0x820] sm:$0xff] }
 0x334   :  { %v8260_v43 = vcombine.high %v3945_v42, %v3949_v16  ;;  %v8259_v50 = vcombine.low %v3945_v42, %v3949_v16  ;;  %v8290_v45 = vcombine.high %v10160_v18, %v10162_v29 }
 0x335   :  { %6508 = vmatpush1.bf16.msra.mxu0 %v8217_v38  ;;  %6680 = vmatpush1.bf16.msra.mxu1 %v8219_v47  ;;  %v10096_v38 = vld [vmem:[#allocation6 + $0x740] sm:$0xff]  ;;  %v3634_v31 = vmax.f32 %v10107_v33, 0.0  ;;  %v3662_v16 = vmax.f32 %v10130_v5, 0.0 }
 0x336   :  { %6509 = vmatprep.subr.bf16.mxu0 %v8226_v26  ;;  %6681 = vmatprep.subr.bf16.mxu1 %v8228_v24  ;;  %v10098_v47 = vld [vmem:[#allocation6 + $0x760] sm:$0xff]  ;;  %v8257_v26 = vcombine.low %v3944_v59, %v3948_v44  ;;  %v8258_v24 = vcombine.high %v3944_v59, %v3948_v44  ;;  %v10156_v59 = vadd.f32 %v10064_v9, %v706_v34  ;;  %v3660_v44 = vmax.f32 %v10121_v51, 0.0 }
 0x337   :  { %v8266_v20 = vcombine.high %v10096_v38, %v10098_v47 }
 0x339   :  { %6510 = vmatpush1.bf16.msra.mxu0 %v8225_v3  ;;  %6682 = vmatpush1.bf16.msra.mxu1 %v8227_v32  ;;  %v10109_v3 = vld [vmem:[#allocation6 + $0x748] sm:$0xff] }
 0x33a   :  { %6511 = vmatprep.subr.bf16.mxu0 %v8234_v55  ;;  %6683 = vmatprep.subr.bf16.mxu1 %v8236_v57  ;;  %v10111_v32 = vld [vmem:[#allocation6 + $0x768] sm:$0xff]  ;;  %v10114_v55 = vadd.f32 %v10038_v48, %v698_v53  ;;  %v722_v57 = vrot.slane %v618_v35, %v9903_v58  ;;  %v10127_v48 = vld [vmem:[#allocation6 + $0x7a0] sm:$0xff] }
 0x33b   :  { %v8268_v25 = vcombine.high %v10109_v3, %v10111_v32  ;;  %v8267_v40 = vcombine.low %v10109_v3, %v10111_v32  ;;  %v8273_v53 = vcombine.low %v10125_v39, %v10127_v48  ;;  %v8274_v42 = vcombine.high %v10125_v39, %v10127_v48 }
 0x33d   :  { %6512 = vmatpush1.bf16.msra.mxu0 %v8233_v49  ;;  %6684 = vmatpush1.bf16.msra.mxu1 %v8235_v52  ;;  %v8265_v49 = vcombine.low %v10096_v38, %v10098_v47  ;;  %v10136_v52 = vld [vmem:[#allocation6 + $0x788] sm:$0xff] }
 0x33e   :  { %6513 = vmatprep.subr.bf16.mxu0 %v8242_v56  ;;  %6685 = vmatprep.subr.bf16.mxu1 %v8244_v60  ;;  %v10138_v56 = vld [vmem:[#allocation6 + $0x7a8] sm:$0xff]  ;;  %v10140_v60 = vld [vmem:[#allocation6 + $0x7c0] sm:$0xff] }
 0x33f   :  { %v8276_v9 = vcombine.high %v10136_v52, %v10138_v56  ;;  %v8282_v35 = vcombine.high %v10140_v60, %v10147_v22 }
 0x341   :  { %6514 = vmatpush1.bf16.msra.mxu0 %v8241_v37  ;;  %6686 = vmatpush1.bf16.msra.mxu1 %v8243_v62  ;;  %v10149_v37 = vld [vmem:[#allocation6 + $0x7c8] sm:$0xff] }
 0x342   :  { %6515 = vmatprep.subr.bf16.mxu0 %v8250_v13  ;;  %6687 = vmatprep.subr.bf16.mxu1 %v8252_v11  ;;  %v10151_v62 = vld [vmem:[#allocation6 + $0x7e8] sm:$0xff]  ;;  %v3478_v11 = vadd.f32 %v10061_v7, %v706_v34  ;;  %v8275_v7 = vcombine.low %v10136_v52, %v10138_v56 }
 0x343   :  { %v8284_v21 = vcombine.high %v10149_v37, %v10151_v62 }
 0x344   :  { %v3635_v33 = vmax.f32 %v3478_v11, 0.0 }
 0x345   :  { %6516 = vmatpush1.bf16.msra.mxu0 %v8249_v54  ;;  %6688 = vmatpush1.bf16.msra.mxu1 %v8251_v23  ;;  %v8281_v23 = vcombine.low %v10140_v60, %v10147_v22 }
 0x346   :  { %6517 = vmatprep.subr.bf16.mxu0 %v8258_v24  ;;  %6689 = vmatprep.subr.bf16.mxu1 %v8260_v43 }
 0x349   :  { %6518 = vmatpush1.bf16.msra.mxu0 %v8257_v26  ;;  %6690 = vmatpush1.bf16.msra.mxu1 %v8259_v50  ;;  %v3663_v50 = vmax.f32 %v10156_v59, 0.0 }
 0x34a   :  { %v3563_v34 = vpop.f32.mrb[24].mxu0  ;;  %v3606_v54 = vpop.f32.mrb[24].mxu1  ;;  %6519 = vmatprep.subr.bf16.mxu0 %v8266_v20  ;;  %6691 = vmatprep.subr.bf16.mxu1 %v8268_v25 }
 0x34b   :  { %v3564_v47 = vadd.f32 %v3563_v34, %v722_v57  ;;  %v3607_v26 = vadd.f32 %v3606_v54, %v730_v41  ;;  %v3565_v24 = vpop.f32.mrb[25].mxu0  ;;  %v3608_v43 = vpop.f32.mrb[25].mxu1 }
 0x34c   :  { %v3566_v3 = vadd.f32 %v3565_v24, %v726_v36  ;;  %v3609_v32 = vadd.f32 %v3608_v43, %v734_v0  ;;  %v3567_v20 = vpop.f32.mrb[26].mxu0  ;;  %v3610_v51 = vpop.f32.mrb[26].mxu1 }
 0x34d   :  { %v3639_v39 = vmax.f32 %v3564_v47, 0.0  ;;  %v3641_v48 = vmax.f32 %v3607_v26, 0.0  ;;  %v3568_v5 = vadd.f32 %v3567_v20, %v722_v57  ;;  %v3611_v25 = vadd.f32 %v3610_v51, %v730_v41  ;;  %6520 = vmatpush1.bf16.msra.mxu0 %v8265_v49  ;;  %6692 = vmatpush1.bf16.msra.mxu1 %v8267_v40  ;;  %v3569_v52 = vpop.f32.mrb[27].mxu0  ;;  %v3612_v56 = vpop.f32.mrb[27].mxu1  ;;  %v4004_v20 = vld [vmem:[#allocation6 + $0x8e0] sm:$0xff]  ;;  %v4001_v51 = vld [vmem:[#allocation6 + $0x8c8] sm:$0xff] }
 0x34e   :  { %v3640_v60 = vmax.f32 %v3566_v3, 0.0  ;;  %v3642_v22 = vmax.f32 %v3609_v32, 0.0  ;;  %v3570_v34 = vadd.f32 %v3569_v52, %v726_v36  ;;  %v3613_v54 = vadd.f32 %v3612_v56, %v734_v0  ;;  %6521 = vmatprep.subr.bf16.mxu0 %v8274_v42  ;;  %6693 = vmatprep.subr.bf16.mxu1 %v8276_v9  ;;  %v3977_v3 = vld [vmem:[#allocation6 + $0x808] sm:$0xff]  ;;  %v4000_v32 = vld [vmem:[#allocation6 + $0x8c0] sm:$0xff] }
 0x34f   :  { %v3688_v11 = vmax.f32 %v3632_v63, %v3639_v39  ;;  %v3690_v59 = vmax.f32 %v3634_v31, %v3641_v48  ;;  %v3667_v24 = vmax.f32 %v3568_v5, 0.0  ;;  %v3669_v43 = vmax.f32 %v3611_v25, 0.0  ;;  %v3981_v36 = vld [vmem:[#allocation6 + $0x828] sm:$0xff]  ;;  %v4008_v56 = vld [vmem:[#allocation6 + $0x900] sm:$0xff] }
 0x350   :  { %v3689_v38 = vmax.f32 %v3633_v46, %v3640_v60  ;;  %v3691_v13 = vmax.f32 %v3635_v33, %v3642_v22  ;;  %v3668_v47 = vmax.f32 %v3570_v34, 0.0  ;;  %v3670_v26 = vmax.f32 %v3613_v54, 0.0  ;;  %v3997_v33 = vld [vmem:[#allocation6 + $0x8a8] sm:$0xff]  ;;  %v4012_v60 = vld [vmem:[#allocation6 + $0x920] sm:$0xff] }
 0x351   :  { %v3702_v57 = vmax.f32 %v9975_v4, %v3688_v11  ;;  %v3704_v41 = vmax.f32 %v10008_v6, %v3690_v59  ;;  %v3695_v49 = vmax.f32 %v3660_v44, %v3667_v24  ;;  %v3697_v40 = vmax.f32 %v3662_v16, %v3669_v43  ;;  %6522 = vmatpush1.bf16.msra.mxu0 %v8273_v53  ;;  %v3984_v16 = vld [vmem:[#allocation6 + $0x840] sm:$0xff]  ;;  %v4005_v39 = vld [vmem:[#allocation6 + $0x8e8] sm:$0xff] }
 0x352   :  { %v3703_v0 = vmax.f32 %v9979_v8, %v3689_v38  ;;  %v3705_v63 = vmax.f32 %v10010_v10, %v3691_v13  ;;  %v10305_v31 = vmax.f32 %v10114_v55, 0.0  ;;  %v3698_v46 = vmax.f32 %v3663_v50, %v3670_v26  ;;  %6694 = vmatpush1.bf16.msra.mxu1 %v8275_v7  ;;  %6523 = vmatprep.subr.bf16.mxu0 %v8282_v35  ;;  %v3988_v8 = vld [vmem:[#allocation6 + $0x860] sm:$0xff]  ;;  %v3989_v13 = vld [vmem:[#allocation6 + $0x868] sm:$0xff] }
 0x353   :  { %v3709_v9 = vmax.f32 %v9983_v14, %v3695_v49  ;;  %v3711_v4 = vmax.f32 %v10012_v17, %v3697_v40  ;;  %6695 = vmatprep.subr.bf16.mxu1 %v8284_v21  ;;  %v8292_v44 = vcombine.high %v3977_v3, %v3981_v36  ;;  %v8289_v55 = vcombine.low %v10160_v18, %v10162_v29  ;;  %v3985_v14 = vld [vmem:[#allocation6 + $0x848] sm:$0xff]  ;;  %v3992_v35 = vld [vmem:[#allocation6 + $0x880] sm:$0xff] }
 0x354   :  { %v3696_v42 = vmax.f32 %v10305_v31, %v3668_v47  ;;  %v3712_v53 = vmax.f32 %v10014_v28, %v3698_v46  ;;  %v8291_v28 = vcombine.low %v3977_v3, %v3981_v36  ;;  %v3996_v21 = vld [vmem:[#allocation6 + $0x8a0] sm:$0xff]  ;;  %v8300_v18 = vcombine.high %v3985_v14, %v3989_v13  ;;  %v3993_v29 = vld [vmem:[#allocation6 + $0x888] sm:$0xff] }
 0x355   :  { %v10193_v38 = vpack.c.bf16 %v3709_v9, %v3702_v57  ;;  %v10195_v10 = vpack.c.bf16 %v3711_v4, %v3704_v41  ;;  %6524 = vmatpush1.bf16.msra.mxu0 %v8281_v23  ;;  %v8298_v23 = vcombine.high %v3984_v16, %v3988_v8  ;;  %v8308_v50 = vcombine.high %v3993_v29, %v3997_v33  ;;  %v4009_v22 = vld [vmem:[#allocation6 + $0x908] sm:$0xff]  ;;  %v4016_v43 = vld [vmem:[#allocation6 + $0x940] sm:$0xff] }
 0x356   :  { %v3710_v6 = vmax.f32 %v9987_v19, %v3696_v42  ;;  %v10201_v7 = vpack.c.bf16 %v3712_v53, %v3705_v63  ;;  %v10306_v19 = vcombine.low %v10149_v37, %v10151_v62  ;;  %6536 = vmatprep.subr.bf16.mxu0 %v8290_v45  ;;  %v8297_v37 = vcombine.low %v3984_v16, %v3988_v8  ;;  %v4013_v34 = vld [vmem:[#allocation6 + $0x928] sm:$0xff]  ;;  %v4020_v47 = vld [vmem:[#allocation6 + $0x960] sm:$0xff] }
 0x357   :  { %6525 = vmatprep.mubr.bf16.mxu0 %v10193_v38  ;;  %6697 = vmatprep.mubr.bf16.mxu1 %v10193_v38  ;;  %v8299_v62 = vcombine.low %v3985_v14, %v3989_v13  ;;  %v8306_v45 = vcombine.high %v3992_v35, %v3996_v21  ;;  %v8305_v48 = vcombine.low %v3992_v35, %v3996_v21  ;;  %v4017_v26 = vld [vmem:[#allocation6 + $0x948] sm:$0xff]  ;;  %v4024_v36 = vld [vmem:[#allocation6 + $0x980] sm:$0xff] }
 0x358   :  { %v10199_v17 = vpack.c.bf16 %v3710_v6, %v3703_v0  ;;  %6696 = vmatpush1.bf16.msra.mxu1 %v10306_v19  ;;  %6526 = vmatmul.mubr.bf16.vlgmr.msra.gmra.mrb[28].mxu0 %v10076_v1  ;;  %v8307_v5 = vcombine.low %v3993_v29, %v3997_v33  ;;  %v8314_v25 = vcombine.high %v4000_v32, %v4004_v20  ;;  %v4021_v57 = vld [vmem:[#allocation6 + $0x968] sm:$0xff]  ;;  %v4028_v0 = vld [vmem:[#allocation6 + $0x9a0] sm:$0xff] }
 0x359   :  { %6708 = vmatprep.subr.bf16.mxu1 %v8292_v44  ;;  %6537 = vmatpush1.bf16.msra.mxu0 %v8289_v55  ;;  %v8316_v52 = vcombine.high %v4001_v51, %v4005_v39  ;;  %v8313_v54 = vcombine.low %v4000_v32, %v4004_v20  ;;  %v8315_v11 = vcombine.low %v4001_v51, %v4005_v39  ;;  %v4025_v63 = vld [vmem:[#allocation6 + $0x988] sm:$0xff]  ;;  %v4032_v6 = vld [vmem:[#allocation6 + $0x9c0] sm:$0xff] }
 0x35a   :  { %6568 = vmatprep.mubr.bf16.mxu0 %v10195_v10  ;;  %6538 = vmatprep.subr.bf16.mxu0 %v8298_v23  ;;  %v8322_v59 = vcombine.high %v4008_v56, %v4012_v60  ;;  %v8324_v24 = vcombine.high %v4009_v22, %v4013_v34  ;;  %v8321_v41 = vcombine.low %v4008_v56, %v4012_v60  ;;  %v4029_v31 = vld [vmem:[#allocation6 + $0x9a8] sm:$0xff]  ;;  %v4036_v53 = vld [vmem:[#allocation6 + $0x9e0] sm:$0xff] }
 0x35b   :  { %6698 = vmatmul.mubr.bf16.vlgmr.msra.gmra.mrb[28].mxu1 %v10076_v1  ;;  %v8323_v49 = vcombine.low %v4009_v22, %v4013_v34  ;;  %v8330_v40 = vcombine.high %v4016_v43, %v4020_v47  ;;  %v8332_v3 = vcombine.high %v4017_v26, %v4021_v57  ;;  %v8329_v42 = vcombine.low %v4016_v43, %v4020_v47  ;;  %v4033_v44 = vld [vmem:[#allocation6 + $0x9c8] sm:$0xff]  ;;  %v4040_v19 = vld [vmem:[#allocation6 + $0xa00] sm:$0xff] }
 0x35c   :  { %6709 = vmatpush1.bf16.msra.mxu1 %v8291_v28  ;;  %6740 = vmatprep.mubr.bf16.mxu1 %v10195_v10  ;;  %v8331_v46 = vcombine.low %v4017_v26, %v4021_v57  ;;  %v8338_v9 = vcombine.high %v4024_v36, %v4028_v0  ;;  %v8340_v4 = vcombine.high %v4025_v63, %v4029_v31  ;;  %v4037_v16 = vld [vmem:[#allocation6 + $0x9e8] sm:$0xff]  ;;  %v4044_v28 = vld [vmem:[#allocation6 + $0xa20] sm:$0xff] }
 0x35d   :  { %6710 = vmatprep.subr.bf16.mxu1 %v8300_v18  ;;  %6539 = vmatpush1.bf16.msra.mxu0 %v8297_v37  ;;  %v8337_v8 = vcombine.low %v4024_v36, %v4028_v0  ;;  %v8339_v55 = vcombine.low %v4025_v63, %v4029_v31  ;;  %v8346_v14 = vcombine.high %v4032_v6, %v4036_v53  ;;  %v4041_v23 = vld [vmem:[#allocation6 + $0xa08] sm:$0xff]  ;;  %v4048_v37 = vld [vmem:[#allocation6 + $0xa40] sm:$0xff] }
 0x35e   :  { %6540 = vmatprep.subr.bf16.mxu0 %v8306_v45  ;;  %v8348_v13 = vcombine.high %v4033_v44, %v4037_v16  ;;  %v4045_v35 = vld [vmem:[#allocation6 + $0xa28] sm:$0xff]  ;;  %v8345_v21 = vcombine.low %v4032_v6, %v4036_v53  ;;  %v8347_v18 = vcombine.low %v4033_v44, %v4037_v16  ;;  %v8354_v29 = vcombine.high %v4040_v19, %v4044_v28 }
 0x35f   :  { %v8356_v33 = vcombine.high %v4041_v23, %v4045_v35  ;;  %v4049_v45 = vld [vmem:[#allocation6 + $0xa48] sm:$0xff]  ;;  %v8353_v32 = vcombine.low %v4040_v19, %v4044_v28  ;;  %v8355_v20 = vcombine.low %v4041_v23, %v4045_v35 }
 0x360   :  { %6711 = vmatpush1.bf16.msra.mxu1 %v8299_v62  ;;  %v4052_v62 = vld [vmem:[#allocation6 + $0xa60] sm:$0xff] }
 0x361   :  { %6712 = vmatprep.subr.bf16.mxu1 %v8308_v50  ;;  %6541 = vmatpush1.bf16.msra.mxu0 %v8305_v48  ;;  %v4053_v50 = vld [vmem:[#allocation6 + $0xa68] sm:$0xff]  ;;  %v8362_v51 = vcombine.high %v4048_v37, %v4052_v62  ;;  %v4056_v48 = vld [vmem:[#allocation6 + $0xa80] sm:$0xff]  ;;  %v8361_v56 = vcombine.low %v4048_v37, %v4052_v62 }
 0x362   :  { %6542 = vmatprep.subr.bf16.mxu0 %v8314_v25  ;;  %v8364_v39 = vcombine.high %v4049_v45, %v4053_v50  ;;  %v4057_v25 = vld [vmem:[#allocation6 + $0xa88] sm:$0xff]  ;;  %v8363_v60 = vcombine.low %v4049_v45, %v4053_v50 }
 0x364   :  { %6713 = vmatpush1.bf16.msra.mxu1 %v8307_v5  ;;  %v4060_v5 = vld [vmem:[#allocation6 + $0xaa0] sm:$0xff] }
 0x365   :  { %6714 = vmatprep.subr.bf16.mxu1 %v8316_v52  ;;  %6543 = vmatpush1.bf16.msra.mxu0 %v8313_v54  ;;  %v4061_v52 = vld [vmem:[#allocation6 + $0xaa8] sm:$0xff]  ;;  %v8370_v22 = vcombine.high %v4056_v48, %v4060_v5  ;;  %v4064_v54 = vld [vmem:[#allocation6 + $0xac0] sm:$0xff]  ;;  %v8369_v43 = vcombine.low %v4056_v48, %v4060_v5 }
 0x366   :  { %6544 = vmatprep.subr.bf16.mxu0 %v8322_v59  ;;  %v8372_v34 = vcombine.high %v4057_v25, %v4061_v52  ;;  %v4065_v59 = vld [vmem:[#allocation6 + $0xac8] sm:$0xff]  ;;  %v8371_v47 = vcombine.low %v4057_v25, %v4061_v52 }
 0x368   :  { %6715 = vmatpush1.bf16.msra.mxu1 %v8315_v11  ;;  %v4068_v11 = vld [vmem:[#allocation6 + $0xae0] sm:$0xff] }
 0x369   :  { %6716 = vmatprep.subr.bf16.mxu1 %v8324_v24  ;;  %6545 = vmatpush1.bf16.msra.mxu0 %v8321_v41  ;;  %v4069_v24 = vld [vmem:[#allocation6 + $0xae8] sm:$0xff]  ;;  %v8378_v26 = vcombine.high %v4064_v54, %v4068_v11  ;;  %v4072_v41 = vld [vmem:[#allocation6 + $0xb00] sm:$0xff]  ;;  %v8377_v36 = vcombine.low %v4064_v54, %v4068_v11 }
 0x36a   :  { %6546 = vmatprep.subr.bf16.mxu0 %v8330_v40  ;;  %v8380_v57 = vcombine.high %v4065_v59, %v4069_v24  ;;  %v4073_v40 = vld [vmem:[#allocation6 + $0xb08] sm:$0xff]  ;;  %v8379_v0 = vcombine.low %v4065_v59, %v4069_v24 }
 0x36c   :  { %6717 = vmatpush1.bf16.msra.mxu1 %v8323_v49  ;;  %v4076_v49 = vld [vmem:[#allocation6 + $0xb20] sm:$0xff] }
 0x36d   :  { %6718 = vmatprep.subr.bf16.mxu1 %v8332_v3  ;;  %6547 = vmatpush1.bf16.msra.mxu0 %v8329_v42  ;;  %v4077_v3 = vld [vmem:[#allocation6 + $0xb28] sm:$0xff]  ;;  %v8386_v63 = vcombine.high %v4072_v41, %v4076_v49  ;;  %v4080_v42 = vld [vmem:[#allocation6 + $0xb40] sm:$0xff]  ;;  %v8385_v6 = vcombine.low %v4072_v41, %v4076_v49 }
 0x36e   :  { %6548 = vmatprep.subr.bf16.mxu0 %v8338_v9  ;;  %v8388_v31 = vcombine.high %v4073_v40, %v4077_v3  ;;  %v4081_v9 = vld [vmem:[#allocation6 + $0xb48] sm:$0xff]  ;;  %v8387_v53 = vcombine.low %v4073_v40, %v4077_v3 }
 0x370   :  { %6719 = vmatpush1.bf16.msra.mxu1 %v8331_v46  ;;  %v4084_v46 = vld [vmem:[#allocation6 + $0xb60] sm:$0xff] }
 0x371   :  { %6720 = vmatprep.subr.bf16.mxu1 %v8340_v4  ;;  %6549 = vmatpush1.bf16.msra.mxu0 %v8337_v8  ;;  %v4085_v4 = vld [vmem:[#allocation6 + $0xb68] sm:$0xff]  ;;  %v8394_v44 = vcombine.high %v4080_v42, %v4084_v46  ;;  %v4088_v8 = vld [vmem:[#allocation6 + $0xb80] sm:$0xff]  ;;  %v8393_v19 = vcombine.low %v4080_v42, %v4084_v46 }
 0x372   :  { %6550 = vmatprep.subr.bf16.mxu0 %v8346_v14  ;;  %v8396_v16 = vcombine.high %v4081_v9, %v4085_v4  ;;  %v4089_v14 = vld [vmem:[#allocation6 + $0xb88] sm:$0xff]  ;;  %v8395_v28 = vcombine.low %v4081_v9, %v4085_v4 }
 0x373   :  { %v4133_v42 = vld [vmem:[#allocation6 + $0xce8] sm:$0xff] }
 0x374   :  { %6721 = vmatpush1.bf16.msra.mxu1 %v8339_v55  ;;  %v4092_v55 = vld [vmem:[#allocation6 + $0xba0] sm:$0xff] }
 0x375   :  { %6722 = vmatprep.subr.bf16.mxu1 %v8348_v13  ;;  %6551 = vmatpush1.bf16.msra.mxu0 %v8345_v21  ;;  %v4093_v13 = vld [vmem:[#allocation6 + $0xba8] sm:$0xff]  ;;  %v8402_v23 = vcombine.high %v4088_v8, %v4092_v55  ;;  %v4096_v21 = vld [vmem:[#allocation6 + $0xbc0] sm:$0xff]  ;;  %v8401_v37 = vcombine.low %v4088_v8, %v4092_v55 }
 0x376   :  { %6552 = vmatprep.subr.bf16.mxu0 %v8354_v29  ;;  %v8404_v35 = vcombine.high %v4089_v14, %v4093_v13  ;;  %v4097_v29 = vld [vmem:[#allocation6 + $0xbc8] sm:$0xff]  ;;  %v8403_v62 = vcombine.low %v4089_v14, %v4093_v13 }
 0x377   :  { %v4141_v8 = vld [vmem:[#allocation6 + $0xd28] sm:$0xff] }
 0x378   :  { %6723 = vmatpush1.bf16.msra.mxu1 %v8347_v18  ;;  %v4100_v18 = vld [vmem:[#allocation6 + $0xbe0] sm:$0xff] }
 0x379   :  { %6724 = vmatprep.subr.bf16.mxu1 %v8356_v33  ;;  %6553 = vmatpush1.bf16.msra.mxu0 %v8353_v32  ;;  %v4101_v33 = vld [vmem:[#allocation6 + $0xbe8] sm:$0xff]  ;;  %v8410_v45 = vcombine.high %v4096_v21, %v4100_v18  ;;  %v4104_v32 = vld [vmem:[#allocation6 + $0xc00] sm:$0xff]  ;;  %v8409_v48 = vcombine.low %v4096_v21, %v4100_v18 }
 0x37a   :  { %6554 = vmatprep.subr.bf16.mxu0 %v8362_v51  ;;  %v8412_v50 = vcombine.high %v4097_v29, %v4101_v33  ;;  %v4105_v51 = vld [vmem:[#allocation6 + $0xc08] sm:$0xff]  ;;  %v8411_v5 = vcombine.low %v4097_v29, %v4101_v33 }
 0x37b   :  { %v4149_v21 = vld [vmem:[#allocation6 + $0xd68] sm:$0xff] }
 0x37c   :  { %6725 = vmatpush1.bf16.msra.mxu1 %v8355_v20  ;;  %v4108_v20 = vld [vmem:[#allocation6 + $0xc20] sm:$0xff] }
 0x37d   :  { %6726 = vmatprep.subr.bf16.mxu1 %v8364_v39  ;;  %6555 = vmatpush1.bf16.msra.mxu0 %v8361_v56  ;;  %v4109_v39 = vld [vmem:[#allocation6 + $0xc28] sm:$0xff]  ;;  %v8418_v25 = vcombine.high %v4104_v32, %v4108_v20  ;;  %v4112_v56 = vld [vmem:[#allocation6 + $0xc40] sm:$0xff]  ;;  %v8417_v54 = vcombine.low %v4104_v32, %v4108_v20 }
 0x37e   :  { %6556 = vmatprep.subr.bf16.mxu0 %v8370_v22  ;;  %v8420_v52 = vcombine.high %v4105_v51, %v4109_v39  ;;  %v4113_v22 = vld [vmem:[#allocation6 + $0xc48] sm:$0xff]  ;;  %v8419_v11 = vcombine.low %v4105_v51, %v4109_v39 }
 0x37f   :  { %v4157_v32 = vld [vmem:[#allocation6 + $0xda8] sm:$0xff] }
 0x380   :  { %6727 = vmatpush1.bf16.msra.mxu1 %v8363_v60  ;;  %v4116_v60 = vld [vmem:[#allocation6 + $0xc60] sm:$0xff] }
 0x381   :  { %6728 = vmatprep.subr.bf16.mxu1 %v8372_v34  ;;  %6557 = vmatpush1.bf16.msra.mxu0 %v8369_v43  ;;  %v4117_v34 = vld [vmem:[#allocation6 + $0xc68] sm:$0xff]  ;;  %v8426_v59 = vcombine.high %v4112_v56, %v4116_v60  ;;  %v4120_v43 = vld [vmem:[#allocation6 + $0xc80] sm:$0xff]  ;;  %v8425_v41 = vcombine.low %v4112_v56, %v4116_v60 }
 0x382   :  { %6558 = vmatprep.subr.bf16.mxu0 %v8378_v26  ;;  %v8428_v24 = vcombine.high %v4113_v22, %v4117_v34  ;;  %v4121_v26 = vld [vmem:[#allocation6 + $0xc88] sm:$0xff]  ;;  %v8427_v49 = vcombine.low %v4113_v22, %v4117_v34 }
 0x383   :  { %v4165_v56 = vld [vmem:[#allocation6 + $0xde8] sm:$0xff] }
 0x384   :  { %6729 = vmatpush1.bf16.msra.mxu1 %v8371_v47  ;;  %v4124_v47 = vld [vmem:[#allocation6 + $0xca0] sm:$0xff] }
 0x385   :  { %6730 = vmatprep.subr.bf16.mxu1 %v8380_v57  ;;  %6559 = vmatpush1.bf16.msra.mxu0 %v8377_v36  ;;  %v4125_v57 = vld [vmem:[#allocation6 + $0xca8] sm:$0xff]  ;;  %v8434_v40 = vcombine.high %v4120_v43, %v4124_v47  ;;  %v4128_v36 = vld [vmem:[#allocation6 + $0xcc0] sm:$0xff]  ;;  %v8433_v46 = vcombine.low %v4120_v43, %v4124_v47  ;;  %v3727_v43 = vld [vmem:[#allocation6 + $0x38] sm:$0xff] }
 0x386   :  { %6560 = vmatprep.subr.bf16.mxu0 %v8386_v63  ;;  %v8436_v3 = vcombine.high %v4121_v26, %v4125_v57  ;;  %v9638_v63 = vmov 0   ;;  %v8435_v9 = vcombine.low %v4121_v26, %v4125_v57 }
 0x388   :  { %6731 = vmatpush1.bf16.msra.mxu1 %v8379_v0  ;;  %v4132_v0 = vld [vmem:[#allocation6 + $0xce0] sm:$0xff] }
 0x389   :  { %6732 = vmatprep.subr.bf16.mxu1 %v8388_v31  ;;  %6561 = vmatpush1.bf16.msra.mxu0 %v8385_v6  ;;  %v4129_v31 = vld [vmem:[#allocation6 + $0xcc8] sm:$0xff]  ;;  %v8442_v4 = vcombine.high %v4128_v36, %v4132_v0  ;;  %v8441_v55 = vcombine.low %v4128_v36, %v4132_v0  ;;  %v3731_v36 = vld [vmem:[#allocation6 + $0x58] sm:$0xff] }
 0x38a   :  { %6562 = vmatprep.subr.bf16.mxu0 %v8394_v44  ;;  %v8444_v6 = vcombine.high %v4129_v31, %v4133_v42  ;;  %v4140_v44 = vld [vmem:[#allocation6 + $0xd20] sm:$0xff]  ;;  %v8443_v14 = vcombine.low %v4129_v31, %v4133_v42  ;;  %v3735_v0 = vld [vmem:[#allocation6 + $0x78] sm:$0xff] }
 0x38c   :  { %6733 = vmatpush1.bf16.msra.mxu1 %v8387_v53  ;;  %v4136_v53 = vld [vmem:[#allocation6 + $0xd00] sm:$0xff] }
 0x38d   :  { %6734 = vmatprep.subr.bf16.mxu1 %v8396_v16  ;;  %6563 = vmatpush1.bf16.msra.mxu0 %v8393_v19  ;;  %v4137_v16 = vld [vmem:[#allocation6 + $0xd08] sm:$0xff]  ;;  %v8450_v13 = vcombine.high %v4136_v53, %v4140_v44  ;;  %v8449_v18 = vcombine.low %v4136_v53, %v4140_v44  ;;  %v3743_v53 = vld [vmem:[#allocation6 + $0xb8] sm:$0xff] }
 0x38e   :  { %6564 = vmatprep.subr.bf16.mxu0 %v8402_v23  ;;  %v8452_v19 = vcombine.high %v4137_v16, %v4141_v8  ;;  %v4148_v23 = vld [vmem:[#allocation6 + $0xd60] sm:$0xff]  ;;  %v8451_v29 = vcombine.low %v4137_v16, %v4141_v8  ;;  %v8047_v16 = vcombine.low %v3731_v36, %v3735_v0 }
 0x390   :  { %6735 = vmatpush1.bf16.msra.mxu1 %v8395_v28  ;;  %v4144_v28 = vld [vmem:[#allocation6 + $0xd40] sm:$0xff] }
 0x391   :  { %6736 = vmatprep.subr.bf16.mxu1 %v8404_v35  ;;  %6565 = vmatpush1.bf16.msra.mxu0 %v8401_v37  ;;  %v4145_v35 = vld [vmem:[#allocation6 + $0xd48] sm:$0xff]  ;;  %v8458_v33 = vcombine.high %v4144_v28, %v4148_v23  ;;  %v8457_v20 = vcombine.low %v4144_v28, %v4148_v23  ;;  %v3751_v28 = vld [vmem:[#allocation6 + $0xf8] sm:$0xff] }
 0x392   :  { %6566 = vmatprep.subr.bf16.mxu0 %v8410_v45  ;;  %v8460_v37 = vcombine.high %v4145_v35, %v4149_v21  ;;  %v4156_v45 = vld [vmem:[#allocation6 + $0xda0] sm:$0xff]  ;;  %v8459_v51 = vcombine.low %v4145_v35, %v4149_v21 }
 0x394   :  { %6737 = vmatpush1.bf16.msra.mxu1 %v8403_v62  ;;  %v4152_v62 = vld [vmem:[#allocation6 + $0xd80] sm:$0xff] }
 0x395   :  { %6738 = vmatprep.subr.bf16.mxu1 %v8412_v50  ;;  %6567 = vmatpush1.bf16.msra.mxu0 %v8409_v48  ;;  %v4153_v50 = vld [vmem:[#allocation6 + $0xd88] sm:$0xff]  ;;  %v8466_v39 = vcombine.high %v4152_v62, %v4156_v45  ;;  %v8465_v60 = vcombine.low %v4152_v62, %v4156_v45  ;;  %v3759_v62 = vld [vmem:[#allocation6 + $0x138] sm:$0xff] }
 0x396   :  { %6579 = vmatprep.subr.bf16.mxu0 %v8418_v25  ;;  %v8468_v48 = vcombine.high %v4153_v50, %v4157_v32  ;;  %v4164_v25 = vld [vmem:[#allocation6 + $0xde0] sm:$0xff]  ;;  %v8467_v22 = vcombine.low %v4153_v50, %v4157_v32 }
 0x398   :  { %6739 = vmatpush1.bf16.msra.mxu1 %v8411_v5  ;;  %6569 = vmatmul.mubr.bf16.vlgmr.msra.gmra.mrb[28].mxu0 %v10199_v17  ;;  %v4160_v5 = vld [vmem:[#allocation6 + $0xdc0] sm:$0xff] }
 0x399   :  { %6751 = vmatprep.subr.bf16.mxu1 %v8420_v52  ;;  %6580 = vmatpush1.bf16.msra.mxu0 %v8417_v54  ;;  %v4161_v52 = vld [vmem:[#allocation6 + $0xdc8] sm:$0xff]  ;;  %v8474_v34 = vcombine.high %v4160_v5, %v4164_v25  ;;  %v8473_v47 = vcombine.low %v4160_v5, %v4164_v25 }
 0x39a   :  { %6581 = vmatprep.subr.bf16.mxu0 %v8426_v59  ;;  %6611 = vmatprep.mubr.bf16.mxu0 %v9638_v63  ;;  %v8476_v54 = vcombine.high %v4161_v52, %v4165_v56  ;;  %v3726_v59 = vld [vmem:[#allocation6 + $0x30] sm:$0xff]  ;;  %v8475_v26 = vcombine.low %v4161_v52, %v4165_v56 }
 0x39b   :  { %6741 = vmatmul.mubr.bf16.vlgmr.msra.gmra.mrb[28].mxu1 %v10199_v17 }
 0x39c   :  { %6752 = vmatpush1.bf16.msra.mxu1 %v8419_v11  ;;  %6783 = vmatprep.mubr.bf16.mxu1 %v9638_v63  ;;  %v3722_v11 = vld [vmem:[#allocation6 + $0x10] sm:$0xff] }
 0x39d   :  { %6753 = vmatprep.subr.bf16.mxu1 %v8428_v24  ;;  %6582 = vmatpush1.bf16.msra.mxu0 %v8425_v41  ;;  %v3723_v24 = vld [vmem:[#allocation6 + $0x18] sm:$0xff]  ;;  %v8038_v57 = vcombine.high %v3722_v11, %v3726_v59 }
 0x39e   :  { %6583 = vmatprep.subr.bf16.mxu0 %v8434_v40  ;;  %v8040_v41 = vcombine.high %v3723_v24, %v3727_v43  ;;  %v3734_v40 = vld [vmem:[#allocation6 + $0x70] sm:$0xff]  ;;  %v8039_v31 = vcombine.low %v3723_v24, %v3727_v43 }
 0x3a0   :  { %6754 = vmatpush1.bf16.msra.mxu1 %v8427_v49  ;;  %v3730_v49 = vld [vmem:[#allocation6 + $0x50] sm:$0xff] }
 0x3a1   :  { %6755 = vmatprep.subr.bf16.mxu1 %v8436_v3  ;;  %6584 = vmatpush1.bf16.msra.mxu0 %v8433_v46  ;;  %v8037_v3 = vcombine.low %v3722_v11, %v3726_v59  ;;  %v8046_v42 = vcombine.high %v3730_v49, %v3734_v40  ;;  %v3738_v46 = vld [vmem:[#allocation6 + $0x90] sm:$0xff]  ;;  %v8045_v44 = vcombine.low %v3730_v49, %v3734_v40 }
 0x3a2   :  { %6585 = vmatprep.subr.bf16.mxu0 %v8442_v4  ;;  %v8048_v4 = vcombine.high %v3731_v36, %v3735_v0  ;;  %v3786_v0 = vld [vmem:[#allocation6 + $0x210] sm:$0xff] }
 0x3a4   :  { %6756 = vmatpush1.bf16.msra.mxu1 %v8435_v9  ;;  %v3742_v9 = vld [vmem:[#allocation6 + $0xb0] sm:$0xff] }
 0x3a5   :  { %6757 = vmatprep.subr.bf16.mxu1 %v8444_v6  ;;  %6586 = vmatpush1.bf16.msra.mxu0 %v8441_v55  ;;  %v3739_v6 = vld [vmem:[#allocation6 + $0x98] sm:$0xff]  ;;  %v8054_v8 = vcombine.high %v3738_v46, %v3742_v9  ;;  %v8053_v23 = vcombine.low %v3738_v46, %v3742_v9 }
 0x3a6   :  { %6587 = vmatprep.subr.bf16.mxu0 %v8450_v13  ;;  %v8056_v55 = vcombine.high %v3739_v6, %v3743_v53  ;;  %v3750_v13 = vld [vmem:[#allocation6 + $0xf0] sm:$0xff]  ;;  %v8055_v35 = vcombine.low %v3739_v6, %v3743_v53  ;;  %v3791_v46 = vld [vmem:[#allocation6 + $0x238] sm:$0xff] }
 0x3a8   :  { %6758 = vmatpush1.bf16.msra.mxu1 %v8443_v14  ;;  %v3746_v14 = vld [vmem:[#allocation6 + $0xd0] sm:$0xff] }
 0x3a9   :  { %6759 = vmatprep.subr.bf16.mxu1 %v8452_v19  ;;  %6588 = vmatpush1.bf16.msra.mxu0 %v8449_v18  ;;  %v3747_v19 = vld [vmem:[#allocation6 + $0xd8] sm:$0xff]  ;;  %v8062_v21 = vcombine.high %v3746_v14, %v3750_v13 }
 0x3aa   :  { %6589 = vmatprep.subr.bf16.mxu0 %v8458_v33  ;;  %v8064_v18 = vcombine.high %v3747_v19, %v3751_v28  ;;  %v3758_v33 = vld [vmem:[#allocation6 + $0x130] sm:$0xff]  ;;  %v8063_v45 = vcombine.low %v3747_v19, %v3751_v28 }
 0x3ac   :  { %6760 = vmatpush1.bf16.msra.mxu1 %v8451_v29  ;;  %v3754_v29 = vld [vmem:[#allocation6 + $0x110] sm:$0xff] }
 0x3ad   :  { %6761 = vmatprep.subr.bf16.mxu1 %v8460_v37  ;;  %6590 = vmatpush1.bf16.msra.mxu0 %v8457_v20  ;;  %v3755_v37 = vld [vmem:[#allocation6 + $0x118] sm:$0xff]  ;;  %v8070_v50 = vcombine.high %v3754_v29, %v3758_v33  ;;  %v3762_v20 = vld [vmem:[#allocation6 + $0x150] sm:$0xff]  ;;  %v8069_v5 = vcombine.low %v3754_v29, %v3758_v33 }
 0x3ae   :  { %6591 = vmatprep.subr.bf16.mxu0 %v8466_v39  ;;  %v8072_v32 = vcombine.high %v3755_v37, %v3759_v62  ;;  %v3763_v39 = vld [vmem:[#allocation6 + $0x158] sm:$0xff]  ;;  %v8071_v25 = vcombine.low %v3755_v37, %v3759_v62 }
 0x3b0   :  { %6762 = vmatpush1.bf16.msra.mxu1 %v8459_v51  ;;  %v3766_v51 = vld [vmem:[#allocation6 + $0x170] sm:$0xff] }
 0x3b1   :  { %6763 = vmatprep.subr.bf16.mxu1 %v8468_v48  ;;  %6592 = vmatpush1.bf16.msra.mxu0 %v8465_v60  ;;  %v3767_v48 = vld [vmem:[#allocation6 + $0x178] sm:$0xff]  ;;  %v8078_v52 = vcombine.high %v3762_v20, %v3766_v51  ;;  %v3770_v60 = vld [vmem:[#allocation6 + $0x190] sm:$0xff]  ;;  %v8077_v11 = vcombine.low %v3762_v20, %v3766_v51 }
 0x3b2   :  { %6593 = vmatprep.subr.bf16.mxu0 %v8474_v34  ;;  %v8080_v56 = vcombine.high %v3763_v39, %v3767_v48  ;;  %v3771_v34 = vld [vmem:[#allocation6 + $0x198] sm:$0xff]  ;;  %v8079_v59 = vcombine.low %v3763_v39, %v3767_v48 }
 0x3b4   :  { %6764 = vmatpush1.bf16.msra.mxu1 %v8467_v22  ;;  %v3774_v22 = vld [vmem:[#allocation6 + $0x1b0] sm:$0xff] }
 0x3b5   :  { %6765 = vmatprep.subr.bf16.mxu1 %v8476_v54  ;;  %6594 = vmatpush1.bf16.msra.mxu0 %v8473_v47  ;;  %v3775_v54 = vld [vmem:[#allocation6 + $0x1b8] sm:$0xff]  ;;  %v8086_v24 = vcombine.high %v3770_v60, %v3774_v22  ;;  %v3778_v47 = vld [vmem:[#allocation6 + $0x1d0] sm:$0xff]  ;;  %v8085_v49 = vcombine.low %v3770_v60, %v3774_v22 }
 0x3b6   :  { %6794 = vmatprep.subr.bf16.mxu0 %v8038_v57  ;;  %v8088_v43 = vcombine.high %v3771_v34, %v3775_v54  ;;  %v3779_v57 = vld [vmem:[#allocation6 + $0x1d8] sm:$0xff]  ;;  %v8087_v40 = vcombine.low %v3771_v34, %v3775_v54 }
 0x3b8   :  { %6766 = vmatpush1.bf16.msra.mxu1 %v8475_v26  ;;  %6612 = vmatmul.mubr.bf16.vlgmr.msra.gmra.mrb[28].mxu0 %v10201_v7  ;;  %v3782_v26 = vld [vmem:[#allocation6 + $0x1f0] sm:$0xff] }
 0x3b9   :  { %6966 = vmatprep.subr.bf16.mxu1 %v8040_v41  ;;  %6795 = vmatpush1.bf16.msra.mxu0 %v8037_v3  ;;  %v3783_v41 = vld [vmem:[#allocation6 + $0x1f8] sm:$0xff]  ;;  %v8094_v3 = vcombine.high %v3778_v47, %v3782_v26  ;;  %v8093_v9 = vcombine.low %v3778_v47, %v3782_v26 }
 0x3ba   :  { %6826 = vmatprep.mubr.bf16.mxu0 %v10072_v61  ;;  %6796 = vmatprep.subr.bf16.mxu0 %v8046_v42  ;;  %v8096_v36 = vcombine.high %v3779_v57, %v3783_v41  ;;  %v3787_v42 = vld [vmem:[#allocation6 + $0x218] sm:$0xff] }
 0x3bb   :  { %6784 = vmatmul.mubr.bf16.vlgmr.msra.gmra.mrb[28].mxu1 %v10201_v7  ;;  %v8104_v53 = vcombine.high %v3787_v42, %v3791_v46 }
 0x3bc   :  { %6967 = vmatpush1.bf16.msra.mxu1 %v8039_v31  ;;  %6998 = vmatprep.mubr.bf16.mxu1 %v10072_v61  ;;  %v8061_v61 = vcombine.low %v3746_v14, %v3750_v13  ;;  %v3790_v31 = vld [vmem:[#allocation6 + $0x230] sm:$0xff]  ;;  %v8103_v13 = vcombine.low %v3787_v42, %v3791_v46 }
 0x3bd   :  { %6968 = vmatprep.subr.bf16.mxu1 %v8048_v4  ;;  %6797 = vmatpush1.bf16.msra.mxu0 %v8045_v44  ;;  %v8095_v4 = vcombine.low %v3779_v57, %v3783_v41  ;;  %v8102_v6 = vcombine.high %v3786_v0, %v3790_v31  ;;  %v3794_v44 = vld [vmem:[#allocation6 + $0x250] sm:$0xff]  ;;  %v8101_v14 = vcombine.low %v3786_v0, %v3790_v31 }
 0x3be   :  { %6798 = vmatprep.subr.bf16.mxu0 %v8054_v8  ;;  %v3795_v8 = vld [vmem:[#allocation6 + $0x258] sm:$0xff] }
 0x3c0   :  { %6969 = vmatpush1.bf16.msra.mxu1 %v8047_v16  ;;  %v3798_v16 = vld [vmem:[#allocation6 + $0x270] sm:$0xff] }
 0x3c1   :  { %6970 = vmatprep.subr.bf16.mxu1 %v8056_v55  ;;  %6799 = vmatpush1.bf16.msra.mxu0 %v8053_v23  ;;  %v3799_v55 = vld [vmem:[#allocation6 + $0x278] sm:$0xff]  ;;  %v8110_v19 = vcombine.high %v3794_v44, %v3798_v16  ;;  %v3802_v23 = vld [vmem:[#allocation6 + $0x290] sm:$0xff]  ;;  %v8109_v29 = vcombine.low %v3794_v44, %v3798_v16 }
 0x3c2   :  { %6800 = vmatprep.subr.bf16.mxu0 %v8062_v21  ;;  %v8112_v28 = vcombine.high %v3795_v8, %v3799_v55  ;;  %v3803_v21 = vld [vmem:[#allocation6 + $0x298] sm:$0xff]  ;;  %v8111_v33 = vcombine.low %v3795_v8, %v3799_v55 }
 0x3c4   :  { %6971 = vmatpush1.bf16.msra.mxu1 %v8055_v35  ;;  %v3806_v35 = vld [vmem:[#allocation6 + $0x2b0] sm:$0xff] }
 0x3c5   :  { %6972 = vmatprep.subr.bf16.mxu1 %v8064_v18  ;;  %6801 = vmatpush1.bf16.msra.mxu0 %v8061_v61  ;;  %v3807_v18 = vld [vmem:[#allocation6 + $0x2b8] sm:$0xff]  ;;  %v8118_v37 = vcombine.high %v3802_v23, %v3806_v35  ;;  %v3810_v61 = vld [vmem:[#allocation6 + $0x2d0] sm:$0xff]  ;;  %v8117_v20 = vcombine.low %v3802_v23, %v3806_v35 }
 0x3c6   :  { %6802 = vmatprep.subr.bf16.mxu0 %v8070_v50  ;;  %v8120_v62 = vcombine.high %v3803_v21, %v3807_v18  ;;  %v3811_v50 = vld [vmem:[#allocation6 + $0x2d8] sm:$0xff]  ;;  %v8119_v51 = vcombine.low %v3803_v21, %v3807_v18 }
 0x3c8   :  { %6973 = vmatpush1.bf16.msra.mxu1 %v8063_v45  ;;  %v3814_v45 = vld [vmem:[#allocation6 + $0x2f0] sm:$0xff] }
 0x3c9   :  { %6974 = vmatprep.subr.bf16.mxu1 %v8072_v32  ;;  %6803 = vmatpush1.bf16.msra.mxu0 %v8069_v5  ;;  %v3815_v32 = vld [vmem:[#allocation6 + $0x2f8] sm:$0xff]  ;;  %v8126_v39 = vcombine.high %v3810_v61, %v3814_v45  ;;  %v3818_v5 = vld [vmem:[#allocation6 + $0x310] sm:$0xff]  ;;  %v8125_v60 = vcombine.low %v3810_v61, %v3814_v45 }
 0x3ca   :  { %6804 = vmatprep.subr.bf16.mxu0 %v8078_v52  ;;  %v8128_v48 = vcombine.high %v3811_v50, %v3815_v32  ;;  %v3819_v52 = vld [vmem:[#allocation6 + $0x318] sm:$0xff]  ;;  %v8127_v22 = vcombine.low %v3811_v50, %v3815_v32  ;;  %v3866_v32 = vld [vmem:[#allocation6 + $0x490] sm:$0xff] }
 0x3cb   :  { %v3863_v61 = vld [vmem:[#allocation6 + $0x478] sm:$0xff] }
 0x3cc   :  { %6975 = vmatpush1.bf16.msra.mxu1 %v8071_v25  ;;  %v3822_v25 = vld [vmem:[#allocation6 + $0x330] sm:$0xff] }
 0x3cd   :  { %6976 = vmatprep.subr.bf16.mxu1 %v8080_v56  ;;  %6805 = vmatpush1.bf16.msra.mxu0 %v8077_v11  ;;  %v3823_v56 = vld [vmem:[#allocation6 + $0x338] sm:$0xff]  ;;  %v8134_v34 = vcombine.high %v3818_v5, %v3822_v25  ;;  %v3826_v11 = vld [vmem:[#allocation6 + $0x350] sm:$0xff]  ;;  %v8133_v47 = vcombine.low %v3818_v5, %v3822_v25 }
 0x3ce   :  { %6806 = vmatprep.subr.bf16.mxu0 %v8086_v24  ;;  %v8136_v54 = vcombine.high %v3819_v52, %v3823_v56  ;;  %v3827_v24 = vld [vmem:[#allocation6 + $0x358] sm:$0xff]  ;;  %v8135_v26 = vcombine.low %v3819_v52, %v3823_v56 }
 0x3d0   :  { %6977 = vmatpush1.bf16.msra.mxu1 %v8079_v59  ;;  %v3830_v59 = vld [vmem:[#allocation6 + $0x370] sm:$0xff] }
 0x3d1   :  { %6978 = vmatprep.subr.bf16.mxu1 %v8088_v43  ;;  %6807 = vmatpush1.bf16.msra.mxu0 %v8085_v49  ;;  %v3831_v43 = vld [vmem:[#allocation6 + $0x378] sm:$0xff]  ;;  %v8142_v57 = vcombine.high %v3826_v11, %v3830_v59  ;;  %v3834_v49 = vld [vmem:[#allocation6 + $0x390] sm:$0xff]  ;;  %v8141_v0 = vcombine.low %v3826_v11, %v3830_v59 }
 0x3d2   :  { %6808 = vmatprep.subr.bf16.mxu0 %v8094_v3  ;;  %v8144_v41 = vcombine.high %v3827_v24, %v3831_v43  ;;  %v3835_v3 = vld [vmem:[#allocation6 + $0x398] sm:$0xff]  ;;  %v8143_v31 = vcombine.low %v3827_v24, %v3831_v43  ;;  %v3882_v43 = vld [vmem:[#allocation6 + $0x510] sm:$0xff] }
 0x3d4   :  { %6979 = vmatpush1.bf16.msra.mxu1 %v8087_v40  ;;  %v3838_v40 = vld [vmem:[#allocation6 + $0x3b0] sm:$0xff] }
 0x3d5   :  { %6980 = vmatprep.subr.bf16.mxu1 %v8096_v36  ;;  %6809 = vmatpush1.bf16.msra.mxu0 %v8093_v9  ;;  %v3839_v36 = vld [vmem:[#allocation6 + $0x3b8] sm:$0xff]  ;;  %v8150_v42 = vcombine.high %v3834_v49, %v3838_v40  ;;  %v3842_v9 = vld [vmem:[#allocation6 + $0x3d0] sm:$0xff]  ;;  %v8149_v44 = vcombine.low %v3834_v49, %v3838_v40 }
 0x3d6   :  { %6810 = vmatprep.subr.bf16.mxu0 %v8102_v6  ;;  %v8152_v46 = vcombine.high %v3835_v3, %v3839_v36  ;;  %v3843_v6 = vld [vmem:[#allocation6 + $0x3d8] sm:$0xff]  ;;  %v8151_v16 = vcombine.low %v3835_v3, %v3839_v36  ;;  %v3890_v3 = vld [vmem:[#allocation6 + $0x550] sm:$0xff] }
 0x3d7   :  { %v3894_v36 = vld [vmem:[#allocation6 + $0x570] sm:$0xff] }
 0x3d8   :  { %6981 = vmatpush1.bf16.msra.mxu1 %v8095_v4  ;;  %v3846_v4 = vld [vmem:[#allocation6 + $0x3f0] sm:$0xff] }
 0x3d9   :  { %6982 = vmatprep.subr.bf16.mxu1 %v8104_v53  ;;  %6811 = vmatpush1.bf16.msra.mxu0 %v8101_v14  ;;  %v3847_v53 = vld [vmem:[#allocation6 + $0x3f8] sm:$0xff]  ;;  %v8158_v8 = vcombine.high %v3842_v9, %v3846_v4  ;;  %v3850_v14 = vld [vmem:[#allocation6 + $0x410] sm:$0xff]  ;;  %v8157_v23 = vcombine.low %v3842_v9, %v3846_v4  ;;  %v8206_v9 = vcombine.high %v3890_v3, %v3894_v36 }
 0x3da   :  { %6812 = vmatprep.subr.bf16.mxu0 %v8110_v19  ;;  %v8160_v55 = vcombine.high %v3843_v6, %v3847_v53  ;;  %v3851_v19 = vld [vmem:[#allocation6 + $0x418] sm:$0xff]  ;;  %v8159_v35 = vcombine.low %v3843_v6, %v3847_v53  ;;  %v3898_v6 = vld [vmem:[#allocation6 + $0x590] sm:$0xff] }
 0x3db   :  { %v3902_v53 = vld [vmem:[#allocation6 + $0x5b0] sm:$0xff] }
 0x3dc   :  { %6983 = vmatpush1.bf16.msra.mxu1 %v8103_v13  ;;  %v3854_v13 = vld [vmem:[#allocation6 + $0x430] sm:$0xff] }
 0x3dd   :  { %6984 = vmatprep.subr.bf16.mxu1 %v8112_v28  ;;  %6813 = vmatpush1.bf16.msra.mxu0 %v8109_v29  ;;  %v3855_v28 = vld [vmem:[#allocation6 + $0x438] sm:$0xff]  ;;  %v8166_v21 = vcombine.high %v3850_v14, %v3854_v13  ;;  %v3858_v29 = vld [vmem:[#allocation6 + $0x450] sm:$0xff] }
 0x3de   :  { %6814 = vmatprep.subr.bf16.mxu0 %v8118_v37  ;;  %v8168_v18 = vcombine.high %v3851_v19, %v3855_v28  ;;  %v8165_v37 = vcombine.low %v3850_v14, %v3854_v13  ;;  %v8167_v45 = vcombine.low %v3851_v19, %v3855_v28  ;;  %v8214_v14 = vcombine.high %v3898_v6, %v3902_v53  ;;  %v3906_v19 = vld [vmem:[#allocation6 + $0x5d0] sm:$0xff] }
 0x3df   :  { %v3910_v28 = vld [vmem:[#allocation6 + $0x5f0] sm:$0xff] }
 0x3e0   :  { %6985 = vmatpush1.bf16.msra.mxu1 %v8111_v33  ;;  %v3862_v33 = vld [vmem:[#allocation6 + $0x470] sm:$0xff] }
 0x3e1   :  { %6986 = vmatprep.subr.bf16.mxu1 %v8120_v62  ;;  %6815 = vmatpush1.bf16.msra.mxu0 %v8117_v20  ;;  %v3859_v62 = vld [vmem:[#allocation6 + $0x458] sm:$0xff]  ;;  %v8174_v50 = vcombine.high %v3858_v29, %v3862_v33  ;;  %v3870_v20 = vld [vmem:[#allocation6 + $0x4b0] sm:$0xff]  ;;  %v8173_v5 = vcombine.low %v3858_v29, %v3862_v33  ;;  %v8222_v29 = vcombine.high %v3906_v19, %v3910_v28 }
 0x3e2   :  { %6816 = vmatprep.subr.bf16.mxu0 %v8126_v39  ;;  %v3867_v39 = vld [vmem:[#allocation6 + $0x498] sm:$0xff]  ;;  %v8175_v25 = vcombine.low %v3859_v62, %v3863_v61  ;;  %v8182_v52 = vcombine.high %v3866_v32, %v3870_v20  ;;  %v8181_v11 = vcombine.low %v3866_v32, %v3870_v20 }
 0x3e4   :  { %6987 = vmatpush1.bf16.msra.mxu1 %v8119_v51  ;;  %v8176_v51 = vcombine.high %v3859_v62, %v3863_v61  ;;  %v3918_v62 = vld [vmem:[#allocation6 + $0x630] sm:$0xff]  ;;  %v3915_v61 = vld [vmem:[#allocation6 + $0x618] sm:$0xff] }
 0x3e5   :  { %6988 = vmatprep.subr.bf16.mxu1 %v8128_v48  ;;  %6817 = vmatpush1.bf16.msra.mxu0 %v8125_v60  ;;  %v3871_v48 = vld [vmem:[#allocation6 + $0x4b8] sm:$0xff]  ;;  %v3874_v60 = vld [vmem:[#allocation6 + $0x4d0] sm:$0xff] }
 0x3e6   :  { %6818 = vmatprep.subr.bf16.mxu0 %v8134_v34  ;;  %v8184_v56 = vcombine.high %v3867_v39, %v3871_v48  ;;  %v3875_v34 = vld [vmem:[#allocation6 + $0x4d8] sm:$0xff] }
 0x3e8   :  { %6989 = vmatpush1.bf16.msra.mxu1 %v8127_v22  ;;  %v3878_v22 = vld [vmem:[#allocation6 + $0x4f0] sm:$0xff] }
 0x3e9   :  { %6990 = vmatprep.subr.bf16.mxu1 %v8136_v54  ;;  %6819 = vmatpush1.bf16.msra.mxu0 %v8133_v47  ;;  %v3879_v54 = vld [vmem:[#allocation6 + $0x4f8] sm:$0xff]  ;;  %v8190_v59 = vcombine.high %v3874_v60, %v3878_v22  ;;  %v3886_v47 = vld [vmem:[#allocation6 + $0x530] sm:$0xff] }
 0x3ea   :  { %6820 = vmatprep.subr.bf16.mxu0 %v8142_v57  ;;  %v8192_v24 = vcombine.high %v3875_v34, %v3879_v54  ;;  %v3887_v57 = vld [vmem:[#allocation6 + $0x538] sm:$0xff]  ;;  %v8198_v49 = vcombine.high %v3882_v43, %v3886_v47 }
 0x3ec   :  { %6991 = vmatpush1.bf16.msra.mxu1 %v8135_v26  ;;  %v3883_v26 = vld [vmem:[#allocation6 + $0x518] sm:$0xff] }
 0x3ed   :  { %6992 = vmatprep.subr.bf16.mxu1 %v8144_v41  ;;  %6821 = vmatpush1.bf16.msra.mxu0 %v8141_v0  ;;  %v8191_v41 = vcombine.low %v3875_v34, %v3879_v54  ;;  %v8200_v40 = vcombine.high %v3883_v26, %v3887_v57  ;;  %v3891_v0 = vld [vmem:[#allocation6 + $0x558] sm:$0xff]  ;;  %v3930_v34 = vld [vmem:[#allocation6 + $0x690] sm:$0xff] }
 0x3ee   :  { %6822 = vmatprep.subr.bf16.mxu0 %v8150_v42  ;;  %v8197_v42 = vcombine.low %v3882_v43, %v3886_v47  ;;  %v3934_v54 = vld [vmem:[#allocation6 + $0x6b0] sm:$0xff] }
 0x3ef   :  { %v8246_v43 = vcombine.high %v3930_v34, %v3934_v54 }
 0x3f0   :  { %6993 = vmatpush1.bf16.msra.mxu1 %v8143_v31  ;;  %v3895_v31 = vld [vmem:[#allocation6 + $0x578] sm:$0xff] }
 0x3f1   :  { %6994 = vmatprep.subr.bf16.mxu1 %v8152_v46  ;;  %6823 = vmatpush1.bf16.msra.mxu0 %v8149_v44  ;;  %v8199_v46 = vcombine.low %v3883_v26, %v3887_v57  ;;  %v8208_v4 = vcombine.high %v3891_v0, %v3895_v31  ;;  %v3899_v44 = vld [vmem:[#allocation6 + $0x598] sm:$0xff]  ;;  %v3938_v26 = vld [vmem:[#allocation6 + $0x6d0] sm:$0xff] }
 0x3f2   :  { %6824 = vmatprep.subr.bf16.mxu0 %v8158_v8  ;;  %v8205_v8 = vcombine.low %v3890_v3, %v3894_v36  ;;  %v3942_v57 = vld [vmem:[#allocation6 + $0x6f0] sm:$0xff] }
 0x3f3   :  { %v8254_v3 = vcombine.high %v3938_v26, %v3942_v57 }
 0x3f4   :  { %6995 = vmatpush1.bf16.msra.mxu1 %v8151_v16  ;;  %v3903_v16 = vld [vmem:[#allocation6 + $0x5b8] sm:$0xff] }
 0x3f5   :  { %6996 = vmatprep.subr.bf16.mxu1 %v8160_v55  ;;  %6825 = vmatpush1.bf16.msra.mxu0 %v8157_v23  ;;  %v8207_v55 = vcombine.low %v3891_v0, %v3895_v31  ;;  %v8216_v13 = vcombine.high %v3899_v44, %v3903_v16  ;;  %v3907_v23 = vld [vmem:[#allocation6 + $0x5d8] sm:$0xff]  ;;  %v3946_v0 = vld [vmem:[#allocation6 + $0x710] sm:$0xff] }
 0x3f6   :  { %6837 = vmatprep.subr.bf16.mxu0 %v8166_v21  ;;  %v8213_v21 = vcombine.low %v3898_v6, %v3902_v53  ;;  %v3950_v31 = vld [vmem:[#allocation6 + $0x730] sm:$0xff] }
 0x3f7   :  { %v8262_v6 = vcombine.high %v3946_v0, %v3950_v31 }
 0x3f8   :  { %6997 = vmatpush1.bf16.msra.mxu1 %v8159_v35  ;;  %6827 = vmatmul.mubr.bf16.vlgmr.msra.gmra.mrb[32].mxu0 %v10074_v2  ;;  %v3911_v35 = vld [vmem:[#allocation6 + $0x5f8] sm:$0xff] }
 0x3f9   :  { %7009 = vmatprep.subr.bf16.mxu1 %v8168_v18  ;;  %6838 = vmatpush1.bf16.msra.mxu0 %v8165_v37  ;;  %v8215_v18 = vcombine.low %v3899_v44, %v3903_v16  ;;  %v8224_v33 = vcombine.high %v3907_v23, %v3911_v35  ;;  %v3914_v37 = vld [vmem:[#allocation6 + $0x610] sm:$0xff]  ;;  %v8223_v32 = vcombine.low %v3907_v23, %v3911_v35 }
 0x3fa   :  { %6869 = vmatprep.mubr.bf16.mxu0 %v10193_v38  ;;  %6839 = vmatprep.subr.bf16.mxu0 %v8174_v50  ;;  %v8221_v50 = vcombine.low %v3906_v19, %v3910_v28  ;;  %v8230_v20 = vcombine.high %v3914_v37, %v3918_v62  ;;  %v3954_v44 = vld [vmem:[#allocation6 + $0x750] sm:$0xff] }
 0x3fb   :  { %6999 = vmatmul.mubr.bf16.vlgmr.msra.gmra.mrb[32].mxu1 %v10074_v2  ;;  %v8183_v2 = vcombine.low %v3867_v39, %v3871_v48  ;;  %v3922_v39 = vld [vmem:[#allocation6 + $0x650] sm:$0xff] }
 0x3fc   :  { %7010 = vmatpush1.bf16.msra.mxu1 %v8167_v45  ;;  %7041 = vmatprep.mubr.bf16.mxu1 %v10193_v38  ;;  %v8189_v38 = vcombine.low %v3874_v60, %v3878_v22  ;;  %v3919_v45 = vld [vmem:[#allocation6 + $0x638] sm:$0xff]  ;;  %v3926_v48 = vld [vmem:[#allocation6 + $0x670] sm:$0xff] }
 0x3fd   :  { %7011 = vmatprep.subr.bf16.mxu1 %v8176_v51  ;;  %6840 = vmatpush1.bf16.msra.mxu0 %v8173_v5  ;;  %v8232_v51 = vcombine.high %v3915_v61, %v3919_v45  ;;  %v3923_v5 = vld [vmem:[#allocation6 + $0x658] sm:$0xff]  ;;  %v8238_v60 = vcombine.high %v3922_v39, %v3926_v48  ;;  %v3958_v16 = vld [vmem:[#allocation6 + $0x770] sm:$0xff] }
 0x3fe   :  { %6841 = vmatprep.subr.bf16.mxu0 %v8182_v52  ;;  %v8229_v52 = vcombine.low %v3914_v37, %v3918_v62  ;;  %v8270_v19 = vcombine.high %v3954_v44, %v3958_v16  ;;  %v3962_v23 = vld [vmem:[#allocation6 + $0x790] sm:$0xff] }
 0x3ff   :  { %v3966_v35 = vld [vmem:[#allocation6 + $0x7b0] sm:$0xff] }
 0x400   :  { %7012 = vmatpush1.bf16.msra.mxu1 %v8175_v25  ;;  %v3927_v25 = vld [vmem:[#allocation6 + $0x678] sm:$0xff]  ;;  %v8278_v37 = vcombine.high %v3962_v23, %v3966_v35 }
 0x401   :  { %7013 = vmatprep.subr.bf16.mxu1 %v8184_v56  ;;  %6842 = vmatpush1.bf16.msra.mxu0 %v8181_v11  ;;  %v8231_v56 = vcombine.low %v3915_v61, %v3919_v45  ;;  %v8240_v22 = vcombine.high %v3923_v5, %v3927_v25  ;;  %v3931_v11 = vld [vmem:[#allocation6 + $0x698] sm:$0xff]  ;;  %v3970_v61 = vld [vmem:[#allocation6 + $0x7d0] sm:$0xff] }
 0x402   :  { %6843 = vmatprep.subr.bf16.mxu0 %v8190_v59  ;;  %v8237_v59 = vcombine.low %v3922_v39, %v3926_v48  ;;  %v3974_v45 = vld [vmem:[#allocation6 + $0x7f0] sm:$0xff] }
 0x403   :  { %v8286_v39 = vcombine.high %v3970_v61, %v3974_v45 }
 0x404   :  { %7014 = vmatpush1.bf16.msra.mxu1 %v8183_v2  ;;  %v3935_v2 = vld [vmem:[#allocation6 + $0x6b8] sm:$0xff] }
 0x405   :  { %7015 = vmatprep.subr.bf16.mxu1 %v8192_v24  ;;  %6844 = vmatpush1.bf16.msra.mxu0 %v8189_v38  ;;  %v8239_v24 = vcombine.low %v3923_v5, %v3927_v25  ;;  %v8248_v47 = vcombine.high %v3931_v11, %v3935_v2  ;;  %v3939_v38 = vld [vmem:[#allocation6 + $0x6d8] sm:$0xff]  ;;  %v3978_v5 = vld [vmem:[#allocation6 + $0x810] sm:$0xff] }
 0x406   :  { %6845 = vmatprep.subr.bf16.mxu0 %v8198_v49  ;;  %v8245_v49 = vcombine.low %v3930_v34, %v3934_v54  ;;  %v3982_v25 = vld [vmem:[#allocation6 + $0x830] sm:$0xff] }
 0x407   :  { %v8294_v34 = vcombine.high %v3978_v5, %v3982_v25 }
 0x408   :  { %7016 = vmatpush1.bf16.msra.mxu1 %v8191_v41  ;;  %v3943_v41 = vld [vmem:[#allocation6 + $0x6f8] sm:$0xff] }
 0x409   :  { %7017 = vmatprep.subr.bf16.mxu1 %v8200_v40  ;;  %6846 = vmatpush1.bf16.msra.mxu0 %v8197_v42  ;;  %v8247_v40 = vcombine.low %v3931_v11, %v3935_v2  ;;  %v8256_v36 = vcombine.high %v3939_v38, %v3943_v41  ;;  %v3947_v42 = vld [vmem:[#allocation6 + $0x718] sm:$0xff]  ;;  %v3986_v11 = vld [vmem:[#allocation6 + $0x850] sm:$0xff] }
 0x40a   :  { %6847 = vmatprep.subr.bf16.mxu0 %v8206_v9  ;;  %v8253_v9 = vcombine.low %v3938_v26, %v3942_v57  ;;  %v3990_v2 = vld [vmem:[#allocation6 + $0x870] sm:$0xff] }
 0x40b   :  { %v8302_v26 = vcombine.high %v3986_v11, %v3990_v2  ;;  %v3994_v57 = vld [vmem:[#allocation6 + $0x890] sm:$0xff] }
 0x40c   :  { %7018 = vmatpush1.bf16.msra.mxu1 %v8199_v46  ;;  %v3951_v46 = vld [vmem:[#allocation6 + $0x738] sm:$0xff] }
 0x40d   :  { %7019 = vmatprep.subr.bf16.mxu1 %v8208_v4  ;;  %6848 = vmatpush1.bf16.msra.mxu0 %v8205_v8  ;;  %v8255_v4 = vcombine.low %v3939_v38, %v3943_v41  ;;  %v8264_v53 = vcombine.high %v3947_v42, %v3951_v46  ;;  %v3955_v8 = vld [vmem:[#allocation6 + $0x758] sm:$0xff]  ;;  %v3998_v38 = vld [vmem:[#allocation6 + $0x8b0] sm:$0xff] }
 0x40e   :  { %6849 = vmatprep.subr.bf16.mxu0 %v8214_v14  ;;  %v8261_v14 = vcombine.low %v3946_v0, %v3950_v31  ;;  %v8310_v0 = vcombine.high %v3994_v57, %v3998_v38 }
 0x410   :  { %7020 = vmatpush1.bf16.msra.mxu1 %v8207_v55  ;;  %v3959_v55 = vld [vmem:[#allocation6 + $0x778] sm:$0xff] }
 0x411   :  { %7021 = vmatprep.subr.bf16.mxu1 %v8216_v13  ;;  %6850 = vmatpush1.bf16.msra.mxu0 %v8213_v21  ;;  %v8263_v13 = vcombine.low %v3947_v42, %v3951_v46  ;;  %v8272_v28 = vcombine.high %v3955_v8, %v3959_v55  ;;  %v3963_v21 = vld [vmem:[#allocation6 + $0x798] sm:$0xff]  ;;  %v4002_v42 = vld [vmem:[#allocation6 + $0x8d0] sm:$0xff] }
 0x412   :  { %6851 = vmatprep.subr.bf16.mxu0 %v8222_v29  ;;  %v8269_v29 = vcombine.low %v3954_v44, %v3958_v16  ;;  %v4006_v46 = vld [vmem:[#allocation6 + $0x8f0] sm:$0xff] }
 0x413   :  { %v4010_v16 = vld [vmem:[#allocation6 + $0x910] sm:$0xff] }
 0x414   :  { %7022 = vmatpush1.bf16.msra.mxu1 %v8215_v18  ;;  %v3967_v18 = vld [vmem:[#allocation6 + $0x7b8] sm:$0xff] }
 0x415   :  { %7023 = vmatprep.subr.bf16.mxu1 %v8224_v33  ;;  %6852 = vmatpush1.bf16.msra.mxu0 %v8221_v50  ;;  %v8271_v33 = vcombine.low %v3955_v8, %v3959_v55  ;;  %v8280_v62 = vcombine.high %v3963_v21, %v3967_v18  ;;  %v3971_v50 = vld [vmem:[#allocation6 + $0x7d8] sm:$0xff]  ;;  %v4014_v8 = vld [vmem:[#allocation6 + $0x930] sm:$0xff] }
 0x416   :  { %6853 = vmatprep.subr.bf16.mxu0 %v8230_v20  ;;  %v8277_v20 = vcombine.low %v3962_v23, %v3966_v35  ;;  %v4011_v55 = vld [vmem:[#allocation6 + $0x918] sm:$0xff]  ;;  %v4018_v23 = vld [vmem:[#allocation6 + $0x950] sm:$0xff] }
 0x417   :  { %v4022_v35 = vld [vmem:[#allocation6 + $0x970] sm:$0xff] }
 0x418   :  { %7024 = vmatpush1.bf16.msra.mxu1 %v8223_v32  ;;  %v3975_v32 = vld [vmem:[#allocation6 + $0x7f8] sm:$0xff] }
 0x419   :  { %7025 = vmatprep.subr.bf16.mxu1 %v8232_v51  ;;  %6854 = vmatpush1.bf16.msra.mxu0 %v8229_v52  ;;  %v8279_v51 = vcombine.low %v3963_v21, %v3967_v18  ;;  %v8288_v48 = vcombine.high %v3971_v50, %v3975_v32  ;;  %v3979_v52 = vld [vmem:[#allocation6 + $0x818] sm:$0xff] }
 0x41a   :  { %6855 = vmatprep.subr.bf16.mxu0 %v8238_v60  ;;  %v8285_v60 = vcombine.low %v3970_v61, %v3974_v45  ;;  %v4019_v21 = vld [vmem:[#allocation6 + $0x958] sm:$0xff]  ;;  %v4026_v61 = vld [vmem:[#allocation6 + $0x990] sm:$0xff] }
 0x41b   :  { %v4023_v18 = vld [vmem:[#allocation6 + $0x978] sm:$0xff]  ;;  %v4030_v45 = vld [vmem:[#allocation6 + $0x9b0] sm:$0xff] }
 0x41c   :  { %7026 = vmatpush1.bf16.msra.mxu1 %v8231_v56  ;;  %v3983_v56 = vld [vmem:[#allocation6 + $0x838] sm:$0xff] }
 0x41d   :  { %7027 = vmatprep.subr.bf16.mxu1 %v8240_v22  ;;  %6856 = vmatpush1.bf16.msra.mxu0 %v8237_v59  ;;  %v8287_v22 = vcombine.low %v3971_v50, %v3975_v32  ;;  %v8296_v54 = vcombine.high %v3979_v52, %v3983_v56  ;;  %v8293_v59 = vcombine.low %v3978_v5, %v3982_v25  ;;  %v4027_v50 = vld [vmem:[#allocation6 + $0x998] sm:$0xff]  ;;  %v4034_v5 = vld [vmem:[#allocation6 + $0x9d0] sm:$0xff] }
 0x41e   :  { %6857 = vmatprep.subr.bf16.mxu0 %v8246_v43  ;;  %v3991_v43 = vld [vmem:[#allocation6 + $0x878] sm:$0xff]  ;;  %v4038_v25 = vld [vmem:[#allocation6 + $0x9f0] sm:$0xff] }
 0x41f   :  { %v4031_v32 = vld [vmem:[#allocation6 + $0x9b8] sm:$0xff] }
 0x420   :  { %7028 = vmatpush1.bf16.msra.mxu1 %v8239_v24  ;;  %v3987_v24 = vld [vmem:[#allocation6 + $0x858] sm:$0xff] }
 0x421   :  { %7029 = vmatprep.subr.bf16.mxu1 %v8248_v47  ;;  %6858 = vmatpush1.bf16.msra.mxu0 %v8245_v49  ;;  %v8295_v47 = vcombine.low %v3979_v52, %v3983_v56  ;;  %v8304_v41 = vcombine.high %v3987_v24, %v3991_v43  ;;  %v3995_v49 = vld [vmem:[#allocation6 + $0x898] sm:$0xff] }
 0x422   :  { %6859 = vmatprep.subr.bf16.mxu0 %v8254_v3  ;;  %v8301_v3 = vcombine.low %v3986_v11, %v3990_v2  ;;  %v4035_v52 = vld [vmem:[#allocation6 + $0x9d8] sm:$0xff]  ;;  %v4042_v11 = vld [vmem:[#allocation6 + $0xa10] sm:$0xff] }
 0x423   :  { %v4039_v56 = vld [vmem:[#allocation6 + $0x9f8] sm:$0xff]  ;;  %v4046_v2 = vld [vmem:[#allocation6 + $0xa30] sm:$0xff] }
 0x424   :  { %7030 = vmatpush1.bf16.msra.mxu1 %v8247_v40  ;;  %v3999_v40 = vld [vmem:[#allocation6 + $0x8b8] sm:$0xff] }
 0x425   :  { %7031 = vmatprep.subr.bf16.mxu1 %v8256_v36  ;;  %6860 = vmatpush1.bf16.msra.mxu0 %v8253_v9  ;;  %v8303_v36 = vcombine.low %v3987_v24, %v3991_v43  ;;  %v8312_v31 = vcombine.high %v3995_v49, %v3999_v40  ;;  %v4003_v9 = vld [vmem:[#allocation6 + $0x8d8] sm:$0xff]  ;;  %v8349_v43 = vcombine.low %v4034_v5, %v4038_v25 }
 0x426   :  { %6861 = vmatprep.subr.bf16.mxu0 %v8262_v6  ;;  %v8309_v6 = vcombine.low %v3994_v57, %v3998_v38  ;;  %v4047_v24 = vld [vmem:[#allocation6 + $0xa38] sm:$0xff]  ;;  %v4050_v38 = vld [vmem:[#allocation6 + $0xa50] sm:$0xff] }
 0x428   :  { %7032 = vmatpush1.bf16.msra.mxu1 %v8255_v4  ;;  %v4007_v4 = vld [vmem:[#allocation6 + $0x8f8] sm:$0xff] }
 0x429   :  { %7033 = vmatprep.subr.bf16.mxu1 %v8264_v53  ;;  %6862 = vmatpush1.bf16.msra.mxu0 %v8261_v14  ;;  %v8318_v53 = vcombine.high %v4002_v42, %v4006_v46  ;;  %v8320_v44 = vcombine.high %v4003_v9, %v4007_v4  ;;  %v4015_v14 = vld [vmem:[#allocation6 + $0x938] sm:$0xff] }
 0x42a   :  { %6863 = vmatprep.subr.bf16.mxu0 %v8270_v19  ;;  %v8326_v19 = vcombine.high %v4010_v16, %v4014_v8 }
 0x42c   :  { %7034 = vmatpush1.bf16.msra.mxu1 %v8263_v13  ;;  %v8319_v13 = vcombine.low %v4003_v9, %v4007_v4  ;;  %v4059_v9 = vld [vmem:[#allocation6 + $0xa98] sm:$0xff] }
 0x42d   :  { %7035 = vmatprep.subr.bf16.mxu1 %v8272_v28  ;;  %6864 = vmatpush1.bf16.msra.mxu0 %v8269_v29  ;;  %v8328_v28 = vcombine.high %v4011_v55, %v4015_v14  ;;  %v8325_v29 = vcombine.low %v4010_v16, %v4014_v8  ;;  %v4063_v4 = vld [vmem:[#allocation6 + $0xab8] sm:$0xff]  ;;  %v4066_v16 = vld [vmem:[#allocation6 + $0xad0] sm:$0xff] }
 0x42e   :  { %6865 = vmatprep.subr.bf16.mxu0 %v8278_v37  ;;  %v8334_v37 = vcombine.high %v4018_v23, %v4022_v35  ;;  %v4070_v8 = vld [vmem:[#allocation6 + $0xaf0] sm:$0xff] }
 0x430   :  { %7036 = vmatpush1.bf16.msra.mxu1 %v8271_v33  ;;  %v8327_v33 = vcombine.low %v4011_v55, %v4015_v14  ;;  %v4067_v55 = vld [vmem:[#allocation6 + $0xad8] sm:$0xff] }
 0x431   :  { %7037 = vmatprep.subr.bf16.mxu1 %v8280_v62  ;;  %6866 = vmatpush1.bf16.msra.mxu0 %v8277_v20  ;;  %v8336_v62 = vcombine.high %v4019_v21, %v4023_v18  ;;  %v8333_v20 = vcombine.low %v4018_v23, %v4022_v35  ;;  %v4071_v14 = vld [vmem:[#allocation6 + $0xaf8] sm:$0xff]  ;;  %v4074_v23 = vld [vmem:[#allocation6 + $0xb10] sm:$0xff] }
 0x432   :  { %6867 = vmatprep.subr.bf16.mxu0 %v8286_v39  ;;  %v8342_v39 = vcombine.high %v4026_v61, %v4030_v45  ;;  %v4078_v35 = vld [vmem:[#allocation6 + $0xb30] sm:$0xff] }
 0x434   :  { %7038 = vmatpush1.bf16.msra.mxu1 %v8279_v51  ;;  %v8335_v51 = vcombine.low %v4019_v21, %v4023_v18  ;;  %v4075_v21 = vld [vmem:[#allocation6 + $0xb18] sm:$0xff] }
 0x435   :  { %7039 = vmatprep.subr.bf16.mxu1 %v8288_v48  ;;  %6868 = vmatpush1.bf16.msra.mxu0 %v8285_v60  ;;  %v8344_v48 = vcombine.high %v4027_v50, %v4031_v32  ;;  %v8341_v60 = vcombine.low %v4026_v61, %v4030_v45  ;;  %v4079_v18 = vld [vmem:[#allocation6 + $0xb38] sm:$0xff]  ;;  %v4082_v61 = vld [vmem:[#allocation6 + $0xb50] sm:$0xff] }
 0x436   :  { %6880 = vmatprep.subr.bf16.mxu0 %v8294_v34  ;;  %v8350_v34 = vcombine.high %v4034_v5, %v4038_v25  ;;  %v4086_v45 = vld [vmem:[#allocation6 + $0xb70] sm:$0xff] }
 0x437   :  { %v4090_v5 = vld [vmem:[#allocation6 + $0xb90] sm:$0xff] }
 0x438   :  { %7040 = vmatpush1.bf16.msra.mxu1 %v8287_v22  ;;  %6870 = vmatmul.mubr.bf16.vlgmr.msra.gmra.mrb[32].mxu0 %v10076_v1  ;;  %v8343_v22 = vcombine.low %v4027_v50, %v4031_v32  ;;  %v4083_v50 = vld [vmem:[#allocation6 + $0xb58] sm:$0xff]  ;;  %v4094_v25 = vld [vmem:[#allocation6 + $0xbb0] sm:$0xff] }
 0x439   :  { %7052 = vmatprep.subr.bf16.mxu1 %v8296_v54  ;;  %6881 = vmatpush1.bf16.msra.mxu0 %v8293_v59  ;;  %v8352_v54 = vcombine.high %v4035_v52, %v4039_v56  ;;  %v4043_v59 = vld [vmem:[#allocation6 + $0xa18] sm:$0xff] }
 0x43a   :  { %6912 = vmatprep.mubr.bf16.mxu0 %v10195_v10  ;;  %6882 = vmatprep.subr.bf16.mxu0 %v8302_v26  ;;  %v8358_v26 = vcombine.high %v4042_v11, %v4046_v2  ;;  %v8360_v57 = vcombine.high %v4043_v59, %v4047_v24  ;;  %v4087_v32 = vld [vmem:[#allocation6 + $0xb78] sm:$0xff] }
 0x43b   :  { %7042 = vmatmul.mubr.bf16.vlgmr.msra.gmra.mrb[32].mxu1 %v10076_v1  ;;  %v8311_v1 = vcombine.low %v3995_v49, %v3999_v40  ;;  %v4051_v49 = vld [vmem:[#allocation6 + $0xa58] sm:$0xff] }
 0x43c   :  { %7053 = vmatpush1.bf16.msra.mxu1 %v8295_v47  ;;  %7084 = vmatprep.mubr.bf16.mxu1 %v10195_v10  ;;  %v8317_v10 = vcombine.low %v4002_v42, %v4006_v46  ;;  %v8351_v47 = vcombine.low %v4035_v52, %v4039_v56  ;;  %v4055_v40 = vld [vmem:[#allocation6 + $0xa78] sm:$0xff]  ;;  %v4058_v42 = vld [vmem:[#allocation6 + $0xa90] sm:$0xff] }
 0x43d   :  { %7054 = vmatprep.subr.bf16.mxu1 %v8304_v41  ;;  %6883 = vmatpush1.bf16.msra.mxu0 %v8301_v3  ;;  %v4054_v41 = vld [vmem:[#allocation6 + $0xa70] sm:$0xff]  ;;  %v8357_v3 = vcombine.low %v4042_v11, %v4046_v2  ;;  %v4091_v52 = vld [vmem:[#allocation6 + $0xb98] sm:$0xff] }
 0x43e   :  { %6884 = vmatprep.subr.bf16.mxu0 %v8310_v0  ;;  %v8366_v0 = vcombine.high %v4050_v38, %v4054_v41  ;;  %v4062_v46 = vld [vmem:[#allocation6 + $0xab0] sm:$0xff]  ;;  %v4095_v56 = vld [vmem:[#allocation6 + $0xbb8] sm:$0xff] }
 0x43f   :  { %v4098_v11 = vld [vmem:[#allocation6 + $0xbd0] sm:$0xff] }
 0x440   :  { %7055 = vmatpush1.bf16.msra.mxu1 %v8303_v36  ;;  %v8359_v36 = vcombine.low %v4043_v59, %v4047_v24  ;;  %v4102_v2 = vld [vmem:[#allocation6 + $0xbf0] sm:$0xff]  ;;  %v4099_v59 = vld [vmem:[#allocation6 + $0xbd8] sm:$0xff] }
 0x441   :  { %7056 = vmatprep.subr.bf16.mxu1 %v8312_v31  ;;  %6885 = vmatpush1.bf16.msra.mxu0 %v8309_v6  ;;  %v8368_v31 = vcombine.high %v4051_v49, %v4055_v40  ;;  %v8365_v6 = vcombine.low %v4050_v38, %v4054_v41  ;;  %v4103_v24 = vld [vmem:[#allocation6 + $0xbf8] sm:$0xff]  ;;  %v4106_v38 = vld [vmem:[#allocation6 + $0xc10] sm:$0xff] }
 0x442   :  { %6886 = vmatprep.subr.bf16.mxu0 %v8318_v53  ;;  %v8374_v53 = vcombine.high %v4058_v42, %v4062_v46  ;;  %v4110_v41 = vld [vmem:[#allocation6 + $0xc30] sm:$0xff] }
 0x444   :  { %7057 = vmatpush1.bf16.msra.mxu1 %v8311_v1  ;;  %v8367_v1 = vcombine.low %v4051_v49, %v4055_v40  ;;  %v4107_v49 = vld [vmem:[#allocation6 + $0xc18] sm:$0xff] }
 0x445   :  { %7058 = vmatprep.subr.bf16.mxu1 %v8320_v44  ;;  %6887 = vmatpush1.bf16.msra.mxu0 %v8317_v10  ;;  %v8376_v44 = vcombine.high %v4059_v9, %v4063_v4  ;;  %v8373_v10 = vcombine.low %v4058_v42, %v4062_v46  ;;  %v4111_v40 = vld [vmem:[#allocation6 + $0xc38] sm:$0xff]  ;;  %v4114_v42 = vld [vmem:[#allocation6 + $0xc50] sm:$0xff] }
 0x446   :  { %6888 = vmatprep.subr.bf16.mxu0 %v8326_v19  ;;  %v8382_v19 = vcombine.high %v4066_v16, %v4070_v8  ;;  %v4118_v46 = vld [vmem:[#allocation6 + $0xc70] sm:$0xff] }
 0x448   :  { %7059 = vmatpush1.bf16.msra.mxu1 %v8319_v13  ;;  %v8375_v13 = vcombine.low %v4059_v9, %v4063_v4  ;;  %v4115_v9 = vld [vmem:[#allocation6 + $0xc58] sm:$0xff] }
 0x449   :  { %7060 = vmatprep.subr.bf16.mxu1 %v8328_v28  ;;  %6889 = vmatpush1.bf16.msra.mxu0 %v8325_v29  ;;  %v8384_v28 = vcombine.high %v4067_v55, %v4071_v14  ;;  %v8381_v29 = vcombine.low %v4066_v16, %v4070_v8  ;;  %v4119_v4 = vld [vmem:[#allocation6 + $0xc78] sm:$0xff]  ;;  %v4122_v16 = vld [vmem:[#allocation6 + $0xc90] sm:$0xff] }
 0x44a   :  { %6890 = vmatprep.subr.bf16.mxu0 %v8334_v37  ;;  %v8390_v37 = vcombine.high %v4074_v23, %v4078_v35  ;;  %v4126_v8 = vld [vmem:[#allocation6 + $0xcb0] sm:$0xff] }
 0x44c   :  { %7061 = vmatpush1.bf16.msra.mxu1 %v8327_v33  ;;  %v8383_v33 = vcombine.low %v4067_v55, %v4071_v14  ;;  %v4123_v55 = vld [vmem:[#allocation6 + $0xc98] sm:$0xff] }
 0x44d   :  { %7062 = vmatprep.subr.bf16.mxu1 %v8336_v62  ;;  %6891 = vmatpush1.bf16.msra.mxu0 %v8333_v20  ;;  %v8392_v62 = vcombine.high %v4075_v21, %v4079_v18  ;;  %v8389_v20 = vcombine.low %v4074_v23, %v4078_v35  ;;  %v4127_v14 = vld [vmem:[#allocation6 + $0xcb8] sm:$0xff]  ;;  %v4130_v23 = vld [vmem:[#allocation6 + $0xcd0] sm:$0xff] }
 0x44e   :  { %6892 = vmatprep.subr.bf16.mxu0 %v8342_v39  ;;  %v8398_v39 = vcombine.high %v4082_v61, %v4086_v45  ;;  %v4134_v35 = vld [vmem:[#allocation6 + $0xcf0] sm:$0xff] }
 0x450   :  { %7063 = vmatpush1.bf16.msra.mxu1 %v8335_v51  ;;  %v8391_v51 = vcombine.low %v4075_v21, %v4079_v18  ;;  %v4131_v21 = vld [vmem:[#allocation6 + $0xcd8] sm:$0xff] }
 0x451   :  { %7064 = vmatprep.subr.bf16.mxu1 %v8344_v48  ;;  %6893 = vmatpush1.bf16.msra.mxu0 %v8341_v60  ;;  %v8400_v48 = vcombine.high %v4083_v50, %v4087_v32  ;;  %v8397_v60 = vcombine.low %v4082_v61, %v4086_v45  ;;  %v4135_v18 = vld [vmem:[#allocation6 + $0xcf8] sm:$0xff]  ;;  %v4142_v61 = vld [vmem:[#allocation6 + $0xd30] sm:$0xff] }
 0x452   :  { %6894 = vmatprep.subr.bf16.mxu0 %v8350_v34  ;;  %v8406_v34 = vcombine.high %v4090_v5, %v4094_v25  ;;  %v4139_v45 = vld [vmem:[#allocation6 + $0xd18] sm:$0xff] }
 0x454   :  { %7065 = vmatpush1.bf16.msra.mxu1 %v8343_v22  ;;  %v8399_v22 = vcombine.low %v4083_v50, %v4087_v32  ;;  %v4143_v50 = vld [vmem:[#allocation6 + $0xd38] sm:$0xff]  ;;  %v8445_v32 = vcombine.low %v4130_v23, %v4134_v35 }
 0x455   :  { %7066 = vmatprep.subr.bf16.mxu1 %v8352_v54  ;;  %6895 = vmatpush1.bf16.msra.mxu0 %v8349_v43  ;;  %v8408_v54 = vcombine.high %v4091_v52, %v4095_v56  ;;  %v8405_v43 = vcombine.low %v4090_v5, %v4094_v25  ;;  %v4147_v5 = vld [vmem:[#allocation6 + $0xd58] sm:$0xff] }
 0x456   :  { %6896 = vmatprep.subr.bf16.mxu0 %v8358_v26  ;;  %v8414_v26 = vcombine.high %v4098_v11, %v4102_v2  ;;  %v4151_v25 = vld [vmem:[#allocation6 + $0xd78] sm:$0xff] }
 0x458   :  { %7067 = vmatpush1.bf16.msra.mxu1 %v8351_v47  ;;  %v8407_v47 = vcombine.low %v4091_v52, %v4095_v56  ;;  %v10232_v56 = vld [vmem:[#allocation7] sm:$0xff] }
 0x459   :  { %7068 = vmatprep.subr.bf16.mxu1 %v8360_v57  ;;  %6897 = vmatpush1.bf16.msra.mxu0 %v8357_v3  ;;  %v8416_v57 = vcombine.high %v4099_v59, %v4103_v24  ;;  %v8413_v3 = vcombine.low %v4098_v11, %v4102_v2  ;;  %v4158_v11 = vld [vmem:[#allocation6 + $0xdb0] sm:$0xff]  ;;  %v4173_v2 = vrot.slane %v10232_v56, %v9903_v58 }
 0x45a   :  { %6898 = vmatprep.subr.bf16.mxu0 %v8366_v0  ;;  %v8422_v0 = vcombine.high %v4106_v38, %v4110_v41 }
 0x45c   :  { %7069 = vmatpush1.bf16.msra.mxu1 %v8359_v36  ;;  %v8415_v36 = vcombine.low %v4099_v59, %v4103_v24  ;;  %v4155_v59 = vld [vmem:[#allocation6 + $0xd98] sm:$0xff] }
 0x45d   :  { %7070 = vmatprep.subr.bf16.mxu1 %v8368_v31  ;;  %6899 = vmatpush1.bf16.msra.mxu0 %v8365_v6  ;;  %v8424_v31 = vcombine.high %v4107_v49, %v4111_v40  ;;  %v8421_v6 = vcombine.low %v4106_v38, %v4110_v41  ;;  %v4159_v24 = vld [vmem:[#allocation6 + $0xdb8] sm:$0xff]  ;;  %v8463_v38 = vcombine.low %v4147_v5, %v4151_v25 }
 0x45e   :  { %6900 = vmatprep.subr.bf16.mxu0 %v8374_v53  ;;  %v8430_v53 = vcombine.high %v4114_v42, %v4118_v46 }
 0x460   :  { %7071 = vmatpush1.bf16.msra.mxu1 %v8367_v1  ;;  %v8423_v1 = vcombine.low %v4107_v49, %v4111_v40  ;;  %v4162_v49 = vld [vmem:[#allocation6 + $0xdd0] sm:$0xff] }
 0x461   :  { %7072 = vmatprep.subr.bf16.mxu1 %v8376_v44  ;;  %6901 = vmatpush1.bf16.msra.mxu0 %v8373_v10  ;;  %v8432_v44 = vcombine.high %v4115_v9, %v4119_v4  ;;  %v8429_v10 = vcombine.low %v4114_v42, %v4118_v46  ;;  %v4166_v40 = vld [vmem:[#allocation6 + $0xdf0] sm:$0xff] }
 0x462   :  { %6902 = vmatprep.subr.bf16.mxu0 %v8382_v19  ;;  %v8438_v19 = vcombine.high %v4122_v16, %v4126_v8 }
 0x464   :  { %7073 = vmatpush1.bf16.msra.mxu1 %v8375_v13  ;;  %v8431_v13 = vcombine.low %v4115_v9, %v4119_v4 }
 0x465   :  { %7074 = vmatprep.subr.bf16.mxu1 %v8384_v28  ;;  %6903 = vmatpush1.bf16.msra.mxu0 %v8381_v29  ;;  %v8440_v28 = vcombine.high %v4123_v55, %v4127_v14  ;;  %v8437_v29 = vcombine.low %v4122_v16, %v4126_v8 }
 0x466   :  { %6904 = vmatprep.subr.bf16.mxu0 %v8390_v37  ;;  %v8448_v37 = vcombine.high %v4131_v21, %v4135_v18 }
 0x468   :  { %7075 = vmatpush1.bf16.msra.mxu1 %v8383_v33  ;;  %v8446_v33 = vcombine.high %v4130_v23, %v4134_v35 }
 0x469   :  { %7076 = vmatprep.subr.bf16.mxu1 %v8392_v62  ;;  %6905 = vmatpush1.bf16.msra.mxu0 %v8389_v20  ;;  %v4138_v62 = vld [vmem:[#allocation6 + $0xd10] sm:$0xff]  ;;  %v8447_v20 = vcombine.low %v4131_v21, %v4135_v18 }
 0x46a   :  { %6906 = vmatprep.subr.bf16.mxu0 %v8398_v39  ;;  %v4146_v39 = vld [vmem:[#allocation6 + $0xd50] sm:$0xff]  ;;  %v8453_v52 = vcombine.low %v4138_v62, %v4142_v61 }
 0x46c   :  { %7077 = vmatpush1.bf16.msra.mxu1 %v8391_v51  ;;  %v8454_v51 = vcombine.high %v4138_v62, %v4142_v61 }
 0x46d   :  { %7078 = vmatprep.subr.bf16.mxu1 %v8400_v48  ;;  %6907 = vmatpush1.bf16.msra.mxu0 %v8397_v60  ;;  %v4150_v48 = vld [vmem:[#allocation6 + $0xd70] sm:$0xff]  ;;  %v8455_v60 = vcombine.low %v4139_v45, %v4143_v50 }
 0x46e   :  { %6908 = vmatprep.subr.bf16.mxu0 %v8406_v34  ;;  %v8464_v34 = vcombine.high %v4147_v5, %v4151_v25  ;;  %v9359_v5 = vld [vmem:[#allocation9 + $0x10] sm:$0xff]   ;;  %v9360_v25 = vld [vmem:[#allocation9 + $0x58] sm:$0xff]  }
 0x470   :  { %7079 = vmatpush1.bf16.msra.mxu1 %v8399_v22  ;;  %v8462_v22 = vcombine.high %v4146_v39, %v4150_v48 }
 0x471   :  { %7080 = vmatprep.subr.bf16.mxu1 %v8408_v54  ;;  %6909 = vmatpush1.bf16.msra.mxu0 %v8405_v43  ;;  %v4154_v54 = vld [vmem:[#allocation6 + $0xd90] sm:$0xff]  ;;  %v4181_v43 = vrot.slane %v10232_v56, %v9871_v27 }
 0x472   :  { %6910 = vmatprep.subr.bf16.mxu0 %v8414_v26  ;;  %v8461_v26 = vcombine.low %v4146_v39, %v4150_v48  ;;  %v8470_v41 = vcombine.high %v4154_v54, %v4158_v11  ;;  %v8469_v46 = vcombine.low %v4154_v54, %v4158_v11  ;;  %v9357_v39 = vld [vmem:[#allocation9 + $0x8] sm:$0xff]   ;;  %v9358_v48 = vld [vmem:[#allocation9 + $0x50] sm:$0xff]  }
 0x473   :  { %v9365_v54 = vld [vmem:[#allocation9 + $0x28] sm:$0xff]   ;;  %v9367_v11 = vld [vmem:[#allocation9 + $0x30] sm:$0xff]  }
 0x474   :  { %7081 = vmatpush1.bf16.msra.mxu1 %v8407_v47  ;;  %v4177_v47 = vrot.slane %v10232_v56, %v9951_v12 }
 0x475   :  { %7082 = vmatprep.subr.bf16.mxu1 %v8416_v57  ;;  %6911 = vmatpush1.bf16.msra.mxu0 %v8413_v3  ;;  %v4185_v57 = vrot.slane %v10232_v56, %v9876_v30  ;;  %v8472_v3 = vcombine.high %v4155_v59, %v4159_v24  ;;  %v8471_v30 = vcombine.low %v4155_v59, %v4159_v24  ;;  %v9369_v59 = vld [vmem:[#allocation9 + $0x38] sm:$0xff]   ;;  %v9370_v24 = vld [vmem:[#allocation12] sm:$0xff]  }
 0x476   :  { %6923 = vmatprep.subr.bf16.mxu0 %v8422_v0  ;;  %v4167_v0 = vld [vmem:[#allocation6 + $0xdf8] sm:$0xff] }
 0x478   :  { %7083 = vmatpush1.bf16.msra.mxu1 %v8415_v36  ;;  %6913 = vmatmul.mubr.bf16.vlgmr.msra.gmra.mrb[32].mxu0 %v10199_v17  ;;  %v4163_v36 = vld [vmem:[#allocation6 + $0xdd8] sm:$0xff] }
 0x479   :  { %7095 = vmatprep.subr.bf16.mxu1 %v8424_v31  ;;  %6924 = vmatpush1.bf16.msra.mxu0 %v8421_v6 }
 0x47a   :  { %6925 = vmatprep.subr.bf16.mxu0 %v8430_v53  ;;  %6955 = vmatprep.mubr.bf16.mxu0 %v9638_v63 }
 0x47b   :  { %7085 = vmatmul.mubr.bf16.vlgmr.msra.gmra.mrb[32].mxu1 %v10199_v17  ;;  %v8439_v17 = vcombine.low %v4123_v55, %v4127_v14  ;;  %v8480_v14 = vcombine.high %v4163_v36, %v4167_v0 }
 0x47c   :  { %7096 = vmatpush1.bf16.msra.mxu1 %v8423_v1  ;;  %7127 = vmatprep.mubr.bf16.mxu1 %v9638_v63  ;;  %v8456_v63 = vcombine.high %v4139_v45, %v4143_v50  ;;  %v8478_v1 = vcombine.high %v4162_v49, %v4166_v40  ;;  %v8479_v45 = vcombine.low %v4163_v36, %v4167_v0  ;;  %v9354_v50 = vld [vmem:[#allocation9 + $0x40] sm:$0xff]   ;;  %v10309_v0 = vld [vmem:[#allocation26_spill] sm:$0xff] }
 0x47d   :  { %7097 = vmatprep.subr.bf16.mxu1 %v8432_v44  ;;  %6926 = vmatpush1.bf16.msra.mxu0 %v8429_v10 }
 0x47e   :  { %6927 = vmatprep.subr.bf16.mxu0 %v8438_v19 }
 0x480   :  { %7098 = vmatpush1.bf16.msra.mxu1 %v8431_v13 }
 0x481   :  { %7099 = vmatprep.subr.bf16.mxu1 %v8440_v28  ;;  %6928 = vmatpush1.bf16.msra.mxu0 %v8437_v29 }
 0x482   :  { %6929 = vmatprep.subr.bf16.mxu0 %v8446_v33 }
 0x484   :  { %7100 = vmatpush1.bf16.msra.mxu1 %v8439_v17 }
 0x485   :  { %7101 = vmatprep.subr.bf16.mxu1 %v8448_v37  ;;  %6930 = vmatpush1.bf16.msra.mxu0 %v8445_v32  ;;  %v8477_v37 = vcombine.low %v4162_v49, %v4166_v40  ;;  %v4189_v49 = vrot.slane %v10232_v56, %v9906_v15  ;;  %v10307_v40 = vld [vmem:[#allocation24_spill] sm:$0xff] }
 0x486   :  { %6931 = vmatprep.subr.bf16.mxu0 %v8454_v51  ;;  %v9355_v51 = vld [vmem:[#allocation9] sm:$0xff]  }
 0x488   :  { %7102 = vmatpush1.bf16.msra.mxu1 %v8447_v20 }
 0x489   :  { %7103 = vmatprep.subr.bf16.mxu1 %v8456_v63  ;;  %6932 = vmatpush1.bf16.msra.mxu0 %v8453_v52  ;;  %v9356_v63 = vld [vmem:[#allocation9 + $0x48] sm:$0xff]   ;;  %v9361_v52 = vld [vmem:[#allocation9 + $0x18] sm:$0xff]  }
 0x48a   :  { %6933 = vmatprep.subr.bf16.mxu0 %v8462_v22  ;;  %v9363_v22 = vld [vmem:[#allocation9 + $0x20] sm:$0xff]  }
 0x48b   :  { %v6613_v58 = vpop.f32.mrb[28].mxu0 }
 0x48c   :  { %7104 = vmatpush1.bf16.msra.mxu1 %v8455_v60  ;;  %v8596_v31 = vadd.f32 %v6613_v58, %v4173_v2  ;;  %v6615_v42 = vpop.f32.mrb[29].mxu0  ;;  %v9362_v60 = vld [vmem:[#allocation9 + $0x60] sm:$0xff]   ;;  %v4197_v58 = vrot.slane %v10232_v56, %v10307_v40 }
 0x48d   :  { %7105 = vmatprep.subr.bf16.mxu1 %v8464_v34  ;;  %v8597_v9 = vadd.f32 %v6615_v42, %v4177_v47  ;;  %v6617_v6 = vpop.f32.mrb[30].mxu0  ;;  %6934 = vmatpush1.bf16.msra.mxu0 %v8461_v26  ;;  %v9364_v34 = vld [vmem:[#allocation9 + $0x68] sm:$0xff]   ;;  %v9372_v26 = vld [vmem:[#allocation12 + $0x10] sm:$0xff]  }
 0x48e   :  { %v6785_v27 = vpop.f32.mrb[28].mxu1  ;;  %v7138_v53 = vmax.f32 %v8596_v31, 0.0  ;;  %v8598_v16 = vadd.f32 %v6617_v6, %v4173_v2  ;;  %v6619_v55 = vpop.f32.mrb[31].mxu0  ;;  %6935 = vmatprep.subr.bf16.mxu0 %v8470_v41  ;;  %v9368_v2 = vld [vmem:[#allocation9 + $0x78] sm:$0xff]   ;;  %v9375_v41 = vld [vmem:[#allocation12 + $0x28] sm:$0xff]   ;;  %v4201_v31 = vrot.slane %v10232_v56, %v10309_v0 }
 0x48f   :  { %v8600_v12 = vadd.f32 %v6785_v27, %v4181_v43  ;;  %v6787_v4 = vpop.f32.mrb[29].mxu1  ;;  %v7139_v13 = vmax.f32 %v8597_v9, 0.0  ;;  %v8599_v28 = vadd.f32 %v6619_v55, %v4177_v47  ;;  %v9371_v47 = vld [vmem:[#allocation12 + $0x8] sm:$0xff]  }
 0x490   :  { %v8601_v44 = vadd.f32 %v6787_v4, %v4185_v57  ;;  %v6789_v8 = vpop.f32.mrb[30].mxu1  ;;  %7106 = vmatpush1.bf16.msra.mxu1 %v8463_v38  ;;  %v7146_v21 = vmax.f32 %v8598_v16, 0.0  ;;  %v9374_v38 = vld [vmem:[#allocation12 + $0x20] sm:$0xff]  }
 0x491   :  { %v7140_v10 = vmax.f32 %v8600_v12, 0.0  ;;  %v8602_v19 = vadd.f32 %v6789_v8, %v4181_v43  ;;  %v6791_v23 = vpop.f32.mrb[31].mxu1  ;;  %7107 = vmatprep.subr.bf16.mxu1 %v8472_v3  ;;  %v7147_v33 = vmax.f32 %v8599_v28, 0.0  ;;  %6936 = vmatpush1.bf16.msra.mxu0 %v8469_v46  ;;  %v9639_v43 = vmov 0.0   ;;  %v10308_v3 = vld [vmem:[#allocation25_spill] sm:$0xff] }
 0x492   :  { %v7141_v35 = vmax.f32 %v8601_v44, 0.0  ;;  %v8603_v18 = vadd.f32 %v6791_v23, %v4185_v57  ;;  %6937 = vmatprep.subr.bf16.mxu0 %v8478_v1  ;;  %v9373_v57 = vld [vmem:[#allocation12 + $0x18] sm:$0xff]   ;;  %v4193_v36 = vrot.slane %v10232_v56, %v10308_v3 }
 0x493   :  { %v10242_v29 = vmax.f32 %v7138_v53, %v7140_v10  ;;  %v7148_v17 = vmax.f32 %v8602_v19, 0.0 }
 0x494   :  { %v10244_v62 = vmax.f32 %v7139_v13, %v7141_v35  ;;  %v7149_v61 = vmax.f32 %v8603_v18, 0.0  ;;  %7108 = vmatpush1.bf16.msra.mxu1 %v8471_v30 }
 0x495   :  { %v10246_v32 = vmax.f32 %v7146_v21, %v7148_v17  ;;  %7109 = vmatprep.subr.bf16.mxu1 %v8480_v14  ;;  %6938 = vmatpush1.bf16.msra.mxu0 %v8477_v37 }
 0x496   :  { %v10248_v20 = vmax.f32 %v7147_v33, %v7149_v61  ;;  %8516 = vmatprep.subr.bf16.mxu0 %v9354_v50 }
 0x498   :  { %7110 = vmatpush1.bf16.msra.mxu1 %v8479_v45  ;;  %6956 = vmatmul.mubr.bf16.vlgmr.msra.gmra.mrb[32].mxu0 %v10201_v7 }
 0x499   :  { %8517 = vmatpush3.bf16.msra.mxu0 %v9355_v51  ;;  %8556 = vmatprep.subr.bf16.mxu1 %v9639_v43 }
 0x49a   :  { %8518 = vmatprep.subr.bf16.mxu0 %v9356_v63 }
 0x49b   :  { %7128 = vmatmul.mubr.bf16.vlgmr.msra.gmra.mrb[32].mxu1 %v10201_v7  ;;  %v9366_v7 = vld [vmem:[#allocation9 + $0x70] sm:$0xff]  }
 0x49c   :  { %8557 = vmatpush3.bf16.msra.mxu1 %v9370_v24  ;;  %8572 = vmatprep.mubr.msk.bf16.mxu1 %vm9640_vm0, %v9639_v43 }
 0x49d   :  { %8519 = vmatpush3.bf16.msra.mxu0 %v9357_v39  ;;  %8558 = vmatprep.subr.bf16.mxu1 %v9639_v43 }
 0x49e   :  { %8520 = vmatprep.subr.bf16.mxu0 %v9358_v48  ;;  %v9376_v48 = vld [vmem:[#allocation12 + $0x30] sm:$0xff]  }
 0x4a0   :  { %8559 = vmatpush3.bf16.msra.mxu1 %v9371_v47  ;;  %v9383_v47 = vld [vmem:[#allocation15 + $0x28] sm:$0xff]  }
 0x4a1   :  { %8521 = vmatpush3.bf16.msra.mxu0 %v9359_v5  ;;  %8560 = vmatprep.subr.bf16.mxu1 %v9639_v43  ;;  %v9377_v5 = vld [vmem:[#allocation12 + $0x38] sm:$0xff]  }
 0x4a2   :  { %8522 = vmatprep.subr.bf16.mxu0 %v9360_v25  ;;  %v9382_v25 = vld [vmem:[#allocation15 + $0x20] sm:$0xff]  }
 0x4a4   :  { %8561 = vmatpush3.bf16.msra.mxu1 %v9372_v26  ;;  %v9384_v26 = vld [vmem:[#allocation15 + $0x30] sm:$0xff]  }
 0x4a5   :  { %8523 = vmatpush3.bf16.msra.mxu0 %v9361_v52  ;;  %8562 = vmatprep.subr.bf16.mxu1 %v9639_v43 }
 0x4a6   :  { %8524 = vmatprep.subr.bf16.mxu0 %v9362_v60 }
 0x4a8   :  { %8563 = vmatpush3.bf16.msra.mxu1 %v9373_v57  ;;  %v9385_v57 = vld [vmem:[#allocation15 + $0x38] sm:$0xff]  }
 0x4a9   :  { %8525 = vmatpush3.bf16.msra.mxu0 %v9363_v22  ;;  %8564 = vmatprep.subr.bf16.mxu1 %v9639_v43 }
 0x4aa   :  { %8526 = vmatprep.subr.bf16.mxu0 %v9364_v34 }
 0x4ac   :  { %8565 = vmatpush3.bf16.msra.mxu1 %v9374_v38  ;;  %v8498_v38 = vld [vmem:[#allocation13] ss:$0 sm:$0xff] }
 0x4ad   :  { %8527 = vmatpush3.bf16.msra.mxu0 %v9365_v54  ;;  %8566 = vmatprep.subr.bf16.mxu1 %v9639_v43  ;;  %v8481_v54 = vld [vmem:[#allocation10] ss:$0 sm:$0xff] }
 0x4ae   :  { %8528 = vmatprep.subr.bf16.mxu0 %v9366_v7 }
 0x4b0   :  { %8567 = vmatpush3.bf16.msra.mxu1 %v9375_v41 }
 0x4b1   :  { %8529 = vmatpush3.bf16.msra.mxu0 %v9367_v11  ;;  %8568 = vmatprep.subr.bf16.mxu1 %v9639_v43 }
 0x4b2   :  { %8530 = vmatprep.subr.bf16.mxu0 %v9368_v2 }
 0x4b4   :  { %8569 = vmatpush3.bf16.msra.mxu1 %v9376_v48 }
 0x4b5   :  { %8531 = vmatpush3.bf16.msra.mxu0 %v9369_v59  ;;  %8570 = vmatprep.subr.bf16.mxu1 %v9639_v43 }
 0x4b6   :  { %8576 = vmatprep.subr.bf16.mxu0 %v9639_v43 }
 0x4b8   :  { %8571 = vmatpush3.bf16.msra.mxu1 %v9377_v5 }
 0x56b   :  { %v6957_v27 = vpop.f32.mrb[32].mxu0 }
 0x56c   :  { %v8604_v42 = vadd.f32 %v6957_v27, %v4189_v49  ;;  %v6959_v12 = vpop.f32.mrb[33].mxu0 }
 0x56d   :  { %v8605_v4 = vadd.f32 %v6959_v12, %v4193_v36  ;;  %v6961_v30 = vpop.f32.mrb[34].mxu0 }
 0x56e   :  { %v7129_v46 = vpop.f32.mrb[32].mxu1  ;;  %v7142_v1 = vmax.f32 %v8604_v42, 0.0  ;;  %v8606_v15 = vadd.f32 %v6961_v30, %v4189_v49  ;;  %v6963_v16 = vpop.f32.mrb[35].mxu0 }
 0x56f   :  { %v8608_v9 = vadd.f32 %v7129_v46, %v4197_v58  ;;  %v7131_v6 = vpop.f32.mrb[33].mxu1  ;;  %v7143_v55 = vmax.f32 %v8605_v4, 0.0  ;;  %v8607_v10 = vadd.f32 %v6963_v16, %v4193_v36  ;;  %v8507_v46 = vld [vmem:[#allocation16] ss:$0 sm:$0xff] }
 0x570   :  { %v8609_v53 = vadd.f32 %v7131_v6, %v4201_v31  ;;  %v7133_v44 = vpop.f32.mrb[34].mxu1  ;;  %v7150_v56 = vmax.f32 %v8606_v15, 0.0 }
 0x571   :  { %v7144_v8 = vmax.f32 %v8608_v9, 0.0  ;;  %v8610_v14 = vadd.f32 %v7133_v44, %v4197_v58  ;;  %v7135_v13 = vpop.f32.mrb[35].mxu1  ;;  %v7151_v21 = vmax.f32 %v8607_v10, 0.0 }
 0x572   :  { %v7145_v19 = vmax.f32 %v8609_v53, 0.0  ;;  %v8611_v28 = vadd.f32 %v7135_v13, %v4201_v31 }
 0x573   :  { %v7158_v23 = vmax.f32 %v7142_v1, %v7144_v8  ;;  %v7152_v35 = vmax.f32 %v8610_v14, 0.0 }
 0x574   :  { %v7159_v18 = vmax.f32 %v7143_v55, %v7145_v19  ;;  %v7153_v17 = vmax.f32 %v8611_v28, 0.0 }
 0x575   :  { %v7162_v33 = vmax.f32 %v10242_v29, %v7158_v23  ;;  %v7160_v37 = vmax.f32 %v7150_v56, %v7152_v35  ;;  %v9378_v29 = vld [vmem:[#allocation15] sm:$0xff]  }
 0x576   :  { %v7163_v61 = vmax.f32 %v10244_v62, %v7159_v18  ;;  %v7161_v45 = vmax.f32 %v7151_v21, %v7153_v17  ;;  %v9379_v62 = vld [vmem:[#allocation15 + $0x8] sm:$0xff]  }
 0x577   :  { %v7164_v50 = vmax.f32 %v10246_v32, %v7160_v37  ;;  %v9380_v32 = vld [vmem:[#allocation15 + $0x10] sm:$0xff]  }
 0x578   :  { %v7165_v51 = vmax.f32 %v10248_v20, %v7161_v45  ;;  %v9381_v20 = vld [vmem:[#allocation15 + $0x18] sm:$0xff]  }
 0x579   :  { %v7166_v63 = vpack.c.bf16 %v7164_v50, %v7162_v33 }
 0x57a   :  { %v7167_v39 = vpack.c.bf16 %v7165_v51, %v7163_v61 }
 0x57c   :  { %7335 = vmatprep.mubr.bf16.mxu0 %v7167_v39 }
 0x57d   :  { %7336 = vmatmul.mubr.bf16.vlgmr.msra.gmra.mrb[36].mxu0 %v7166_v63 }
 0x57e   :  { %8592 = vmatprep.mubr.msk.bf16.mxu0 %vm9640_vm0, %v9639_v43  ;;  %8577 = vmatpush3.bf16.msra.mxu0 %v9378_v29 }
 0x57f   :  { %8578 = vmatprep.subr.bf16.mxu0 %v9639_v43 }
 0x582   :  { %8579 = vmatpush3.bf16.msra.mxu0 %v9379_v62 }
 0x583   :  { %8580 = vmatprep.subr.bf16.mxu0 %v9639_v43 }
 0x586   :  { %8581 = vmatpush3.bf16.msra.mxu0 %v9380_v32 }
 0x587   :  { %8582 = vmatprep.subr.bf16.mxu0 %v9639_v43 }
 0x58a   :  { %8583 = vmatpush3.bf16.msra.mxu0 %v9381_v20 }
 0x58b   :  { %8584 = vmatprep.subr.bf16.mxu0 %v9639_v43 }
 0x58e   :  { %8585 = vmatpush3.bf16.msra.mxu0 %v9382_v25 }
 0x58f   :  { %8586 = vmatprep.subr.bf16.mxu0 %v9639_v43 }
 0x592   :  { %8587 = vmatpush3.bf16.msra.mxu0 %v9383_v47 }
 0x593   :  { %8588 = vmatprep.subr.bf16.mxu0 %v9639_v43 }
 0x596   :  { %8589 = vmatpush3.bf16.msra.mxu0 %v9384_v26 }
 0x597   :  { %8590 = vmatprep.subr.bf16.mxu0 %v9639_v43 }
 0x59a   :  { %8591 = vmatpush3.bf16.msra.mxu0 %v9385_v57 }
 0x650   :  { %v8532_v52 = vpop.f32.mrb[36].mxu0 }
 0x651   :  { %v8533_v60 = vpop.f32.mrb[37].mxu0 }
 0x652   :  { %v8534_v22 = vadd.f32 %v8533_v60, %v8532_v52  ;;  %v8535_v34 = vpop.f32.mrb[38].mxu0 }
 0x653   :  { %v8536_v7 = vpop.f32.mrb[39].mxu0 }
 0x654   :  { %v8537_v11 = vadd.f32 %v8536_v7, %v8535_v34  ;;  %v7338_v2 = vadd.f32 %v8534_v22, %v8481_v54 }
 0x656   :  { %v7341_v59 = vadd.f32 %v8537_v11, %v8481_v54 }
 0x658   :  { %v7344_v24 = vpack.c.bf16 %v7341_v59, %v7338_v2 }
 0x65a   :  { %8573 = vmatmul.mubr.bf16.vlgmr.msra.gmra.mrb[36].mxu1 %v7344_v24 }
 0x72d   :  { %v7450_v41 = vpop.f32.mrb[36].mxu1 }
 0x72e   :  { %v7451_v49 = vadd.f32 %v8498_v38, %v7450_v41  ;;  %v8574_v40 = vpop.f32.mrb[37].mxu1 }
 0x72f   :  { %v7453_v58 = vpop.f32.mrb[38].mxu1 }
 0x730   :  { %v7454_v3 = vadd.f32 %v8498_v38, %v7453_v58  ;;  %v8575_v36 = vpop.f32.mrb[39].mxu1  ;;  %v7457_v0 = vmax.f32 %v7451_v49, 0.0 }
 0x732   :  { %v7458_v31 = vmax.f32 %v7454_v3, 0.0 }
 0x734   :  { %v7459_v27 = vsub.f32 %v7457_v0, %v7458_v31 }
 0x736   :  { %v7460_v42 = vpack.c.bf16 %v7459_v27, %v7459_v27 }
 0x738   :  { %8593 = vmatmul.mubr.bf16.vlgmr.msra.gmra.mrb[40].mxu0 %v7460_v42 }
 0x80b   :  { %v7566_v12 = vpop.f32.mrb[40].mxu0 }
 0x80c   :  { %v7567_v9 = vadd.f32 %v8507_v46, %v7566_v12  ;;  %v8594_v4 = vpop.f32.mrb[41].mxu0 }
 0x80d   :  { %v7569_v6 = vpop.f32.mrb[42].mxu0 }
 0x80e   :  { %7572 = vst [vmem:[%s10296_s11] sm:$0xff] %v7567_v9  ;;  %v8595_v43 = vpop.f32.mrb[43].mxu0 }
 0x80f   :  { %7577 = vsyncpa [#allocation3], 1 }
 0x810   :  { %7578 = vsyncpa [#allocation5], 1 }
 0x811   :  { %7579 = vsyncpa [#allocation8], 1 }
 0x812   :  { %7580 = vsyncpa [#allocation11], 1 }
 0x813   :  { %7581 = vsyncpa [#allocation14], 1 }
 0x814   :  { %7582 = vsyncpa [#allocation17], 1 }

</bundles_post_ra>
